<compile_context>
chip_gen: v5e
topology: v5e:2x2
jax: 0.10.0
libtpu: 0.0.40
codegen_flags: <defaults>
</compile_context>

<pallas_src>
import functools

import jax
import jax.numpy as jnp
import numpy as np
from jax.experimental import pallas as pl
from jax.experimental.pallas import tpu as pltpu

_LANE = 128


# ---------------------------------------------------------------------------
# Tiling helpers / generation-aware targets
# ---------------------------------------------------------------------------
def _round_up(x, m):
    return ((x + m - 1) // m) * m


def _pick_tile(dim, target, align):
    """Largest multiple of `align` that divides `dim` and is <= target.
    Falls back to the full dimension (a full-dim block is always legal)."""
    if dim <= target:
        return dim
    t = (target // align) * align
    while t >= align:
        if dim % t == 0:
            return t
        t -= align
    return dim


def _vmem_capacity_bytes():
    try:
        cap = getattr(pltpu.get_tpu_info(), "vmem_capacity_bytes", None)
        if cap:
            return int(cap)
    except Exception:
        pass
    return 64 * 1024 * 1024  # conservative fallback (v7x per-TC VMEM)


def _select_tiling():
    cap = _vmem_capacity_bytes()
    if cap >= 100 * 1024 * 1024:
        # v5e / v6e (128 MiB VMEM): big token tiles push the weight-stream
        # arithmetic intensity (~tT FLOP/byte) above the MXU/HBM crossover.
        return 1024, 512, 100 * 1024 * 1024
    # v7x (64 MiB per-TC VMEM): tT=512 / tF=256 keeps intensity above the
    # ~310 FLOP/byte crossover while leaving Mosaic internal-scratch headroom
    # well below physical VMEM.
    return 512, 256, min(int(cap * 0.85), 56 * 1024 * 1024)


_TT_TARGET, _TF_TARGET, _VMEM_LIMIT = _select_tiling()


# ---------------------------------------------------------------------------
# Grouped-expert MoE kernel
# ---------------------------------------------------------------------------
def _moe_grouped_kernel(expert_ref, active_ref, x_ref, w13_ref, w2_ref, rw_ref,
                        out_ref, acc_ref):
    # grid = (token-group tiles g [expert-sorted], F tiles f); out/acc resident
    # across f, expert weights streamed per (g, f).
    g = pl.program_id(0)
    f = pl.program_id(1)
    nf = pl.num_programs(1)

    @pl.when(f == 0)
    def _init():
        acc_ref[...] = jnp.zeros_like(acc_ref)

    # Skip trailing all-padding tiles (their output rows are never read back).
    @pl.when(active_ref[g] > 0)
    def _compute():
        x = x_ref[...]                                                   # (tT, H) bf16
        h = jnp.dot(x, w13_ref[0], preferred_element_type=jnp.float32)   # (tT, 2*tF)
        tf = h.shape[-1] // 2
        h1 = h[:, :tf]
        h3 = h[:, tf:]
        act = (h1 * jax.nn.sigmoid(h1)) * h3                             # SiLU(w1 x)*(w3 x)
        act = act * rw_ref[...]            # routing weight in f32, before the bf16 cast
        acc_ref[...] += jnp.dot(act.astype(x.dtype), w2_ref[0],
                                preferred_element_type=jnp.float32)      # (tT, H) f32

    @pl.when(f == nf - 1)
    def _finalize():
        out_ref[...] = acc_ref[...].astype(out_ref.dtype)                # in-kernel cast


# ---------------------------------------------------------------------------
# One-time weight preparation ("load time", NOT part of the per-call forward)
# ---------------------------------------------------------------------------
def prepare_params(params):
    E, F, H = params["w1"].shape
    tF = _pick_tile(F, _TF_TARGET, _LANE)
    nF = F // tF
    w1t = jnp.transpose(params["w1"], (0, 2, 1)).astype(jnp.bfloat16)    # (E, H, F)
    w3t = jnp.transpose(params["w3"], (0, 2, 1)).astype(jnp.bfloat16)    # (E, H, F)
    # Fuse w1/w3, interleaved per F-tile so the streamed (1, H, 2*tF) block f
    # holds [w1 tile f | w3 tile f] -> a single up-projection matmul per step.
    w13 = jnp.stack([w1t.reshape(E, H, nF, tF),
                     w3t.reshape(E, H, nF, tF)], axis=3).reshape(E, H, 2 * F)
    return {
        "gate_t": params["gate"].T.astype(jnp.bfloat16),                 # (H, E)
        "w13t": w13,                                                     # (E, H, 2F) bf16
        "w2t": jnp.transpose(params["w2"], (0, 2, 1)).astype(jnp.bfloat16),  # (E, F, H)
        "tF": tF,
    }


# ---------------------------------------------------------------------------
# Forward (mirrors PrunableMixtralSparseMoeBlockWrapper.forward)
# ---------------------------------------------------------------------------
def mixtral_moe_forward(hidden_states, prepared, *, top_k=2, experts_to_drop=None,
                        tT_max=None):
    """Returns (final_hidden_states, router_logits) like the PyTorch module."""
    if experts_to_drop is not None:
        experts_to_drop = tuple(int(e) for e in experts_to_drop)
        if len(experts_to_drop) == 0:
            experts_to_drop = None
    return _forward(hidden_states, prepared["gate_t"], prepared["w13t"],
                    prepared["w2t"], top_k=top_k, experts_to_drop=experts_to_drop,
                    tF=prepared["tF"], tT_max=tT_max)


@functools.partial(jax.jit,
                   static_argnames=("top_k", "experts_to_drop", "tF", "tT_max"))
def _forward(hidden_states, gate_t, w13t, w2t, *, top_k, experts_to_drop, tF, tT_max):
    B, S, H = hidden_states.shape
    T = B * S
    E = gate_t.shape[1]
    F = w2t.shape[1]
    nF = F // tF

    x_bf = hidden_states.reshape(T, H).astype(jnp.bfloat16)

    # ---- router (plain XLA: negligible FLOPs; avoids an extra kernel launch) ----
    router_logits = jnp.dot(x_bf, gate_t, preferred_element_type=jnp.float32)  # (T, E)
    if experts_to_drop is not None:
        drop = jnp.zeros((E,), bool).at[
            jnp.asarray(experts_to_drop, jnp.int32)].set(True)
        router_logits = jnp.where(drop[None, :], -jnp.inf, router_logits)

    # ---- routing: softmax + top-k + renormalize ----
    probs = jax.nn.softmax(router_logits, axis=-1)
    top_w, top_idx = jax.lax.top_k(probs, top_k)                         # (T, k)
    top_w = top_w / jnp.sum(top_w, axis=-1, keepdims=True)

    # ---- megablox-style token grouping: sort assignments by expert ----
    A = T * top_k
    flat_expert = top_idx.reshape(A).astype(jnp.int32)
    flat_token = jnp.repeat(jnp.arange(T, dtype=jnp.int32), top_k)
    flat_weight = top_w.reshape(A).astype(jnp.float32)

    order = jnp.argsort(flat_expert)
    sorted_expert = flat_expert[order]
    sorted_token = flat_token[order]
    sorted_weight = flat_weight[order]

    # Token-tile size: generation target, optional cap, sublane aligned.
    tT = _TT_TARGET if tT_max is None else max(16, min(_TT_TARGET, int(tT_max)))
    tT = min(tT, _round_up(A, 16))
    tT = max(16, (tT // 16) * 16)

    nG = pl.cdiv(A, tT) + E          # worst case: every group padded to a tile edge
    cap = nG * tT

    group_sizes = jnp.bincount(flat_expert, length=E).astype(jnp.int32)      # (E,)
    padded_sizes = ((group_sizes + tT - 1) // tT) * tT
    zero = jnp.zeros((1,), jnp.int32)
    padded_starts = jnp.concatenate([zero, jnp.cumsum(padded_sizes)[:-1]])
    group_starts = jnp.concatenate([zero, jnp.cumsum(group_sizes)[:-1]])
    shift = padded_starts - group_starts                                     # (E,)
    dest = jnp.arange(A, dtype=jnp.int32) + shift[sorted_expert]             # (A,)

    row_token = jnp.zeros((cap,), jnp.int32).at[dest].set(sorted_token)
    row_weight = jnp.zeros((cap,), jnp.float32).at[dest].set(sorted_weight)
    row_valid = jnp.zeros((cap,), jnp.int32).at[dest].set(1)

    x_grouped = x_bf[row_token]               # (cap, H) bf16; pad rows carry weight 0
    rw_grouped = row_weight[:, None]          # (cap, 1) f32

    padded_ends = jnp.cumsum(padded_sizes)                                   # (E,)
    tile_starts = jnp.arange(nG, dtype=jnp.int32) * tT
    tile_active = (row_valid.reshape(nG, tT).sum(axis=1) > 0).astype(jnp.int32)
    tile_expert = jnp.minimum(
        jnp.sum(tile_starts[:, None] >= padded_ends[None, :], axis=1),
        E - 1).astype(jnp.int32)
    tile_expert = tile_expert * tile_active   # inactive trailing tiles -> block 0

    # ---- grouped expert MLPs (Pallas) ----
    y_grouped = pl.pallas_call(
        _moe_grouped_kernel,
        out_shape=jax.ShapeDtypeStruct((cap, H), hidden_states.dtype),
        grid_spec=pltpu.PrefetchScalarGridSpec(
            num_scalar_prefetch=2,                  # tile_expert, tile_active -> SMEM
            grid=(nG, nF),
            in_specs=[
                # x and routing weights: resident across the F-tile reduction.
                pl.BlockSpec((tT, H), lambda g, f, te, av: (g, 0)),
                # fused [w1|w3]^T and w2^T streams; inactive trailing tiles pin
                # their weight blocks to a constant block so they cost <=1 DMA.
                pl.BlockSpec((1, H, 2 * tF),
                             lambda g, f, te, av: (te[g], 0, f * av[g])),
                pl.BlockSpec((1, tF, H),
                             lambda g, f, te, av: (te[g], f * av[g], 0)),
                pl.BlockSpec((tT, 1), lambda g, f, te, av: (g, 0)),
            ],
            out_specs=pl.BlockSpec((tT, H), lambda g, f, te, av: (g, 0)),
            scratch_shapes=[pltpu.VMEM((tT, H), jnp.float32)],
        ),
        compiler_params=pltpu.CompilerParams(
            dimension_semantics=("arbitrary", "arbitrary"),
            vmem_limit_bytes=_VMEM_LIMIT,
        ),
    )(tile_expert, tile_active, x_grouped, w13t, w2t, rw_grouped)

    # ---- un-group: sum each token's top_k (already-weighted) expert outputs ----
    pos = jnp.zeros((A,), jnp.int32).at[order].set(dest)
    final = y_grouped[pos].reshape(T, top_k, H).sum(axis=1)
    final = final.astype(hidden_states.dtype).reshape(B, S, H)
    return final, router_logits.astype(hidden_states.dtype)


# ---------------------------------------------------------------------------
# Pure-JAX reference (same math & same bf16-operand / f32-accumulate precision)
# ---------------------------------------------------------------------------
@functools.partial(jax.jit, static_argnames=("top_k", "experts_to_drop"))
def _reference(hidden_states, params, *, top_k=2, experts_to_drop=None):
    B, S, H = hidden_states.shape
    E, F, _ = params["w1"].shape
    xb = hidden_states.reshape(-1, H).astype(jnp.bfloat16)
    logits = jnp.dot(xb, params["gate"].T.astype(jnp.bfloat16),
                     preferred_element_type=jnp.float32)
    if experts_to_drop is not None:
        drop = jnp.zeros((E,), bool).at[
            jnp.asarray(experts_to_drop, jnp.int32)].set(True)
        logits = jnp.where(drop[None, :], -jnp.inf, logits)
    probs = jax.nn.softmax(logits, axis=-1)
    top_w, top_idx = jax.lax.top_k(probs, top_k)
    top_w = top_w / jnp.sum(top_w, axis=-1, keepdims=True)
    onehot = jax.nn.one_hot(top_idx, E, dtype=jnp.float32)               # (T, k, E)
    rw = jnp.einsum("tke,tk->et", onehot, top_w)                         # (E, T)
    out = jnp.zeros((xb.shape[0], H), jnp.float32)
    for e in range(E):
        h1 = jnp.dot(xb, params["w1"][e].T.astype(jnp.bfloat16),
                     preferred_element_type=jnp.float32)
        h3 = jnp.dot(xb, params["w3"][e].T.astype(jnp.bfloat16),
                     preferred_element_type=jnp.float32)
        act = (h1 * jax.nn.sigmoid(h1)) * h3
        # Routing weight applied to the activation (pre bf16 cast), same as the
        # kernel; mathematically identical to PyTorch's post-expert scaling.
        act = act * rw[e][:, None]
        out = out + jnp.dot(act.astype(jnp.bfloat16),
                            params["w2"][e].T.astype(jnp.bfloat16),
                            preferred_element_type=jnp.float32)
    return (out.reshape(B, S, H).astype(hidden_states.dtype),
            logits.astype(hidden_states.dtype))


# ---------------------------------------------------------------------------
if __name__ == "__main__":
    # Small-ish Mixtral-like shapes that still exercise multi-tile grouping,
    # multiple F tiles, the expert-dependent index maps, and padding tiles.
    B, S, H, F, E, TOP_K = 2, 192, 512, 1024, 8, 2

    key = jax.random.PRNGKey(0)
    k_x, k_g, k1, k2, k3 = jax.random.split(key, 5)
    hidden_states = jax.random.normal(k_x, (B, S, H), dtype=jnp.float32)
    params = {
        "gate": jax.random.normal(k_g, (E, H), dtype=jnp.float32) * 0.2,
        "w1": jax.random.normal(k1, (E, F, H), dtype=jnp.float32) * 0.05,
        "w2": jax.random.normal(k2, (E, H, F), dtype=jnp.float32) * 0.05,
        "w3": jax.random.normal(k3, (E, F, H), dtype=jnp.float32) * 0.05,
    }

    prepared = prepare_params(params)   # one-time (load-time) weight prep

    # tT_max=128 forces several token-group tiles at this small test size so
    # the grouped (nG, nF) pipeline and the padding/skip paths are exercised.
    out, logits = mixtral_moe_forward(hidden_states, prepared, top_k=TOP_K,
                                      experts_to_drop=None, tT_max=128)
    jax.block_until_ready((out, logits))
    ref_out, ref_logits = _reference(hidden_states, params, top_k=TOP_K,
                                     experts_to_drop=None)
    np.testing.assert_allclose(np.asarray(logits), np.asarray(ref_logits),
                               rtol=2e-3, atol=2e-3)
    np.testing.assert_allclose(np.asarray(out), np.asarray(ref_out),
                               rtol=5e-3, atol=5e-3)

    # Experts dropped: exercises the -inf mask and zero-sized expert groups.
    out_d, logits_d = mixtral_moe_forward(hidden_states, prepared, top_k=TOP_K,
                                          experts_to_drop=(3, 5), tT_max=128)
    jax.block_until_ready((out_d, logits_d))
    ref_out_d, ref_logits_d = _reference(hidden_states, params, top_k=TOP_K,
                                         experts_to_drop=(3, 5))
    np.testing.assert_allclose(np.asarray(logits_d), np.asarray(ref_logits_d),
                               rtol=2e-3, atol=2e-3)
    np.testing.assert_allclose(np.asarray(out_d), np.asarray(ref_out_d),
                               rtol=5e-3, atol=5e-3)

    print("KERNEL_OK")
</pallas_src>

<mosaic_0001>
module attributes {stable_mosaic.version = 11 : i64} {
  func.func @_moe_grouped_kernel(%arg0: i32, %arg1: i32, %arg2: memref<14xi32, #tpu.memory_space<smem>>, %arg3: memref<14xi32, #tpu.memory_space<smem>>, %arg4: memref<128x512xbf16, #tpu.memory_space<vmem>>, %arg5: memref<1x512x512xbf16, #tpu.memory_space<vmem>>, %arg6: memref<1x256x512xbf16, #tpu.memory_space<vmem>>, %arg7: memref<128x1xf32, #tpu.memory_space<vmem>>, %arg8: memref<128x512xf32, #tpu.memory_space<vmem>>, %arg9: memref<128x512xf32, #tpu.memory_space<vmem>>) attributes {dimension_semantics = [#tpu.dimension_semantics<arbitrary>, #tpu.dimension_semantics<arbitrary>], iteration_bounds = array<i64: 14, 4>, scalar_prefetch = 2 : i64, scratch_operands = 1 : i64, tpu.core_type = #tpu.core_type<tc>, window_params = [{transform_indices = @transform_0, window_bounds = array<i64: 128, 512>}, {transform_indices = @transform_1, window_bounds = array<i64: 1, 512, 512>}, {transform_indices = @transform_2, window_bounds = array<i64: 1, 256, 512>}, {transform_indices = @transform_3, window_bounds = array<i64: 128, 1>}, {transform_indices = @transform_4, window_bounds = array<i64: 128, 512>}]} {
    %c0_i32 = arith.constant 0 : i32
    %0 = arith.cmpi eq, %arg1, %c0_i32 : i32
    %1 = arith.extui %0 : i1 to i32
    %c0_i32_0 = arith.constant 0 : i32
    %2 = arith.cmpi ne, %1, %c0_i32_0 : i32
    scf.if %2 {
      %cst = arith.constant 0.000000e+00 : f32
      %11 = vector.broadcast %cst : f32 to vector<128x512xf32>
      %c0 = arith.constant 0 : index
      %c0_4 = arith.constant 0 : index
      %12 = vector.load %arg9[%c0, %c0_4] : memref<128x512xf32, #tpu.memory_space<vmem>>, vector<128x512xf32>
      tpu.vector_store %arg9[%c0, %c0_4], %11 {strides = array<i32>} : memref<128x512xf32, #tpu.memory_space<vmem>>, vector<128x512xf32>,
    } else {
    }
    %3 = arith.index_cast %arg0 : i32 to index
    %4 = memref.load %arg3[%3] : memref<14xi32, #tpu.memory_space<smem>>
    %c0_i32_1 = arith.constant 0 : i32
    %5 = arith.cmpi sgt, %4, %c0_i32_1 : i32
    %6 = arith.extui %5 : i1 to i32
    %c0_i32_2 = arith.constant 0 : i32
    %7 = arith.cmpi ne, %6, %c0_i32_2 : i32
    scf.if %7 {
      %c0 = arith.constant 0 : index
      %c0_4 = arith.constant 0 : index
      %11 = vector.load %arg4[%c0, %c0_4] : memref<128x512xbf16, #tpu.memory_space<vmem>>, vector<128x512xbf16>
      %c0_5 = arith.constant 0 : index
      %c0_6 = arith.constant 0 : index
      %c0_7 = arith.constant 0 : index
      %12 = vector.load %arg5[%c0_5, %c0_6, %c0_7] : memref<1x512x512xbf16, #tpu.memory_space<vmem>>, vector<1x512x512xbf16>
      %13 = vector.shape_cast %12 : vector<1x512x512xbf16> to vector<512x512xbf16>
      %cst = arith.constant dense<0.000000e+00> : vector<128x512xf32>
      %14 = tpu.matmul %11, %13, %cst {dimension_numbers = #tpu.dot_dimension_numbers<[1], [0], [0], [1], [0, 0, 1, 1], [], []>} : vector<128x512xbf16>, vector<512x512xbf16>, vector<128x512xf32> -> vector<128x512xf32>
      %15 = vector.extract_strided_slice %14 {offsets = [0, 0], sizes = [128, 256], strides = [1, 1]} : vector<128x512xf32> to vector<128x256xf32>
      %16 = vector.extract_strided_slice %14 {offsets = [0, 256], sizes = [128, 256], strides = [1, 1]} : vector<128x512xf32> to vector<128x256xf32>
      %17 = arith.negf %15 : vector<128x256xf32>
      %18 = math.exp %17 : vector<128x256xf32>
      %cst_8 = arith.constant 1.000000e+00 : f32
      %19 = vector.broadcast %cst_8 : f32 to vector<128x256xf32>
      %20 = arith.addf %19, %18 : vector<128x256xf32>
      %21 = arith.divf %19, %20 : vector<128x256xf32>
      %22 = arith.mulf %15, %21 : vector<128x256xf32>
      %23 = arith.mulf %22, %16 : vector<128x256xf32>
      %c0_9 = arith.constant 0 : index
      %c0_10 = arith.constant 0 : index
      %24 = vector.load %arg7[%c0_9, %c0_10] : memref<128x1xf32, #tpu.memory_space<vmem>>, vector<128x1xf32>
      %25 = vector.broadcast %24 : vector<128x1xf32> to vector<128x256xf32>
      %26 = arith.mulf %23, %25 : vector<128x256xf32>
      %c0_11 = arith.constant 0 : index
      %c0_12 = arith.constant 0 : index
      %27 = vector.load %arg9[%c0_11, %c0_12] : memref<128x512xf32, #tpu.memory_space<vmem>>, vector<128x512xf32>
      %28 = arith.truncf %26 : vector<128x256xf32> to vector<128x256xbf16>
      %c0_13 = arith.constant 0 : index
      %c0_14 = arith.constant 0 : index
      %c0_15 = arith.constant 0 : index
      %29 = vector.load %arg6[%c0_13, %c0_14, %c0_15] : memref<1x256x512xbf16, #tpu.memory_space<vmem>>, vector<1x256x512xbf16>
      %30 = vector.shape_cast %29 : vector<1x256x512xbf16> to vector<256x512xbf16>
      %cst_16 = arith.constant dense<0.000000e+00> : vector<128x512xf32>
      %31 = tpu.matmul %28, %30, %cst_16 {dimension_numbers = #tpu.dot_dimension_numbers<[1], [0], [0], [1], [0, 0, 1, 1], [], []>} : vector<128x256xbf16>, vector<256x512xbf16>, vector<128x512xf32> -> vector<128x512xf32>
      %32 = arith.addf %27, %31 : vector<128x512xf32>
      %c0_17 = arith.constant 0 : index
      %c0_18 = arith.constant 0 : index
      %33 = vector.load %arg9[%c0_17, %c0_18] : memref<128x512xf32, #tpu.memory_space<vmem>>, vector<128x512xf32>
      tpu.vector_store %arg9[%c0_17, %c0_18], %32 {strides = array<i32>} : memref<128x512xf32, #tpu.memory_space<vmem>>, vector<128x512xf32>,
    } else {
    }
    %c3_i32 = arith.constant 3 : i32
    %8 = arith.cmpi eq, %arg1, %c3_i32 : i32
    %9 = arith.extui %8 : i1 to i32
    %c0_i32_3 = arith.constant 0 : i32
    %10 = arith.cmpi ne, %9, %c0_i32_3 : i32
    scf.if %10 {
      %c0 = arith.constant 0 : index
      %c0_4 = arith.constant 0 : index
      %11 = vector.load %arg9[%c0, %c0_4] : memref<128x512xf32, #tpu.memory_space<vmem>>, vector<128x512xf32>
      %c0_5 = arith.constant 0 : index
      %c0_6 = arith.constant 0 : index
      %12 = vector.load %arg8[%c0_5, %c0_6] : memref<128x512xf32, #tpu.memory_space<vmem>>, vector<128x512xf32>
      tpu.vector_store %arg8[%c0_5, %c0_6], %11 {strides = array<i32>} : memref<128x512xf32, #tpu.memory_space<vmem>>, vector<128x512xf32>,
    } else {
    }
    return
  }
  func.func @transform_0(%arg0: i32, %arg1: i32, %arg2: memref<14xi32, #tpu.memory_space<smem>>, %arg3: memref<14xi32, #tpu.memory_space<smem>>) -> (i32, i32) {
    %c0_i32 = arith.constant 0 : i32
    %c0_i32_0 = arith.constant 0 : i32
    return %arg0, %c0_i32 : i32, i32
  }
  func.func @transform_1(%arg0: i32, %arg1: i32, %arg2: memref<14xi32, #tpu.memory_space<smem>>, %arg3: memref<14xi32, #tpu.memory_space<smem>>) -> (i32, i32, i32) {
    %0 = arith.index_cast %arg0 : i32 to index
    %1 = memref.load %arg2[%0] : memref<14xi32, #tpu.memory_space<smem>>
    %2 = arith.index_cast %arg0 : i32 to index
    %3 = memref.load %arg3[%2] : memref<14xi32, #tpu.memory_space<smem>>
    %4 = arith.muli %arg1, %3 : i32
    %c0_i32 = arith.constant 0 : i32
    %c0_i32_0 = arith.constant 0 : i32
    return %1, %c0_i32, %4 : i32, i32, i32
  }
  func.func @transform_2(%arg0: i32, %arg1: i32, %arg2: memref<14xi32, #tpu.memory_space<smem>>, %arg3: memref<14xi32, #tpu.memory_space<smem>>) -> (i32, i32, i32) {
    %0 = arith.index_cast %arg0 : i32 to index
    %1 = memref.load %arg2[%0] : memref<14xi32, #tpu.memory_space<smem>>
    %2 = arith.index_cast %arg0 : i32 to index
    %3 = memref.load %arg3[%2] : memref<14xi32, #tpu.memory_space<smem>>
    %4 = arith.muli %arg1, %3 : i32
    %c0_i32 = arith.constant 0 : i32
    %c0_i32_0 = arith.constant 0 : i32
    return %1, %4, %c0_i32 : i32, i32, i32
  }
  func.func @transform_3(%arg0: i32, %arg1: i32, %arg2: memref<14xi32, #tpu.memory_space<smem>>, %arg3: memref<14xi32, #tpu.memory_space<smem>>) -> (i32, i32) {
    %c0_i32 = arith.constant 0 : i32
    %c0_i32_0 = arith.constant 0 : i32
    return %arg0, %c0_i32 : i32, i32
  }
  func.func @transform_4(%arg0: i32, %arg1: i32, %arg2: memref<14xi32, #tpu.memory_space<smem>>, %arg3: memref<14xi32, #tpu.memory_space<smem>>) -> (i32, i32) {
    %c0_i32 = arith.constant 0 : i32
    %c0_i32_0 = arith.constant 0 : i32
    return %arg0, %c0_i32 : i32, i32
  }
}

</mosaic_0001>

<bundles_post_ra>
// kernel: _forward.1
= control target key start
LH: loop header
LB: loop body
LE: loop exit
PB: predicated region body
PF: predicated region fallthrough
CT: control target
= control target key end

     0   :  { %s5937_s27 = smov [#allocation4]   ;;  %s5938_s28 = smov [#allocation5]   ;;  %s8100_s0 = inlined_call_operand.vmem [shape: s32[14], index: 0, kind: input, shape index: {}]   ;;  %s8101_s2 = inlined_call_operand.vmem [shape: bf16[1792,512], index: 2, kind: input, shape index: {}]   ;;  %s8102_s3 = inlined_call_operand.vmem [shape: bf16[8,512,2048], index: 3, kind: input, shape index: {}]   ;;  %s8103_s4 = inlined_call_operand.vmem [shape: bf16[8,1024,512], index: 4, kind: input, shape index: {}]   ;;  %s8104_s5 = inlined_call_operand.vmem [shape: f32[1792,1], index: 5, kind: input, shape index: {}]   ;;  %s8105_s6 = inlined_call_operand.vmem [shape: f32[1792,512], index: 6, kind: output, shape index: {}]   ;;  %s8106_s1 = inlined_call_operand.vmem [shape: s32[14], index: 1, kind: input, shape index: {}]  }
   0x1   :  { %8137 = sst [smem:[#allocation38_spill]] %s8101_s2  ;;  %s12_s23 = sshll.u32 %s8100_s0, 4  ;;  %s13_s23 = int_to_ptr.vmem [resolvable:$true] %s12_s23 }
   0x2   :  { %8138 = sst [smem:[#allocation39_spill]] %s8102_s3  ;;  %s17_s26 = sshll.u32 %s8106_s1, 4  ;;  %s18_s26 = int_to_ptr.vmem [resolvable:$true] %s17_s26 }
   0x3   :  { %15 = dma.vmem_to_smem %s13_s23, 16, %s5937_s27, [#allocation3] }
   0x4   :  { %20 = dma.vmem_to_smem %s18_s26, 16, %s5938_s28, [#allocation3] }
   0x5   :  { %5907 = dma.done.wait [#allocation3], 32 }
   0x6   :  { %5908 = vsyncadd [#allocation3], 4294967264 }
   0x7   :  { %23 = sfence }
   0x8   :  { %s5982_s29 = smov 0   ;;  %s5984_s30 = smov 0  }
   0x9   :  { %s5986_s7 = smov 0   ;;  %s5988_s0 = smov 0  }
   0xa   :  { %s5990_s8 = smov 0   ;;  %s5992_s1 = smov 0  }
   0xb   :  { %s5994_s9 = smov 0  }
   0xc LB: > { %s38_s10 = sadd.s32 1, %s5927_s8  ;;  %s41_s11 = sadd.s32 1, %s5931_s1  ;;  %s5935_s9 = sphi %s5994_s9, %s29_s9   ;;  %s5931_s1 = sphi %s5992_s1, %s8259_s1   ;;  %s5927_s8 = sphi %s5990_s8, %s8258_s8   ;;  %s5923_s0 = sphi %s5988_s0, %s8257_s0   ;;  %s5919_s7 = sphi %s5986_s7, %s8256_s7   ;;  %s5915_s30 = sphi %s5984_s30, %s8255_s30   ;;  %s5911_s29 = sphi %s5982_s29, %s8254_s29  }
   0xd   : > { %p39_p0 = scmp.ge.s32.totalorder %s38_s10, 4  ;;  %p89_p1 = scmp.ne.s32.totalorder %s5915_s30, %s5911_s29 }
   0xe   : > { %p90_p2 = scmp.eq.s32.totalorder %s5935_s9, 0  ;;  %s72_s12 = sld [smem:[#allocation5 + %s5931_s1]] }
   0xf   : > { %s8261_s11 = smov (!%p39_p0, %s41_s11), %s5931_s1  ;;  %s71_s14 = sld [smem:[#allocation4 + %s5931_s1]] }
  0x10   : > { %p43_p3 = scmp.ge.s32.totalorder %s8261_s11, 14  ;;  %p6024_p4 = por %p90_p2, %p89_p1 }
  0x11   : > { %s8265_s10 = smov (%p39_p0, %s38_s10), 0  ;;  %s82_s22 = sadd.s32 1, %s5915_s30 }
  0x12   : > { %s8263_s11 = smov (%p43_p3, %s8261_s11), 0  ;;  %p4486_p6 = scmp.ge.s32.totalorder %s5935_s9, 56 }
  0x13   : > { %8140 = sst [smem:[#allocation8_spill]] %s8263_s11 }
  0x14   : > { %s74_s15 = sld [smem:[#allocation4 + %s8263_s11]]  ;;  %s73_s17 = smul.u32 %s5927_s8, %s72_s12 }
  0x15   : > { %s75_s16 = sld [smem:[#allocation5 + %s8263_s11]] }
  0x1a   : > { %s77_s19 = ssub.s32 %s71_s14, %s74_s15 }
  0x1b   : > { %s76_s18 = smul.u32 %s75_s16, %s8265_s10 }
  0x1d   : > { %s78_s20 = ssub.s32 %s73_s17, %s76_s18  ;;  %201 = sbr.rel (%p4486_p6) target bundleno = 176 (0xb0), region = 16 }
  0x1e   : > { %s79_s21 = sor.u32 %s78_s20, %s77_s19 }
  0x1f   : > { %p80_p5 = scmp.eq.s32.totalorder %s79_s21, 0 }
  0x21   : > { %s6039_s23 = scalar_select %p80_p5, %s5915_s30, %s82_s22  }
  0x22   : > { %214 = sbr.rel (!%p6024_p4) target bundleno = 176 (0xb0), region = 24  ;;  %s219_s24 = sld [smem:[#allocation4 + %s5931_s1]] (%p6024_p4) }
  0x23   : > { %s220_s25 = sld [smem:[#allocation5 + %s5931_s1]] (%p6024_p4)  ;;  %s216_s26 = sand.u32 (%p6024_p4), 1, %s5915_s30  }
  0x24   : > { %s4487_s12 = sshll.u32 (%p6024_p4), %s216_s26, 10  ;;  %s8141_s3 = sld [smem:[#allocation39_spill]] (%p6024_p4) }
  0x25   : > { %s6056_s13 = scalar_lea.vmem (%p6024_p4), [#allocation6], %s4487_s12 }
  0x28   : > { %s4489_s28 = sshll.u32 %s219_s24, 10 }
  0x29   : > { %s221_s27 = smul.u32 %s5927_s8, %s220_s25 }
  0x2b   : > { %s4488_s14 = sshll.u32 %s221_s27, 2 }
  0x2c   : > { %s224_s15 = sadd.s32 %s4489_s28, %s4488_s14 }
  0x2d   : > { %s4490_s16 = sshll.u32 %s224_s15, 2 }
  0x2e   : > { %s6051_s19 = scalar_lea.vmem %s8141_s3, %s4490_s16 }
  0x2f   : > { %v239_v0 = vld [vmem:[%s6051_s19] sm:$0xff]  ;;  %v241_v1 = vld [vmem:[%s6051_s19 + $0x8] sm:$0xff] }
  0x30   : > { %v243_v2 = vld [vmem:[%s6051_s19 + $0x40] sm:$0xff]  ;;  %240 = vst [vmem:[%s6056_s13] sm:$0xff] %v239_v0  ;;  %v245_v3 = vld [vmem:[%s6051_s19 + $0x48] sm:$0xff] }
  0x31   : > { %242 = vst [vmem:[%s6056_s13 + $0x8] sm:$0xff] %v241_v1  ;;  %v247_v4 = vld [vmem:[%s6051_s19 + $0x80] sm:$0xff]  ;;  %v249_v5 = vld [vmem:[%s6051_s19 + $0x88] sm:$0xff] }
  0x32   : > { %244 = vst [vmem:[%s6056_s13 + $0x10] sm:$0xff] %v243_v2  ;;  %v251_v6 = vld [vmem:[%s6051_s19 + $0xc0] sm:$0xff]  ;;  %v253_v7 = vld [vmem:[%s6051_s19 + $0xc8] sm:$0xff] }
  0x33   : > { %246 = vst [vmem:[%s6056_s13 + $0x18] sm:$0xff] %v245_v3  ;;  %v255_v8 = vld [vmem:[%s6051_s19 + $0x100] sm:$0xff]  ;;  %v257_v9 = vld [vmem:[%s6051_s19 + $0x108] sm:$0xff] }
  0x34   : > { %248 = vst [vmem:[%s6056_s13 + $0x20] sm:$0xff] %v247_v4  ;;  %v259_v10 = vld [vmem:[%s6051_s19 + $0x140] sm:$0xff]  ;;  %v261_v11 = vld [vmem:[%s6051_s19 + $0x148] sm:$0xff] }
  0x35   : > { %250 = vst [vmem:[%s6056_s13 + $0x28] sm:$0xff] %v249_v5  ;;  %v263_v12 = vld [vmem:[%s6051_s19 + $0x180] sm:$0xff]  ;;  %v265_v13 = vld [vmem:[%s6051_s19 + $0x188] sm:$0xff] }
  0x36   : > { %252 = vst [vmem:[%s6056_s13 + $0x30] sm:$0xff] %v251_v6  ;;  %v267_v14 = vld [vmem:[%s6051_s19 + $0x1c0] sm:$0xff]  ;;  %v269_v15 = vld [vmem:[%s6051_s19 + $0x1c8] sm:$0xff] }
  0x37   : > { %254 = vst [vmem:[%s6056_s13 + $0x38] sm:$0xff] %v253_v7  ;;  %v271_v16 = vld [vmem:[%s6051_s19 + $0x200] sm:$0xff]  ;;  %v273_v17 = vld [vmem:[%s6051_s19 + $0x208] sm:$0xff] }
  0x38   : > { %256 = vst [vmem:[%s6056_s13 + $0x40] sm:$0xff] %v255_v8  ;;  %v275_v18 = vld [vmem:[%s6051_s19 + $0x240] sm:$0xff]  ;;  %v277_v19 = vld [vmem:[%s6051_s19 + $0x248] sm:$0xff] }
  0x39   : > { %258 = vst [vmem:[%s6056_s13 + $0x48] sm:$0xff] %v257_v9  ;;  %v279_v20 = vld [vmem:[%s6051_s19 + $0x280] sm:$0xff]  ;;  %v281_v21 = vld [vmem:[%s6051_s19 + $0x288] sm:$0xff] }
  0x3a   : > { %260 = vst [vmem:[%s6056_s13 + $0x50] sm:$0xff] %v259_v10  ;;  %v283_v22 = vld [vmem:[%s6051_s19 + $0x2c0] sm:$0xff]  ;;  %v285_v23 = vld [vmem:[%s6051_s19 + $0x2c8] sm:$0xff] }
  0x3b   : > { %262 = vst [vmem:[%s6056_s13 + $0x58] sm:$0xff] %v261_v11  ;;  %v287_v24 = vld [vmem:[%s6051_s19 + $0x300] sm:$0xff]  ;;  %v289_v25 = vld [vmem:[%s6051_s19 + $0x308] sm:$0xff] }
  0x3c   : > { %264 = vst [vmem:[%s6056_s13 + $0x60] sm:$0xff] %v263_v12  ;;  %v291_v26 = vld [vmem:[%s6051_s19 + $0x340] sm:$0xff]  ;;  %v293_v27 = vld [vmem:[%s6051_s19 + $0x348] sm:$0xff] }
  0x3d   : > { %266 = vst [vmem:[%s6056_s13 + $0x68] sm:$0xff] %v265_v13  ;;  %v295_v28 = vld [vmem:[%s6051_s19 + $0x380] sm:$0xff]  ;;  %v297_v29 = vld [vmem:[%s6051_s19 + $0x388] sm:$0xff] }
  0x3e   : > { %268 = vst [vmem:[%s6056_s13 + $0x70] sm:$0xff] %v267_v14  ;;  %v299_v30 = vld [vmem:[%s6051_s19 + $0x3c0] sm:$0xff]  ;;  %v301_v31 = vld [vmem:[%s6051_s19 + $0x3c8] sm:$0xff] }
  0x3f   : > { %270 = vst [vmem:[%s6056_s13 + $0x78] sm:$0xff] %v269_v15  ;;  %v303_v32 = vld [vmem:[%s6051_s19 + $0x400] sm:$0xff]  ;;  %v305_v33 = vld [vmem:[%s6051_s19 + $0x408] sm:$0xff] }
  0x40   : > { %272 = vst [vmem:[%s6056_s13 + $0x80] sm:$0xff] %v271_v16  ;;  %v307_v34 = vld [vmem:[%s6051_s19 + $0x440] sm:$0xff]  ;;  %v309_v35 = vld [vmem:[%s6051_s19 + $0x448] sm:$0xff] }
  0x41   : > { %274 = vst [vmem:[%s6056_s13 + $0x88] sm:$0xff] %v273_v17  ;;  %v311_v36 = vld [vmem:[%s6051_s19 + $0x480] sm:$0xff]  ;;  %v313_v37 = vld [vmem:[%s6051_s19 + $0x488] sm:$0xff] }
  0x42   : > { %276 = vst [vmem:[%s6056_s13 + $0x90] sm:$0xff] %v275_v18  ;;  %v315_v38 = vld [vmem:[%s6051_s19 + $0x4c0] sm:$0xff]  ;;  %v317_v39 = vld [vmem:[%s6051_s19 + $0x4c8] sm:$0xff] }
  0x43   : > { %278 = vst [vmem:[%s6056_s13 + $0x98] sm:$0xff] %v277_v19  ;;  %v319_v40 = vld [vmem:[%s6051_s19 + $0x500] sm:$0xff]  ;;  %v321_v41 = vld [vmem:[%s6051_s19 + $0x508] sm:$0xff] }
  0x44   : > { %280 = vst [vmem:[%s6056_s13 + $0xa0] sm:$0xff] %v279_v20  ;;  %v323_v42 = vld [vmem:[%s6051_s19 + $0x540] sm:$0xff]  ;;  %v325_v43 = vld [vmem:[%s6051_s19 + $0x548] sm:$0xff] }
  0x45   : > { %282 = vst [vmem:[%s6056_s13 + $0xa8] sm:$0xff] %v281_v21  ;;  %v327_v44 = vld [vmem:[%s6051_s19 + $0x580] sm:$0xff]  ;;  %v329_v45 = vld [vmem:[%s6051_s19 + $0x588] sm:$0xff] }
  0x46   : > { %284 = vst [vmem:[%s6056_s13 + $0xb0] sm:$0xff] %v283_v22  ;;  %v331_v46 = vld [vmem:[%s6051_s19 + $0x5c0] sm:$0xff]  ;;  %v333_v47 = vld [vmem:[%s6051_s19 + $0x5c8] sm:$0xff] }
  0x47   : > { %286 = vst [vmem:[%s6056_s13 + $0xb8] sm:$0xff] %v285_v23  ;;  %v335_v48 = vld [vmem:[%s6051_s19 + $0x600] sm:$0xff]  ;;  %v337_v49 = vld [vmem:[%s6051_s19 + $0x608] sm:$0xff] }
  0x48   : > { %288 = vst [vmem:[%s6056_s13 + $0xc0] sm:$0xff] %v287_v24  ;;  %v339_v50 = vld [vmem:[%s6051_s19 + $0x640] sm:$0xff]  ;;  %v341_v51 = vld [vmem:[%s6051_s19 + $0x648] sm:$0xff] }
  0x49   : > { %290 = vst [vmem:[%s6056_s13 + $0xc8] sm:$0xff] %v289_v25  ;;  %v343_v52 = vld [vmem:[%s6051_s19 + $0x680] sm:$0xff]  ;;  %v345_v53 = vld [vmem:[%s6051_s19 + $0x688] sm:$0xff] }
  0x4a   : > { %292 = vst [vmem:[%s6056_s13 + $0xd0] sm:$0xff] %v291_v26  ;;  %v347_v54 = vld [vmem:[%s6051_s19 + $0x6c0] sm:$0xff]  ;;  %v349_v55 = vld [vmem:[%s6051_s19 + $0x6c8] sm:$0xff] }
  0x4b   : > { %294 = vst [vmem:[%s6056_s13 + $0xd8] sm:$0xff] %v293_v27  ;;  %v351_v56 = vld [vmem:[%s6051_s19 + $0x700] sm:$0xff]  ;;  %v353_v57 = vld [vmem:[%s6051_s19 + $0x708] sm:$0xff] }
  0x4c   : > { %296 = vst [vmem:[%s6056_s13 + $0xe0] sm:$0xff] %v295_v28  ;;  %v355_v58 = vld [vmem:[%s6051_s19 + $0x740] sm:$0xff]  ;;  %v357_v59 = vld [vmem:[%s6051_s19 + $0x748] sm:$0xff] }
  0x4d   : > { %298 = vst [vmem:[%s6056_s13 + $0xe8] sm:$0xff] %v297_v29  ;;  %v359_v60 = vld [vmem:[%s6051_s19 + $0x780] sm:$0xff]  ;;  %v361_v61 = vld [vmem:[%s6051_s19 + $0x788] sm:$0xff] }
  0x4e   : > { %300 = vst [vmem:[%s6056_s13 + $0xf0] sm:$0xff] %v299_v30  ;;  %v363_v62 = vld [vmem:[%s6051_s19 + $0x7c0] sm:$0xff]  ;;  %v365_v63 = vld [vmem:[%s6051_s19 + $0x7c8] sm:$0xff] }
  0x4f   : > { %302 = vst [vmem:[%s6056_s13 + $0xf8] sm:$0xff] %v301_v31  ;;  %v367_v0 = vld [vmem:[%s6051_s19 + $0x800] sm:$0xff]  ;;  %v369_v1 = vld [vmem:[%s6051_s19 + $0x808] sm:$0xff] }
  0x50   : > { %304 = vst [vmem:[%s6056_s13 + $0x100] sm:$0xff] %v303_v32  ;;  %v371_v2 = vld [vmem:[%s6051_s19 + $0x840] sm:$0xff]  ;;  %v373_v3 = vld [vmem:[%s6051_s19 + $0x848] sm:$0xff] }
  0x51   : > { %306 = vst [vmem:[%s6056_s13 + $0x108] sm:$0xff] %v305_v33  ;;  %v375_v4 = vld [vmem:[%s6051_s19 + $0x880] sm:$0xff]  ;;  %v377_v5 = vld [vmem:[%s6051_s19 + $0x888] sm:$0xff] }
  0x52   : > { %308 = vst [vmem:[%s6056_s13 + $0x110] sm:$0xff] %v307_v34  ;;  %v379_v6 = vld [vmem:[%s6051_s19 + $0x8c0] sm:$0xff]  ;;  %v381_v7 = vld [vmem:[%s6051_s19 + $0x8c8] sm:$0xff] }
  0x53   : > { %310 = vst [vmem:[%s6056_s13 + $0x118] sm:$0xff] %v309_v35  ;;  %v383_v8 = vld [vmem:[%s6051_s19 + $0x900] sm:$0xff]  ;;  %v385_v9 = vld [vmem:[%s6051_s19 + $0x908] sm:$0xff] }
  0x54   : > { %312 = vst [vmem:[%s6056_s13 + $0x120] sm:$0xff] %v311_v36  ;;  %v387_v10 = vld [vmem:[%s6051_s19 + $0x940] sm:$0xff]  ;;  %v389_v11 = vld [vmem:[%s6051_s19 + $0x948] sm:$0xff] }
  0x55   : > { %314 = vst [vmem:[%s6056_s13 + $0x128] sm:$0xff] %v313_v37  ;;  %v391_v12 = vld [vmem:[%s6051_s19 + $0x980] sm:$0xff]  ;;  %v393_v13 = vld [vmem:[%s6051_s19 + $0x988] sm:$0xff] }
  0x56   : > { %316 = vst [vmem:[%s6056_s13 + $0x130] sm:$0xff] %v315_v38  ;;  %v395_v14 = vld [vmem:[%s6051_s19 + $0x9c0] sm:$0xff]  ;;  %v397_v15 = vld [vmem:[%s6051_s19 + $0x9c8] sm:$0xff] }
  0x57   : > { %318 = vst [vmem:[%s6056_s13 + $0x138] sm:$0xff] %v317_v39  ;;  %v399_v16 = vld [vmem:[%s6051_s19 + $0xa00] sm:$0xff]  ;;  %v401_v17 = vld [vmem:[%s6051_s19 + $0xa08] sm:$0xff] }
  0x58   : > { %320 = vst [vmem:[%s6056_s13 + $0x140] sm:$0xff] %v319_v40  ;;  %v403_v18 = vld [vmem:[%s6051_s19 + $0xa40] sm:$0xff]  ;;  %v405_v19 = vld [vmem:[%s6051_s19 + $0xa48] sm:$0xff] }
  0x59   : > { %322 = vst [vmem:[%s6056_s13 + $0x148] sm:$0xff] %v321_v41  ;;  %v407_v20 = vld [vmem:[%s6051_s19 + $0xa80] sm:$0xff]  ;;  %v409_v21 = vld [vmem:[%s6051_s19 + $0xa88] sm:$0xff] }
  0x5a   : > { %324 = vst [vmem:[%s6056_s13 + $0x150] sm:$0xff] %v323_v42  ;;  %v411_v22 = vld [vmem:[%s6051_s19 + $0xac0] sm:$0xff]  ;;  %v413_v23 = vld [vmem:[%s6051_s19 + $0xac8] sm:$0xff] }
  0x5b   : > { %326 = vst [vmem:[%s6056_s13 + $0x158] sm:$0xff] %v325_v43  ;;  %v415_v24 = vld [vmem:[%s6051_s19 + $0xb00] sm:$0xff]  ;;  %v417_v25 = vld [vmem:[%s6051_s19 + $0xb08] sm:$0xff] }
  0x5c   : > { %328 = vst [vmem:[%s6056_s13 + $0x160] sm:$0xff] %v327_v44  ;;  %v419_v26 = vld [vmem:[%s6051_s19 + $0xb40] sm:$0xff]  ;;  %v421_v27 = vld [vmem:[%s6051_s19 + $0xb48] sm:$0xff] }
  0x5d   : > { %330 = vst [vmem:[%s6056_s13 + $0x168] sm:$0xff] %v329_v45  ;;  %v423_v28 = vld [vmem:[%s6051_s19 + $0xb80] sm:$0xff]  ;;  %v425_v29 = vld [vmem:[%s6051_s19 + $0xb88] sm:$0xff] }
  0x5e   : > { %332 = vst [vmem:[%s6056_s13 + $0x170] sm:$0xff] %v331_v46  ;;  %v427_v30 = vld [vmem:[%s6051_s19 + $0xbc0] sm:$0xff]  ;;  %v429_v31 = vld [vmem:[%s6051_s19 + $0xbc8] sm:$0xff] }
  0x5f   : > { %334 = vst [vmem:[%s6056_s13 + $0x178] sm:$0xff] %v333_v47  ;;  %v431_v32 = vld [vmem:[%s6051_s19 + $0xc00] sm:$0xff]  ;;  %v433_v33 = vld [vmem:[%s6051_s19 + $0xc08] sm:$0xff] }
  0x60   : > { %336 = vst [vmem:[%s6056_s13 + $0x180] sm:$0xff] %v335_v48  ;;  %v435_v34 = vld [vmem:[%s6051_s19 + $0xc40] sm:$0xff]  ;;  %v437_v35 = vld [vmem:[%s6051_s19 + $0xc48] sm:$0xff] }
  0x61   : > { %338 = vst [vmem:[%s6056_s13 + $0x188] sm:$0xff] %v337_v49  ;;  %v439_v36 = vld [vmem:[%s6051_s19 + $0xc80] sm:$0xff]  ;;  %v441_v37 = vld [vmem:[%s6051_s19 + $0xc88] sm:$0xff] }
  0x62   : > { %340 = vst [vmem:[%s6056_s13 + $0x190] sm:$0xff] %v339_v50  ;;  %v443_v38 = vld [vmem:[%s6051_s19 + $0xcc0] sm:$0xff]  ;;  %v445_v39 = vld [vmem:[%s6051_s19 + $0xcc8] sm:$0xff] }
  0x63   : > { %342 = vst [vmem:[%s6056_s13 + $0x198] sm:$0xff] %v341_v51  ;;  %v447_v40 = vld [vmem:[%s6051_s19 + $0xd00] sm:$0xff]  ;;  %v449_v41 = vld [vmem:[%s6051_s19 + $0xd08] sm:$0xff] }
  0x64   : > { %344 = vst [vmem:[%s6056_s13 + $0x1a0] sm:$0xff] %v343_v52  ;;  %v451_v42 = vld [vmem:[%s6051_s19 + $0xd40] sm:$0xff]  ;;  %v453_v43 = vld [vmem:[%s6051_s19 + $0xd48] sm:$0xff] }
  0x65   : > { %346 = vst [vmem:[%s6056_s13 + $0x1a8] sm:$0xff] %v345_v53  ;;  %v455_v44 = vld [vmem:[%s6051_s19 + $0xd80] sm:$0xff]  ;;  %v457_v45 = vld [vmem:[%s6051_s19 + $0xd88] sm:$0xff] }
  0x66   : > { %348 = vst [vmem:[%s6056_s13 + $0x1b0] sm:$0xff] %v347_v54  ;;  %v459_v46 = vld [vmem:[%s6051_s19 + $0xdc0] sm:$0xff]  ;;  %v461_v47 = vld [vmem:[%s6051_s19 + $0xdc8] sm:$0xff] }
  0x67   : > { %350 = vst [vmem:[%s6056_s13 + $0x1b8] sm:$0xff] %v349_v55  ;;  %v463_v48 = vld [vmem:[%s6051_s19 + $0xe00] sm:$0xff]  ;;  %v465_v49 = vld [vmem:[%s6051_s19 + $0xe08] sm:$0xff] }
  0x68   : > { %352 = vst [vmem:[%s6056_s13 + $0x1c0] sm:$0xff] %v351_v56  ;;  %v467_v50 = vld [vmem:[%s6051_s19 + $0xe40] sm:$0xff]  ;;  %v469_v51 = vld [vmem:[%s6051_s19 + $0xe48] sm:$0xff] }
  0x69   : > { %354 = vst [vmem:[%s6056_s13 + $0x1c8] sm:$0xff] %v353_v57  ;;  %v471_v52 = vld [vmem:[%s6051_s19 + $0xe80] sm:$0xff]  ;;  %v473_v53 = vld [vmem:[%s6051_s19 + $0xe88] sm:$0xff] }
  0x6a   : > { %356 = vst [vmem:[%s6056_s13 + $0x1d0] sm:$0xff] %v355_v58  ;;  %v475_v54 = vld [vmem:[%s6051_s19 + $0xec0] sm:$0xff]  ;;  %v477_v55 = vld [vmem:[%s6051_s19 + $0xec8] sm:$0xff] }
  0x6b   : > { %358 = vst [vmem:[%s6056_s13 + $0x1d8] sm:$0xff] %v357_v59  ;;  %v479_v56 = vld [vmem:[%s6051_s19 + $0xf00] sm:$0xff]  ;;  %v481_v57 = vld [vmem:[%s6051_s19 + $0xf08] sm:$0xff] }
  0x6c   : > { %360 = vst [vmem:[%s6056_s13 + $0x1e0] sm:$0xff] %v359_v60  ;;  %v483_v58 = vld [vmem:[%s6051_s19 + $0xf40] sm:$0xff]  ;;  %v485_v59 = vld [vmem:[%s6051_s19 + $0xf48] sm:$0xff] }
  0x6d   : > { %362 = vst [vmem:[%s6056_s13 + $0x1e8] sm:$0xff] %v361_v61  ;;  %v487_v60 = vld [vmem:[%s6051_s19 + $0xf80] sm:$0xff]  ;;  %v489_v61 = vld [vmem:[%s6051_s19 + $0xf88] sm:$0xff] }
  0x6e   : > { %364 = vst [vmem:[%s6056_s13 + $0x1f0] sm:$0xff] %v363_v62  ;;  %v491_v62 = vld [vmem:[%s6051_s19 + $0xfc0] sm:$0xff] }
  0x6f   : > { %366 = vst [vmem:[%s6056_s13 + $0x1f8] sm:$0xff] %v365_v63  ;;  %v493_v63 = vld [vmem:[%s6051_s19 + $0xfc8] sm:$0xff] }
  0x70   : > { %368 = vst [vmem:[%s6056_s13 + $0x200] sm:$0xff] %v367_v0 }
  0x71   : > { %370 = vst [vmem:[%s6056_s13 + $0x208] sm:$0xff] %v369_v1 }
  0x72   : > { %372 = vst [vmem:[%s6056_s13 + $0x210] sm:$0xff] %v371_v2 }
  0x73   : > { %374 = vst [vmem:[%s6056_s13 + $0x218] sm:$0xff] %v373_v3 }
  0x74   : > { %376 = vst [vmem:[%s6056_s13 + $0x220] sm:$0xff] %v375_v4 }
  0x75   : > { %378 = vst [vmem:[%s6056_s13 + $0x228] sm:$0xff] %v377_v5 }
  0x76   : > { %380 = vst [vmem:[%s6056_s13 + $0x230] sm:$0xff] %v379_v6 }
  0x77   : > { %382 = vst [vmem:[%s6056_s13 + $0x238] sm:$0xff] %v381_v7 }
  0x78   : > { %384 = vst [vmem:[%s6056_s13 + $0x240] sm:$0xff] %v383_v8 }
  0x79   : > { %386 = vst [vmem:[%s6056_s13 + $0x248] sm:$0xff] %v385_v9 }
  0x7a   : > { %388 = vst [vmem:[%s6056_s13 + $0x250] sm:$0xff] %v387_v10 }
  0x7b   : > { %390 = vst [vmem:[%s6056_s13 + $0x258] sm:$0xff] %v389_v11 }
  0x7c   : > { %392 = vst [vmem:[%s6056_s13 + $0x260] sm:$0xff] %v391_v12 }
  0x7d   : > { %394 = vst [vmem:[%s6056_s13 + $0x268] sm:$0xff] %v393_v13 }
  0x7e   : > { %396 = vst [vmem:[%s6056_s13 + $0x270] sm:$0xff] %v395_v14 }
  0x7f   : > { %398 = vst [vmem:[%s6056_s13 + $0x278] sm:$0xff] %v397_v15 }
  0x80   : > { %400 = vst [vmem:[%s6056_s13 + $0x280] sm:$0xff] %v399_v16 }
  0x81   : > { %402 = vst [vmem:[%s6056_s13 + $0x288] sm:$0xff] %v401_v17 }
  0x82   : > { %404 = vst [vmem:[%s6056_s13 + $0x290] sm:$0xff] %v403_v18 }
  0x83   : > { %406 = vst [vmem:[%s6056_s13 + $0x298] sm:$0xff] %v405_v19 }
  0x84   : > { %408 = vst [vmem:[%s6056_s13 + $0x2a0] sm:$0xff] %v407_v20 }
  0x85   : > { %410 = vst [vmem:[%s6056_s13 + $0x2a8] sm:$0xff] %v409_v21 }
  0x86   : > { %412 = vst [vmem:[%s6056_s13 + $0x2b0] sm:$0xff] %v411_v22 }
  0x87   : > { %414 = vst [vmem:[%s6056_s13 + $0x2b8] sm:$0xff] %v413_v23 }
  0x88   : > { %416 = vst [vmem:[%s6056_s13 + $0x2c0] sm:$0xff] %v415_v24 }
  0x89   : > { %418 = vst [vmem:[%s6056_s13 + $0x2c8] sm:$0xff] %v417_v25 }
  0x8a   : > { %420 = vst [vmem:[%s6056_s13 + $0x2d0] sm:$0xff] %v419_v26 }
  0x8b   : > { %422 = vst [vmem:[%s6056_s13 + $0x2d8] sm:$0xff] %v421_v27 }
  0x8c   : > { %424 = vst [vmem:[%s6056_s13 + $0x2e0] sm:$0xff] %v423_v28 }
  0x8d   : > { %426 = vst [vmem:[%s6056_s13 + $0x2e8] sm:$0xff] %v425_v29 }
  0x8e   : > { %428 = vst [vmem:[%s6056_s13 + $0x2f0] sm:$0xff] %v427_v30 }
  0x8f   : > { %430 = vst [vmem:[%s6056_s13 + $0x2f8] sm:$0xff] %v429_v31 }
  0x90   : > { %432 = vst [vmem:[%s6056_s13 + $0x300] sm:$0xff] %v431_v32 }
  0x91   : > { %434 = vst [vmem:[%s6056_s13 + $0x308] sm:$0xff] %v433_v33 }
  0x92   : > { %436 = vst [vmem:[%s6056_s13 + $0x310] sm:$0xff] %v435_v34 }
  0x93   : > { %438 = vst [vmem:[%s6056_s13 + $0x318] sm:$0xff] %v437_v35 }
  0x94   : > { %440 = vst [vmem:[%s6056_s13 + $0x320] sm:$0xff] %v439_v36 }
  0x95   : > { %442 = vst [vmem:[%s6056_s13 + $0x328] sm:$0xff] %v441_v37 }
  0x96   : > { %444 = vst [vmem:[%s6056_s13 + $0x330] sm:$0xff] %v443_v38 }
  0x97   : > { %446 = vst [vmem:[%s6056_s13 + $0x338] sm:$0xff] %v445_v39 }
  0x98   : > { %448 = vst [vmem:[%s6056_s13 + $0x340] sm:$0xff] %v447_v40 }
  0x99   : > { %450 = vst [vmem:[%s6056_s13 + $0x348] sm:$0xff] %v449_v41 }
  0x9a   : > { %452 = vst [vmem:[%s6056_s13 + $0x350] sm:$0xff] %v451_v42 }
  0x9b   : > { %454 = vst [vmem:[%s6056_s13 + $0x358] sm:$0xff] %v453_v43 }
  0x9c   : > { %456 = vst [vmem:[%s6056_s13 + $0x360] sm:$0xff] %v455_v44 }
  0x9d   : > { %458 = vst [vmem:[%s6056_s13 + $0x368] sm:$0xff] %v457_v45 }
  0x9e   : > { %460 = vst [vmem:[%s6056_s13 + $0x370] sm:$0xff] %v459_v46 }
  0x9f   : > { %462 = vst [vmem:[%s6056_s13 + $0x378] sm:$0xff] %v461_v47 }
  0xa0   : > { %464 = vst [vmem:[%s6056_s13 + $0x380] sm:$0xff] %v463_v48 }
  0xa1   : > { %466 = vst [vmem:[%s6056_s13 + $0x388] sm:$0xff] %v465_v49 }
  0xa2   : > { %468 = vst [vmem:[%s6056_s13 + $0x390] sm:$0xff] %v467_v50 }
  0xa3   : > { %470 = vst [vmem:[%s6056_s13 + $0x398] sm:$0xff] %v469_v51 }
  0xa4   : > { %472 = vst [vmem:[%s6056_s13 + $0x3a0] sm:$0xff] %v471_v52 }
  0xa5   : > { %474 = vst [vmem:[%s6056_s13 + $0x3a8] sm:$0xff] %v473_v53 }
  0xa6   : > { %476 = vst [vmem:[%s6056_s13 + $0x3b0] sm:$0xff] %v475_v54 }
  0xa7   : > { %478 = vst [vmem:[%s6056_s13 + $0x3b8] sm:$0xff] %v477_v55 }
  0xa8   : > { %480 = vst [vmem:[%s6056_s13 + $0x3c0] sm:$0xff] %v479_v56 }
  0xa9   : > { %482 = vst [vmem:[%s6056_s13 + $0x3c8] sm:$0xff] %v481_v57 }
  0xaa   : > { %484 = vst [vmem:[%s6056_s13 + $0x3d0] sm:$0xff] %v483_v58 }
  0xab   : > { %486 = vst [vmem:[%s6056_s13 + $0x3d8] sm:$0xff] %v485_v59 }
  0xac   : > { %488 = vst [vmem:[%s6056_s13 + $0x3e0] sm:$0xff] %v487_v60 }
  0xad   : > { %490 = vst [vmem:[%s6056_s13 + $0x3e8] sm:$0xff] %v489_v61 }
  0xae   : > { %492 = vst [vmem:[%s6056_s13 + $0x3f0] sm:$0xff] %v491_v62 }
  0xaf   : > { %494 = vst [vmem:[%s6056_s13 + $0x3f8] sm:$0xff] %v493_v63 }
  0xb0 PF: > { %p4491_p7 = scmp.ge.s32.totalorder %s5935_s9, 1  ;;  %p528_p8 = scmp.lt.s32.totalorder %s5935_s9, 57 }
  0xb2   : > { %p529_p9 = pnand %p4491_p7, %p528_p8 }
  0xb3   : > { %s535_s20 = sand.u32 (!%p529_p9), 1, %s5911_s29   ;;  %s4493_s21 = sshll.u32 (!%p529_p9), %s5923_s0, 4 }
  0xb4   : > { %532 = sbr.rel (%p529_p9) target bundleno = 1304 (0x518), region = 55  ;;  %s4492_s22 = sshll.u32 (!%p529_p9), %s535_s20, 10 }
  0xb5   : > { %p586_p10 = scmp.lt.s32.totalorder (!%p529_p9), %s4493_s21, 223  ;;  %s596_s24 = sld [smem:[#allocation4 + %s5923_s0]] (!%p529_p9) }
  0xb6   : > { %s597_s25 = sld [smem:[#allocation5 + %s5923_s0]] (!%p529_p9)  ;;  %p4505_p13 = scmp.ne.s32.totalorder (!%p529_p9), %s5919_s7, 0 }
  0xb7   : > { %s8142_s2 = sld [smem:[#allocation38_spill]] (!%p529_p9) }
  0xb9   : > { %s8267_s21 = smov (!%p586_p10, %s4493_s21), 223 }
  0xba   : > { %s5438_s26 = sshll.u32 %s8267_s21, 4  ;;  %s4501_s27 = sshll.u32 %s8267_s21, 3 }
  0xbb   : > { %s6325_s17 = scalar_lea.vmem %s8104_s5, %s4501_s27  ;;  %s5439_s18 = sshll.u32 %s8267_s21, 5 }
  0xbc   : > { %p600_p11 = scmp.lt.s32.totalorder %s596_s24, 7  ;;  %s6330_s13 = scalar_lea.vmem %s8105_s6, %s5439_s18 }
  0xbd   : > { %s6320_s14 = scalar_lea.vmem %s8142_s2, %s5438_s26  ;;  %s598_s20 = smul.u32 %s5919_s7, %s597_s25 }
  0xbe   : > { %s8269_s24 = smov (!%p600_p11, %s596_s24), 7  ;;  %s6338_s21 = scalar_lea.vmem [#allocation6], %s4492_s22 }
  0xbf   : > { %s4496_s3 = sshll.u32 %s598_s20, 5  ;;  %s4498_s11 = sshll.u32 %s8269_s24, 9 }
  0xc0   : > { %p602_p12 = scmp.lt.s32.totalorder %s4496_s3, 127 }
  0xc2   : > { %s8271_s3 = smov (!%p602_p12, %s4496_s3), 127  ;;  %629 = sbr.rel (%p4505_p13) target bundleno = 264 (0x108), region = 63 }
  0xc3   : > { %s4497_s26 = sshll.u32 %s8271_s3, 2 }
  0xc4   : > { %s606_s28 = sadd.s32 %s4498_s11, %s4497_s26 }
  0xc5   : > { %s4499_s12 = sshll.u32 %s606_s28, 2 }
  0xc6   : > { %s6336_s27 = scalar_lea.vmem %s8103_s4, %s4499_s12 }
  0xc7   : > { %v5939_v0 = vmov 0.0  }
  0xc8   : > { %630 = vst [vmem:[#allocation2 + $0xb0] sm:$0xff] %v5939_v0 }
  0xc9   : > { %631 = vst [vmem:[#allocation2 + $0x1b0] sm:$0xff] %v5939_v0 }
  0xca   : > { %632 = vst [vmem:[#allocation2 + $0xd8] sm:$0xff] %v5939_v0 }
  0xcb   : > { %633 = vst [vmem:[#allocation2 + $0x18] sm:$0xff] %v5939_v0 }
  0xcc   : > { %634 = vst [vmem:[#allocation2 + $0x50] sm:$0xff] %v5939_v0 }
  0xcd   : > { %635 = vst [vmem:[#allocation2 + $0x168] sm:$0xff] %v5939_v0 }
  0xce   : > { %636 = vst [vmem:[#allocation2 + $0x130] sm:$0xff] %v5939_v0 }
  0xcf   : > { %637 = vst [vmem:[#allocation2 + $0x48] sm:$0xff] %v5939_v0 }
  0xd0   : > { %638 = vst [vmem:[#allocation2 + $0x180] sm:$0xff] %v5939_v0 }
  0xd1   : > { %639 = vst [vmem:[#allocation2 + $0x110] sm:$0xff] %v5939_v0 }
  0xd2   : > { %640 = vst [vmem:[#allocation2 + $0x118] sm:$0xff] %v5939_v0 }
  0xd3   : > { %641 = vst [vmem:[#allocation2 + $0x98] sm:$0xff] %v5939_v0 }
  0xd4   : > { %642 = vst [vmem:[#allocation2 + $0x120] sm:$0xff] %v5939_v0 }
  0xd5   : > { %643 = vst [vmem:[#allocation2 + $0x150] sm:$0xff] %v5939_v0 }
  0xd6   : > { %644 = vst [vmem:[#allocation2 + $0x108] sm:$0xff] %v5939_v0 }
  0xd7   : > { %645 = vst [vmem:[#allocation2 + $0x60] sm:$0xff] %v5939_v0 }
  0xd8   : > { %646 = vst [vmem:[#allocation2 + $0xe0] sm:$0xff] %v5939_v0 }
  0xd9   : > { %647 = vst [vmem:[#allocation2 + $0x188] sm:$0xff] %v5939_v0 }
  0xda   : > { %648 = vst [vmem:[#allocation2 + $0x138] sm:$0xff] %v5939_v0 }
  0xdb   : > { %649 = vst [vmem:[#allocation2 + $0x140] sm:$0xff] %v5939_v0 }
  0xdc   : > { %650 = vst [vmem:[#allocation2 + $0x80] sm:$0xff] %v5939_v0 }
  0xdd   : > { %651 = vst [vmem:[#allocation2 + $0x1a8] sm:$0xff] %v5939_v0 }
  0xde   : > { %652 = vst [vmem:[#allocation2 + $0x1b8] sm:$0xff] %v5939_v0 }
  0xdf   : > { %653 = vst [vmem:[#allocation2 + $0x28] sm:$0xff] %v5939_v0 }
  0xe0   : > { %654 = vst [vmem:[#allocation2 + $0x1e8] sm:$0xff] %v5939_v0 }
  0xe1   : > { %655 = vst [vmem:[#allocation2 + $0xf8] sm:$0xff] %v5939_v0 }
  0xe2   : > { %656 = vst [vmem:[#allocation2 + $0x160] sm:$0xff] %v5939_v0 }
  0xe3   : > { %657 = vst [vmem:[#allocation2 + $0x30] sm:$0xff] %v5939_v0 }
  0xe4   : > { %658 = vst [vmem:[#allocation2 + $0x1e0] sm:$0xff] %v5939_v0 }
  0xe5   : > { %659 = vst [vmem:[#allocation2] sm:$0xff] %v5939_v0 }
  0xe6   : > { %660 = vst [vmem:[#allocation2 + $0xf0] sm:$0xff] %v5939_v0 }
  0xe7   : > { %661 = vst [vmem:[#allocation2 + $0x8] sm:$0xff] %v5939_v0 }
  0xe8   : > { %662 = vst [vmem:[#allocation2 + $0x148] sm:$0xff] %v5939_v0 }
  0xe9   : > { %663 = vst [vmem:[#allocation2 + $0x1d0] sm:$0xff] %v5939_v0 }
  0xea   : > { %664 = vst [vmem:[#allocation2 + $0x100] sm:$0xff] %v5939_v0 }
  0xeb   : > { %665 = vst [vmem:[#allocation2 + $0xc8] sm:$0xff] %v5939_v0 }
  0xec   : > { %666 = vst [vmem:[#allocation2 + $0x40] sm:$0xff] %v5939_v0 }
  0xed   : > { %667 = vst [vmem:[#allocation2 + $0x1f8] sm:$0xff] %v5939_v0 }
  0xee   : > { %668 = vst [vmem:[#allocation2 + $0x20] sm:$0xff] %v5939_v0 }
  0xef   : > { %669 = vst [vmem:[#allocation2 + $0x128] sm:$0xff] %v5939_v0 }
  0xf0   : > { %670 = vst [vmem:[#allocation2 + $0x1a0] sm:$0xff] %v5939_v0 }
  0xf1   : > { %671 = vst [vmem:[#allocation2 + $0x1f0] sm:$0xff] %v5939_v0 }
  0xf2   : > { %672 = vst [vmem:[#allocation2 + $0xe8] sm:$0xff] %v5939_v0 }
  0xf3   : > { %673 = vst [vmem:[#allocation2 + $0x78] sm:$0xff] %v5939_v0 }
  0xf4   : > { %674 = vst [vmem:[#allocation2 + $0x70] sm:$0xff] %v5939_v0 }
  0xf5   : > { %675 = vst [vmem:[#allocation2 + $0x90] sm:$0xff] %v5939_v0 }
  0xf6   : > { %676 = vst [vmem:[#allocation2 + $0x1d8] sm:$0xff] %v5939_v0 }
  0xf7   : > { %677 = vst [vmem:[#allocation2 + $0xd0] sm:$0xff] %v5939_v0 }
  0xf8   : > { %678 = vst [vmem:[#allocation2 + $0xb8] sm:$0xff] %v5939_v0 }
  0xf9   : > { %679 = vst [vmem:[#allocation2 + $0x88] sm:$0xff] %v5939_v0 }
  0xfa   : > { %680 = vst [vmem:[#allocation2 + $0xa8] sm:$0xff] %v5939_v0 }
  0xfb   : > { %681 = vst [vmem:[#allocation2 + $0x1c8] sm:$0xff] %v5939_v0 }
  0xfc   : > { %682 = vst [vmem:[#allocation2 + $0x170] sm:$0xff] %v5939_v0 }
  0xfd   : > { %683 = vst [vmem:[#allocation2 + $0x178] sm:$0xff] %v5939_v0 }
  0xfe   : > { %684 = vst [vmem:[#allocation2 + $0x68] sm:$0xff] %v5939_v0 }
  0xff   : > { %685 = vst [vmem:[#allocation2 + $0x190] sm:$0xff] %v5939_v0 }
 0x100   : > { %686 = vst [vmem:[#allocation2 + $0x198] sm:$0xff] %v5939_v0 }
 0x101   : > { %687 = vst [vmem:[#allocation2 + $0x38] sm:$0xff] %v5939_v0 }
 0x102   : > { %688 = vst [vmem:[#allocation2 + $0xc0] sm:$0xff] %v5939_v0 }
 0x103   : > { %689 = vst [vmem:[#allocation2 + $0x1c0] sm:$0xff] %v5939_v0 }
 0x104   : > { %690 = vst [vmem:[#allocation2 + $0x158] sm:$0xff] %v5939_v0 }
 0x105   : > { %691 = vst [vmem:[#allocation2 + $0x10] sm:$0xff] %v5939_v0 }
 0x106   : > { %692 = vst [vmem:[#allocation2 + $0x58] sm:$0xff] %v5939_v0 }
 0x107   : > { %693 = vst [vmem:[#allocation2 + $0xa0] sm:$0xff] %v5939_v0 }
 0x108 PF: > { %s694_s2 = sld [smem:[#allocation5 + %s5923_s0]] }
 0x10e   : > { %p4506_p0 = scmp.le.s32.totalorder %s694_s2, 0 }
 0x110   : > { %698 = sbr.rel (%p4506_p0) target bundleno = 1232 (0x4d0), region = 67 }
 0x115   : > { %v4749_v1 = vld [vmem:[%s6338_s21 + $0xe0] sm:$0xf]  ;;  %v5502_v2 = vld [vmem:[%s6338_s21 + $0xec] sm:$0xf0] }
 0x116   : > { %v4877_v3 = vld [vmem:[%s6338_s21 + $0x1e0] sm:$0xf]  ;;  %v4750_v4 = vor.u32 %v5502_v2, %v4749_v1  ;;  %v5534_v5 = vld [vmem:[%s6338_s21 + $0x1ec] sm:$0xf0] }
 0x117   : > { %v5005_v6 = vld [vmem:[%s6338_s21 + $0x2e0] sm:$0xf]  ;;  %v5566_v7 = vld [vmem:[%s6338_s21 + $0x2ec] sm:$0xf0]  ;;  %v4878_v8 = vor.u32 %v5534_v5, %v4877_v3 }
 0x118   : > { %v5006_v9 = vor.u32 %v5566_v7, %v5005_v6  ;;  %v5133_v10 = vld [vmem:[%s6338_s21 + $0x3e0] sm:$0xf]  ;;  %v5598_v11 = vld [vmem:[%s6338_s21 + $0x3ec] sm:$0xf0]  ;;  %1659 = vmatpush.bf16.msra.mxu0 %v4750_v4 }
 0x119   : > { %v4733_v12 = vld [vmem:[%s6338_s21 + $0xc0] sm:$0xf]  ;;  %v5134_v13 = vor.u32 %v5598_v11, %v5133_v10  ;;  %v5498_v14 = vld [vmem:[%s6338_s21 + $0xcc] sm:$0xf0]  ;;  %1708 = vmatpush.bf16.msra.mxu1 %v4878_v8 }
 0x11a   : > { %v4861_v15 = vld [vmem:[%s6338_s21 + $0x1c0] sm:$0xf]  ;;  %v5530_v16 = vld [vmem:[%s6338_s21 + $0x1cc] sm:$0xf0]  ;;  %1757 = vmatpush.bf16.msra.mxu2 %v5006_v9  ;;  %v4734_v17 = vor.u32 %v5498_v14, %v4733_v12 }
 0x11b   : > { %v4862_v18 = vor.u32 %v5530_v16, %v4861_v15  ;;  %v4989_v19 = vld [vmem:[%s6338_s21 + $0x2c0] sm:$0xf]  ;;  %v5562_v20 = vld [vmem:[%s6338_s21 + $0x2cc] sm:$0xf0]  ;;  %1806 = vmatpush.bf16.msra.mxu3 %v5134_v13 }
 0x11c   : > { %v5117_v21 = vld [vmem:[%s6338_s21 + $0x3c0] sm:$0xf]  ;;  %v4990_v22 = vor.u32 %v5562_v20, %v4989_v19  ;;  %v5594_v23 = vld [vmem:[%s6338_s21 + $0x3cc] sm:$0xf0]  ;;  %1660 = vmatpush.bf16.msra.mxu0 %v4734_v17 }
 0x11d   : > { %v4717_v24 = vld [vmem:[%s6338_s21 + $0xa0] sm:$0xf]  ;;  %v5494_v25 = vld [vmem:[%s6338_s21 + $0xac] sm:$0xf0]  ;;  %v5118_v26 = vor.u32 %v5594_v23, %v5117_v21  ;;  %1709 = vmatpush.bf16.msra.mxu1 %v4862_v18 }
 0x11e   : > { %v4845_v27 = vld [vmem:[%s6338_s21 + $0x1a0] sm:$0xf]  ;;  %v5526_v28 = vld [vmem:[%s6338_s21 + $0x1ac] sm:$0xf0]  ;;  %v4718_v30 = vor.u32 %v5494_v25, %v4717_v24  ;;  %1758 = vmatpush.bf16.msra.mxu2 %v4990_v22 }
 0x11f   : > { %v4973_v29 = vld [vmem:[%s6338_s21 + $0x2a0] sm:$0xf]  ;;  %v5558_v31 = vld [vmem:[%s6338_s21 + $0x2ac] sm:$0xf0]  ;;  %v4846_v34 = vor.u32 %v5526_v28, %v4845_v27  ;;  %1807 = vmatpush.bf16.msra.mxu3 %v5118_v26 }
 0x120   : > { %v5101_v32 = vld [vmem:[%s6338_s21 + $0x3a0] sm:$0xf]  ;;  %v5590_v33 = vld [vmem:[%s6338_s21 + $0x3ac] sm:$0xf0]  ;;  %v4974_v35 = vor.u32 %v5558_v31, %v4973_v29  ;;  %1661 = vmatpush.bf16.msra.mxu0 %v4718_v30  ;;  %v5440_v31 = vld [vmem:[%s6320_s14 + $0x4] sm:$0xf] }
 0x121   : > { %v4701_v36 = vld [vmem:[%s6338_s21 + $0x80] sm:$0xf]  ;;  %v5490_v37 = vld [vmem:[%s6338_s21 + $0x8c] sm:$0xf0]  ;;  %v5102_v39 = vor.u32 %v5590_v33, %v5101_v32  ;;  %1710 = vmatpush.bf16.msra.mxu1 %v4846_v34  ;;  %v4511_v32 = vld [vmem:[%s6320_s14 + $0x10] sm:$0xf0] }
 0x122   : > { %v4829_v38 = vld [vmem:[%s6338_s21 + $0x180] sm:$0xf]  ;;  %v5522_v40 = vld [vmem:[%s6338_s21 + $0x18c] sm:$0xf0]  ;;  %v4702_v45 = vor.u32 %v5490_v37, %v4701_v36  ;;  %1759 = vmatpush.bf16.msra.mxu2 %v4974_v35  ;;  %v5564_v33 = vld [vmem:[%s6338_s21 + $0x2e4] sm:$0xf] }
 0x123   : > { %v4957_v41 = vld [vmem:[%s6338_s21 + $0x280] sm:$0xf]  ;;  %v5554_v42 = vld [vmem:[%s6338_s21 + $0x28c] sm:$0xf0]  ;;  %v4830_v46 = vor.u32 %v5522_v40, %v4829_v38  ;;  %1808 = vmatpush.bf16.msra.mxu3 %v5102_v39  ;;  %v5007_v34 = vld [vmem:[%s6338_s21 + $0x2f0] sm:$0xf0] }
 0x124   : > { %v5085_v43 = vld [vmem:[%s6338_s21 + $0x380] sm:$0xf]  ;;  %v5586_v44 = vld [vmem:[%s6338_s21 + $0x38c] sm:$0xf0]  ;;  %v4958_v47 = vor.u32 %v5554_v42, %v4957_v41  ;;  %1662 = vmatpush.bf16.msra.mxu0 %v4702_v45  ;;  %v4517_v36 = vld [vmem:[%s6320_s14 + $0x8] sm:$0xf]  ;;  %v5010_v45 = vor.u32 %v5564_v33, %v5007_v34 }
 0x125   : > { %v4685_v48 = vld [vmem:[%s6338_s21 + $0x60] sm:$0xf]  ;;  %v5486_v49 = vld [vmem:[%s6338_s21 + $0x6c] sm:$0xf0]  ;;  %v5086_v51 = vor.u32 %v5586_v44, %v5085_v43  ;;  %1711 = vmatpush.bf16.msra.mxu1 %v4830_v46  ;;  %v5596_v37 = vld [vmem:[%s6338_s21 + $0x3e4] sm:$0xf] }
 0x126   : > { %v4813_v50 = vld [vmem:[%s6338_s21 + $0x160] sm:$0xf]  ;;  %v5518_v52 = vld [vmem:[%s6338_s21 + $0x16c] sm:$0xf0]  ;;  %v4686_v57 = vor.u32 %v5486_v49, %v4685_v48  ;;  %1760 = vmatpush.bf16.msra.mxu2 %v4958_v47  ;;  %v5135_v38 = vld [vmem:[%s6338_s21 + $0x3f0] sm:$0xf0] }
 0x127   : > { %v4941_v53 = vld [vmem:[%s6338_s21 + $0x260] sm:$0xf]  ;;  %v5550_v54 = vld [vmem:[%s6338_s21 + $0x26c] sm:$0xf0]  ;;  %v4814_v58 = vor.u32 %v5518_v52, %v4813_v50  ;;  %1809 = vmatpush.bf16.msra.mxu3 %v5086_v51  ;;  %v5443_v41 = vld [vmem:[%s6320_s14 + $0x14] sm:$0xf0]  ;;  %v5138_v50 = vor.u32 %v5596_v37, %v5135_v38 }
 0x128   : > { %v5069_v55 = vld [vmem:[%s6338_s21 + $0x360] sm:$0xf]  ;;  %v5582_v56 = vld [vmem:[%s6338_s21 + $0x36c] sm:$0xf0]  ;;  %v4942_v59 = vor.u32 %v5550_v54, %v4941_v53  ;;  %1663 = vmatpush.bf16.msra.mxu0 %v4686_v57  ;;  %v5441_v42 = vld [vmem:[%s6320_s14 + $0xc] sm:$0xf]  ;;  %v6490_v54 = vor.u32 %v5440_v31, %v4511_v32 }
 0x129   : > { %v4669_v60 = vld [vmem:[%s6338_s21 + $0x40] sm:$0xf]  ;;  %v5482_v61 = vld [vmem:[%s6338_s21 + $0x4c] sm:$0xf0]  ;;  %v5070_v63 = vor.u32 %v5582_v56, %v5069_v55  ;;  %1712 = vmatpush.bf16.msra.mxu1 %v4814_v58  ;;  %v4519_v43 = vld [vmem:[%s6320_s14 + $0x18] sm:$0xf0]  ;;  %v6492_v55 = vor.u32 %v5443_v41, %v4517_v36 }
 0x12a   : > { %v4797_v62 = vld [vmem:[%s6338_s21 + $0x140] sm:$0xf]  ;;  %v5514_v0 = vld [vmem:[%s6338_s21 + $0x14c] sm:$0xf0]  ;;  %v4670_v5 = vor.u32 %v5482_v61, %v4669_v60  ;;  %1761 = vmatpush.bf16.msra.mxu2 %v4942_v59  ;;  %v5500_v46 = vld [vmem:[%s6338_s21 + $0xe4] sm:$0xf]  ;;  %v6496_v58 = vor.u32 %v5441_v42, %v4519_v43 }
 0x12b   : > { %v4925_v1 = vld [vmem:[%s6338_s21 + $0x240] sm:$0xf]  ;;  %v5546_v2 = vld [vmem:[%s6338_s21 + $0x24c] sm:$0xf0]  ;;  %v4798_v6 = vor.u32 %v5514_v0, %v4797_v62  ;;  %1810 = vmatpush.bf16.msra.mxu3 %v5070_v63  ;;  %v4751_v47 = vld [vmem:[%s6338_s21 + $0xf0] sm:$0xf0] }
 0x12c   : > { %v5053_v3 = vld [vmem:[%s6338_s21 + $0x340] sm:$0xf]  ;;  %v5578_v4 = vld [vmem:[%s6338_s21 + $0x34c] sm:$0xf0]  ;;  %v4926_v7 = vor.u32 %v5546_v2, %v4925_v1  ;;  %1664 = vmatpush.bf16.msra.mxu0 %v4670_v5  ;;  %v5532_v48 = vld [vmem:[%s6338_s21 + $0x1e4] sm:$0xf]  ;;  %v4754_v59 = vor.u32 %v5500_v46, %v4751_v47 }
 0x12d   : > { %v4653_v8 = vld [vmem:[%s6338_s21 + $0x20] sm:$0xf]  ;;  %v5478_v9 = vld [vmem:[%s6338_s21 + $0x2c] sm:$0xf0]  ;;  %v5054_v11 = vor.u32 %v5578_v4, %v5053_v3  ;;  %1713 = vmatpush.bf16.msra.mxu1 %v4798_v6  ;;  %v4879_v51 = vld [vmem:[%s6338_s21 + $0x1f0] sm:$0xf0] }
 0x12e   : > { %v4781_v10 = vld [vmem:[%s6338_s21 + $0x120] sm:$0xf]  ;;  %v5510_v12 = vld [vmem:[%s6338_s21 + $0x12c] sm:$0xf0]  ;;  %v4654_v18 = vor.u32 %v5478_v9, %v4653_v8  ;;  %1762 = vmatpush.bf16.msra.mxu2 %v4926_v7  ;;  %v5560_v52 = vld [vmem:[%s6338_s21 + $0x2c4] sm:$0xf]  ;;  %v4882_v60 = vor.u32 %v5532_v48, %v4879_v51 }
 0x12f   : > { %v4909_v13 = vld [vmem:[%s6338_s21 + $0x220] sm:$0xf]  ;;  %v5542_v14 = vld [vmem:[%s6338_s21 + $0x22c] sm:$0xf0]  ;;  %v4782_v22 = vor.u32 %v5510_v12, %v4781_v10  ;;  %1811 = vmatpush.bf16.msra.mxu3 %v5054_v11  ;;  %v4991_v53 = vld [vmem:[%s6338_s21 + $0x2d0] sm:$0xf0] }
 0x130   : > { %v5037_v15 = vld [vmem:[%s6338_s21 + $0x320] sm:$0xf]  ;;  %v5574_v16 = vld [vmem:[%s6338_s21 + $0x32c] sm:$0xf0]  ;;  %v4910_v23 = vor.u32 %v5542_v14, %v4909_v13  ;;  %1665 = vmatpush.bf16.msra.mxu0 %v4654_v18  ;;  %v5592_v56 = vld [vmem:[%s6338_s21 + $0x3c4] sm:$0xf]  ;;  %v4994_v61 = vor.u32 %v5560_v52, %v4991_v53 }
 0x131   : > { %v4637_v17 = vld [vmem:[%s6338_s21] sm:$0xf]  ;;  %v5474_v19 = vld [vmem:[%s6338_s21 + $0xc] sm:$0xf0]  ;;  %v5038_v27 = vor.u32 %v5574_v16, %v5037_v15  ;;  %1714 = vmatpush.bf16.msra.mxu1 %v4782_v22  ;;  %v5119_v57 = vld [vmem:[%s6338_s21 + $0x3d0] sm:$0xf0] }
 0x132   : > { %v4765_v20 = vld [vmem:[%s6338_s21 + $0x100] sm:$0xf]  ;;  %v5506_v21 = vld [vmem:[%s6338_s21 + $0x10c] sm:$0xf0]  ;;  %v4638_v35 = vor.u32 %v5474_v19, %v4637_v17  ;;  %1763 = vmatpush.bf16.msra.mxu2 %v4910_v23  ;;  %v5496_v62 = vld [vmem:[%s6338_s21 + $0xc4] sm:$0xf]  ;;  %v5122_v0 = vor.u32 %v5592_v56, %v5119_v57 }
 0x133   : > { %v4893_v24 = vld [vmem:[%s6338_s21 + $0x200] sm:$0xf]  ;;  %v5538_v25 = vld [vmem:[%s6338_s21 + $0x20c] sm:$0xf0]  ;;  %v4766_v39 = vor.u32 %v5506_v21, %v4765_v20  ;;  %1812 = vmatpush.bf16.msra.mxu3 %v5038_v27  ;;  %v4735_v63 = vld [vmem:[%s6338_s21 + $0xd0] sm:$0xf0] }
 0x134   : > { %v5021_v26 = vld [vmem:[%s6338_s21 + $0x300] sm:$0xf]  ;;  %v5570_v28 = vld [vmem:[%s6338_s21 + $0x30c] sm:$0xf0]  ;;  %v4894_v40 = vor.u32 %v5538_v25, %v4893_v24  ;;  %1666 = vmatpush.bf16.msra.mxu0 %v4638_v35  ;;  %v5528_v1 = vld [vmem:[%s6338_s21 + $0x1c4] sm:$0xf]  ;;  %v4738_v3 = vor.u32 %v5496_v62, %v4735_v63 }
 0x135   : > { %v4509_v29 = vld [vmem:[%s6320_s14] sm:$0xf]  ;;  %v5442_v30 = vld [vmem:[%s6320_s14 + $0xc] sm:$0xf0]  ;;  %v5022_v44 = vor.u32 %v5570_v28, %v5021_v26  ;;  %1715 = vmatpush.bf16.msra.mxu1 %v4766_v39  ;;  %v4863_v2 = vld [vmem:[%s6338_s21 + $0x1d0] sm:$0xf0] }
 0x136   : > { %v6485_v49 = vor.u32 %v5442_v30, %v4509_v29  ;;  %1764 = vmatpush.bf16.msra.mxu2 %v4894_v40  ;;  %v5556_v4 = vld [vmem:[%s6338_s21 + $0x2a4] sm:$0xf]  ;;  %v4975_v5 = vld [vmem:[%s6338_s21 + $0x2b0] sm:$0xf0]  ;;  %v4866_v7 = vor.u32 %v5528_v1, %v4863_v2  ;;  %v4525_v17 = vld [vmem:[%s6320_s14 + $0x20] sm:$0xf] }
 0x137   : > { %1813 = vmatpush.bf16.msra.mxu3 %v5022_v44  ;;  %v5588_v6 = vld [vmem:[%s6338_s21 + $0x3a4] sm:$0xf]  ;;  %v4978_v8 = vor.u32 %v5556_v4, %v4975_v5  ;;  %v5103_v9 = vld [vmem:[%s6338_s21 + $0x3b0] sm:$0xf0]  ;;  %v5446_v18 = vld [vmem:[%s6320_s14 + $0x2c] sm:$0xf0] }
 0x138   : > { %1667 = vmatmul.bf16.vlgmr.msra.gmra.mxu0 %v6485_v49  ;;  %1716 = vmatmul.bf16.vlgmr.msra.gmra.mxu1 %v6490_v54  ;;  %v5492_v10 = vld [vmem:[%s6338_s21 + $0xa4] sm:$0xf]  ;;  %v4719_v11 = vld [vmem:[%s6338_s21 + $0xb0] sm:$0xf0]  ;;  %v5106_v12 = vor.u32 %v5588_v6, %v5103_v9  ;;  %v4533_v21 = vld [vmem:[%s6320_s14 + $0x28] sm:$0xf]  ;;  %v6522_v25 = vor.u32 %v5446_v18, %v4525_v17 }
 0x139   : > { %1765 = vmatmul.bf16.vlgmr.msra.gmra.mxu2 %v6492_v55  ;;  %1855 = vmatpush.bf16.msrb.mxu0 %v4754_v59  ;;  %v5524_v13 = vld [vmem:[%s6338_s21 + $0x1a4] sm:$0xf]  ;;  %v4847_v14 = vld [vmem:[%s6338_s21 + $0x1b0] sm:$0xf0]  ;;  %v4722_v15 = vor.u32 %v5492_v10, %v4719_v11  ;;  %v5447_v22 = vld [vmem:[%s6320_s14 + $0x34] sm:$0xf0] }
 0x13a   : > { %1953 = vmatpush.bf16.msrb.mxu2 %v5010_v45  ;;  %1814 = vmatmul.bf16.vlgmr.msra.gmra.mxu3 %v6496_v58  ;;  %v4850_v16 = vor.u32 %v5524_v13, %v4847_v14  ;;  %v5444_v19 = vld [vmem:[%s6320_s14 + $0x24] sm:$0xf]  ;;  %v4527_v20 = vld [vmem:[%s6320_s14 + $0x30] sm:$0xf0]  ;;  %v5445_v23 = vld [vmem:[%s6320_s14 + $0x2c] sm:$0xf]  ;;  %v6526_v27 = vor.u32 %v5447_v22, %v4533_v21 }
 0x13b   : > { %2002 = vmatpush.bf16.msrb.mxu3 %v5138_v50  ;;  %1904 = vmatpush.bf16.msrb.mxu1 %v4882_v60  ;;  %v4535_v24 = vld [vmem:[%s6320_s14 + $0x38] sm:$0xf0]  ;;  %v6524_v26 = vor.u32 %v5444_v19, %v4527_v20  ;;  %v5552_v29 = vld [vmem:[%s6338_s21 + $0x284] sm:$0xf]  ;;  %v4959_v30 = vld [vmem:[%s6338_s21 + $0x290] sm:$0xf0] }
 0x13c   : > { %v6528_v28 = vor.u32 %v5445_v23, %v4535_v24  ;;  %v5584_v31 = vld [vmem:[%s6338_s21 + $0x384] sm:$0xf]  ;;  %v4962_v32 = vor.u32 %v5552_v29, %v4959_v30  ;;  %v5087_v33 = vld [vmem:[%s6338_s21 + $0x390] sm:$0xf0]  ;;  %v4541_v41 = vld [vmem:[%s6320_s14 + $0x40] sm:$0xf] }
 0x13d   : > { %1856 = vmatpush.bf16.msrb.mxu0 %v4738_v3  ;;  %v5488_v34 = vld [vmem:[%s6338_s21 + $0x84] sm:$0xf]  ;;  %v4703_v35 = vld [vmem:[%s6338_s21 + $0x90] sm:$0xf0]  ;;  %v5090_v36 = vor.u32 %v5584_v31, %v5087_v33  ;;  %v5450_v42 = vld [vmem:[%s6320_s14 + $0x4c] sm:$0xf0] }
 0x13e   : > { %1954 = vmatpush.bf16.msrb.mxu2 %v4994_v61  ;;  %v4706_v37 = vor.u32 %v5488_v34, %v4703_v35  ;;  %v5520_v38 = vld [vmem:[%s6338_s21 + $0x184] sm:$0xf]  ;;  %v4831_v39 = vld [vmem:[%s6338_s21 + $0x190] sm:$0xf0]  ;;  %v4549_v45 = vld [vmem:[%s6320_s14 + $0x48] sm:$0xf]  ;;  %v6550_v50 = vor.u32 %v5450_v42, %v4541_v41 }
 0x13f   : > { %2003 = vmatpush.bf16.msrb.mxu3 %v5122_v0  ;;  %1905 = vmatpush.bf16.msrb.mxu1 %v4866_v7  ;;  %v4834_v40 = vor.u32 %v5520_v38, %v4831_v39  ;;  %v5448_v43 = vld [vmem:[%s6320_s14 + $0x44] sm:$0xf]  ;;  %v4543_v44 = vld [vmem:[%s6320_s14 + $0x50] sm:$0xf0]  ;;  %v5451_v46 = vld [vmem:[%s6320_s14 + $0x54] sm:$0xf0] }
 0x140   : > { %v5449_v47 = vld [vmem:[%s6320_s14 + $0x4c] sm:$0xf]  ;;  %v4551_v48 = vld [vmem:[%s6320_s14 + $0x58] sm:$0xf0]  ;;  %v6552_v51 = vor.u32 %v5448_v43, %v4543_v44  ;;  %v6554_v52 = vor.u32 %v5451_v46, %v4549_v45  ;;  %v5548_v56 = vld [vmem:[%s6338_s21 + $0x264] sm:$0xf] }
 0x141   : > { %1857 = vmatpush.bf16.msrb.mxu0 %v4722_v15  ;;  %v6556_v53 = vor.u32 %v5449_v47, %v4551_v48  ;;  %v4943_v57 = vld [vmem:[%s6338_s21 + $0x270] sm:$0xf0]  ;;  %v5580_v59 = vld [vmem:[%s6338_s21 + $0x364] sm:$0xf]  ;;  %v4557_v5 = vld [vmem:[%s6320_s14 + $0x60] sm:$0xf] }
 0x142   : > { %1955 = vmatpush.bf16.msrb.mxu2 %v4978_v8  ;;  %v4946_v60 = vor.u32 %v5548_v56, %v4943_v57  ;;  %v5071_v61 = vld [vmem:[%s6338_s21 + $0x370] sm:$0xf0]  ;;  %v5484_v62 = vld [vmem:[%s6338_s21 + $0x64] sm:$0xf]  ;;  %v5454_v6 = vld [vmem:[%s6320_s14 + $0x6c] sm:$0xf0] }
 0x143   : > { %2004 = vmatpush.bf16.msrb.mxu3 %v5106_v12  ;;  %1906 = vmatpush.bf16.msrb.mxu1 %v4850_v16  ;;  %v4687_v63 = vld [vmem:[%s6338_s21 + $0x70] sm:$0xf0]  ;;  %v5074_v0 = vor.u32 %v5580_v59, %v5071_v61  ;;  %v5516_v2 = vld [vmem:[%s6338_s21 + $0x164] sm:$0xf]  ;;  %v4565_v9 = vld [vmem:[%s6320_s14 + $0x68] sm:$0xf]  ;;  %v6578_v13 = vor.u32 %v5454_v6, %v4557_v5 }
 0x144   : > { %v4690_v1 = vor.u32 %v5484_v62, %v4687_v63  ;;  %v4815_v3 = vld [vmem:[%s6338_s21 + $0x170] sm:$0xf0]  ;;  %v5452_v7 = vld [vmem:[%s6320_s14 + $0x64] sm:$0xf]  ;;  %v5455_v10 = vld [vmem:[%s6320_s14 + $0x74] sm:$0xf0] }
 0x145   : > { %1858 = vmatpush.bf16.msrb.mxu0 %v4706_v37  ;;  %v4818_v4 = vor.u32 %v5516_v2, %v4815_v3  ;;  %v4559_v8 = vld [vmem:[%s6320_s14 + $0x70] sm:$0xf0]  ;;  %v5453_v11 = vld [vmem:[%s6320_s14 + $0x6c] sm:$0xf]  ;;  %v4567_v12 = vld [vmem:[%s6320_s14 + $0x78] sm:$0xf0]  ;;  %v6582_v15 = vor.u32 %v5455_v10, %v4565_v9 }
 0x146   : > { %1956 = vmatpush.bf16.msrb.mxu2 %v4962_v32  ;;  %v6580_v14 = vor.u32 %v5452_v7, %v4559_v8  ;;  %v6584_v16 = vor.u32 %v5453_v11, %v4567_v12  ;;  %v5544_v17 = vld [vmem:[%s6338_s21 + $0x244] sm:$0xf]  ;;  %v4927_v18 = vld [vmem:[%s6338_s21 + $0x250] sm:$0xf0]  ;;  %v4573_v33 = vld [vmem:[%s6320_s14 + $0x80] sm:$0xf] }
 0x147   : > { %2005 = vmatpush.bf16.msrb.mxu3 %v5090_v36  ;;  %1907 = vmatpush.bf16.msrb.mxu1 %v4834_v40  ;;  %v5576_v19 = vld [vmem:[%s6338_s21 + $0x344] sm:$0xf]  ;;  %v4930_v20 = vor.u32 %v5544_v17, %v4927_v18  ;;  %v5055_v21 = vld [vmem:[%s6338_s21 + $0x350] sm:$0xf0]  ;;  %v5458_v34 = vld [vmem:[%s6320_s14 + $0x8c] sm:$0xf0] }
 0x148   : > { %1672 = vmatmul.bf16.gmra.mxu0 %v6522_v25  ;;  %1721 = vmatmul.bf16.gmra.mxu1 %v6524_v26  ;;  %v5480_v22 = vld [vmem:[%s6338_s21 + $0x44] sm:$0xf]  ;;  %v4671_v23 = vld [vmem:[%s6338_s21 + $0x50] sm:$0xf0]  ;;  %v5058_v24 = vor.u32 %v5576_v19, %v5055_v21  ;;  %v4581_v37 = vld [vmem:[%s6320_s14 + $0x88] sm:$0xf]  ;;  %v6606_v41 = vor.u32 %v5458_v34, %v4573_v33 }
 0x149   : > { %1770 = vmatmul.bf16.gmra.mxu2 %v6526_v27  ;;  %1859 = vmatpush.bf16.msrb.mxu0 %v4690_v1  ;;  %v4674_v29 = vor.u32 %v5480_v22, %v4671_v23  ;;  %v5512_v30 = vld [vmem:[%s6338_s21 + $0x144] sm:$0xf]  ;;  %v4799_v31 = vld [vmem:[%s6338_s21 + $0x150] sm:$0xf0]  ;;  %v5459_v38 = vld [vmem:[%s6320_s14 + $0x94] sm:$0xf0] }
 0x14a   : > { %1819 = vmatmul.bf16.gmra.mxu3 %v6528_v28  ;;  %1957 = vmatpush.bf16.msrb.mxu2 %v4946_v60  ;;  %v4802_v32 = vor.u32 %v5512_v30, %v4799_v31  ;;  %v5456_v35 = vld [vmem:[%s6320_s14 + $0x84] sm:$0xf]  ;;  %v4575_v36 = vld [vmem:[%s6320_s14 + $0x90] sm:$0xf0]  ;;  %v5457_v39 = vld [vmem:[%s6320_s14 + $0x8c] sm:$0xf]  ;;  %v6610_v43 = vor.u32 %v5459_v38, %v4581_v37 }
 0x14b   : > { %2006 = vmatpush.bf16.msrb.mxu3 %v5074_v0  ;;  %1908 = vmatpush.bf16.msrb.mxu1 %v4818_v4  ;;  %v4583_v40 = vld [vmem:[%s6320_s14 + $0x98] sm:$0xf0]  ;;  %v6608_v42 = vor.u32 %v5456_v35, %v4575_v36  ;;  %v5540_v45 = vld [vmem:[%s6338_s21 + $0x224] sm:$0xf]  ;;  %v4911_v46 = vld [vmem:[%s6338_s21 + $0x230] sm:$0xf0] }
 0x14c   : > { %v6612_v44 = vor.u32 %v5457_v39, %v4583_v40  ;;  %v5572_v47 = vld [vmem:[%s6338_s21 + $0x324] sm:$0xf]  ;;  %v4914_v48 = vor.u32 %v5540_v45, %v4911_v46  ;;  %v5039_v56 = vld [vmem:[%s6338_s21 + $0x330] sm:$0xf0]  ;;  %v4589_v1 = vld [vmem:[%s6320_s14 + $0xa0] sm:$0xf] }
 0x14d   : > { %1860 = vmatpush.bf16.msrb.mxu0 %v4674_v29  ;;  %v5476_v57 = vld [vmem:[%s6338_s21 + $0x24] sm:$0xf]  ;;  %v4655_v59 = vld [vmem:[%s6338_s21 + $0x30] sm:$0xf0]  ;;  %v5042_v60 = vor.u32 %v5572_v47, %v5039_v56  ;;  %v5462_v2 = vld [vmem:[%s6320_s14 + $0xac] sm:$0xf0] }
 0x14e   : > { %1958 = vmatpush.bf16.msrb.mxu2 %v4930_v20  ;;  %v4658_v61 = vor.u32 %v5476_v57, %v4655_v59  ;;  %v5508_v62 = vld [vmem:[%s6338_s21 + $0x124] sm:$0xf]  ;;  %v4783_v63 = vld [vmem:[%s6338_s21 + $0x130] sm:$0xf0]  ;;  %v4597_v5 = vld [vmem:[%s6320_s14 + $0xa8] sm:$0xf]  ;;  %v6634_v9 = vor.u32 %v5462_v2, %v4589_v1 }
 0x14f   : > { %2007 = vmatpush.bf16.msrb.mxu3 %v5058_v24  ;;  %1909 = vmatpush.bf16.msrb.mxu1 %v4802_v32  ;;  %v4786_v0 = vor.u32 %v5508_v62, %v4783_v63  ;;  %v5460_v3 = vld [vmem:[%s6320_s14 + $0xa4] sm:$0xf]  ;;  %v4591_v4 = vld [vmem:[%s6320_s14 + $0xb0] sm:$0xf0]  ;;  %v5463_v6 = vld [vmem:[%s6320_s14 + $0xb4] sm:$0xf0] }
 0x150   : > { %v5461_v7 = vld [vmem:[%s6320_s14 + $0xac] sm:$0xf]  ;;  %v4599_v8 = vld [vmem:[%s6320_s14 + $0xb8] sm:$0xf0]  ;;  %8143 = vst [vmem:[#allocation9_spill] sm:$0xff] %v6634_v9  ;;  %v6636_v10 = vor.u32 %v5460_v3, %v4591_v4  ;;  %v6638_v11 = vor.u32 %v5463_v6, %v4597_v5 }
 0x151   : > { %1861 = vmatpush.bf16.msrb.mxu0 %v4658_v61  ;;  %v6640_v12 = vor.u32 %v5461_v7, %v4599_v8  ;;  %v5536_v17 = vld [vmem:[%s6338_s21 + $0x204] sm:$0xf]  ;;  %v4895_v18 = vld [vmem:[%s6338_s21 + $0x210] sm:$0xf0]  ;;  %v4605_v33 = vld [vmem:[%s6320_s14 + $0xc0] sm:$0xf] }
 0x152   : > { %1959 = vmatpush.bf16.msrb.mxu2 %v4914_v48  ;;  %8144 = vst [vmem:[#allocation10_spill] sm:$0xff] %v6636_v10  ;;  %v5568_v19 = vld [vmem:[%s6338_s21 + $0x304] sm:$0xf]  ;;  %v4898_v20 = vor.u32 %v5536_v17, %v4895_v18  ;;  %v5023_v21 = vld [vmem:[%s6338_s21 + $0x310] sm:$0xf0] }
 0x153   : > { %2008 = vmatpush.bf16.msrb.mxu3 %v5042_v60  ;;  %1910 = vmatpush.bf16.msrb.mxu1 %v4786_v0  ;;  %8145 = vst [vmem:[#allocation11_spill] sm:$0xff] %v6638_v11  ;;  %v5472_v22 = vld [vmem:[%s6338_s21 + $0x4] sm:$0xf]  ;;  %v4639_v23 = vld [vmem:[%s6338_s21 + $0x10] sm:$0xf0]  ;;  %v5026_v24 = vor.u32 %v5568_v19, %v5023_v21 }
 0x154   : > { %8146 = vst [vmem:[#allocation12_spill] sm:$0xff] %v6640_v12  ;;  %v4642_v29 = vor.u32 %v5472_v22, %v4639_v23  ;;  %v5504_v30 = vld [vmem:[%s6338_s21 + $0x104] sm:$0xf]  ;;  %v4767_v31 = vld [vmem:[%s6338_s21 + $0x110] sm:$0xf0] }
 0x155   : > { %v4770_v32 = vor.u32 %v5504_v30, %v4767_v31  ;;  %v5466_v34 = vld [vmem:[%s6320_s14 + $0xcc] sm:$0xf0]  ;;  %v5464_v35 = vld [vmem:[%s6320_s14 + $0xc4] sm:$0xf]  ;;  %v4607_v36 = vld [vmem:[%s6320_s14 + $0xd0] sm:$0xf0] }
 0x156   : > { %1960 = vmatpush.bf16.msrb.mxu2 %v4898_v20  ;;  %1862 = vmatpush.bf16.msrb.mxu0 %v4642_v29  ;;  %v4613_v37 = vld [vmem:[%s6320_s14 + $0xc8] sm:$0xf]  ;;  %v5467_v38 = vld [vmem:[%s6320_s14 + $0xd4] sm:$0xf0]  ;;  %v5465_v39 = vld [vmem:[%s6320_s14 + $0xcc] sm:$0xf]  ;;  %v6662_v45 = vor.u32 %v5466_v34, %v4605_v33  ;;  %v6664_v46 = vor.u32 %v5464_v35, %v4607_v36 }
 0x157   : > { %2009 = vmatpush.bf16.msrb.mxu3 %v5026_v24  ;;  %1911 = vmatpush.bf16.msrb.mxu1 %v4770_v32  ;;  %v4615_v40 = vld [vmem:[%s6320_s14 + $0xd8] sm:$0xf0]  ;;  %v6666_v47 = vor.u32 %v5467_v38, %v4613_v37  ;;  %v5013_v56 = vld [vmem:[%s6338_s21 + $0x2e8] sm:$0xf]  ;;  %v5567_v57 = vld [vmem:[%s6338_s21 + $0x2f4] sm:$0xf0] }
 0x158   : > { %1677 = vmatmul.bf16.gmra.mxu0 %v6550_v50  ;;  %1726 = vmatmul.bf16.gmra.mxu1 %v6552_v51  ;;  %v6668_v48 = vor.u32 %v5465_v39, %v4615_v40  ;;  %v5141_v59 = vld [vmem:[%s6338_s21 + $0x3e8] sm:$0xf]  ;;  %v5014_v60 = vor.u32 %v5567_v57, %v5013_v56  ;;  %v5599_v61 = vld [vmem:[%s6338_s21 + $0x3f4] sm:$0xf0]  ;;  %v4621_v63 = vld [vmem:[%s6320_s14 + $0xe0] sm:$0xf] }
 0x159   : > { %1775 = vmatmul.bf16.gmra.mxu2 %v6554_v52  ;;  %v5142_v62 = vor.u32 %v5599_v61, %v5141_v59  ;;  %v5470_v0 = vld [vmem:[%s6320_s14 + $0xec] sm:$0xf0]  ;;  %v5468_v1 = vld [vmem:[%s6320_s14 + $0xe4] sm:$0xf]  ;;  %v4623_v2 = vld [vmem:[%s6320_s14 + $0xf0] sm:$0xf0] }
 0x15a   : > { %1824 = vmatmul.bf16.gmra.mxu3 %v6556_v53  ;;  %2149 = vmatpush.bf16.msra.mxu2 %v5014_v60  ;;  %v4629_v3 = vld [vmem:[%s6320_s14 + $0xe8] sm:$0xf]  ;;  %v5471_v4 = vld [vmem:[%s6320_s14 + $0xf4] sm:$0xf0]  ;;  %v5469_v5 = vld [vmem:[%s6320_s14 + $0xec] sm:$0xf]  ;;  %v6686_v7 = vor.u32 %v5470_v0, %v4621_v63  ;;  %v6688_v8 = vor.u32 %v5468_v1, %v4623_v2 }
 0x15b   : > { %2198 = vmatpush.bf16.msra.mxu3 %v5142_v62  ;;  %v4631_v6 = vld [vmem:[%s6320_s14 + $0xf8] sm:$0xf0]  ;;  %v6690_v17 = vor.u32 %v5471_v4, %v4629_v3  ;;  %v4757_v29 = vld [vmem:[%s6338_s21 + $0xe8] sm:$0xf]  ;;  %v5503_v30 = vld [vmem:[%s6338_s21 + $0xf4] sm:$0xf0] }
 0x15c   : > { %8147 = vst [vmem:[#allocation13_spill] sm:$0xff] %v6686_v7  ;;  %v6692_v18 = vor.u32 %v5469_v5, %v4631_v6  ;;  %v4885_v31 = vld [vmem:[%s6338_s21 + $0x1e8] sm:$0xf]  ;;  %v4758_v33 = vor.u32 %v5503_v30, %v4757_v29  ;;  %v5535_v34 = vld [vmem:[%s6338_s21 + $0x1f4] sm:$0xf0] }
 0x15d   : > { %8148 = vst [vmem:[#allocation14_spill] sm:$0xff] %v6688_v8  ;;  %v4886_v37 = vor.u32 %v5535_v34, %v4885_v31  ;;  %v4997_v59 = vld [vmem:[%s6338_s21 + $0x2c8] sm:$0xf]  ;;  %v5563_v60 = vld [vmem:[%s6338_s21 + $0x2d4] sm:$0xf0] }
 0x15e   : > { %8149 = vst [vmem:[#allocation15_spill] sm:$0xff] %v6690_v17  ;;  %2051 = vmatpush.bf16.msra.mxu0 %v4758_v33  ;;  %v5125_v61 = vld [vmem:[%s6338_s21 + $0x3c8] sm:$0xf]  ;;  %v4998_v63 = vor.u32 %v5563_v60, %v4997_v59  ;;  %v5595_v0 = vld [vmem:[%s6338_s21 + $0x3d4] sm:$0xf0] }
 0x15f   : > { %8150 = vst [vmem:[#allocation16_spill] sm:$0xff] %v6692_v18  ;;  %2100 = vmatpush.bf16.msra.mxu1 %v4886_v37  ;;  %v5126_v3 = vor.u32 %v5595_v0, %v5125_v61  ;;  %v5591_v59 = vld [vmem:[%s6338_s21 + $0x3b4] sm:$0xf0] }
 0x160   : > { %2150 = vmatpush.bf16.msra.mxu2 %v4998_v63 }
 0x161   : > { %2199 = vmatpush.bf16.msra.mxu3 %v5126_v3  ;;  %v4725_v3 = vld [vmem:[%s6338_s21 + $0xa8] sm:$0xf] }
 0x168   : > { %1682 = vmatmul.bf16.gmra.mxu0 %v6578_v13  ;;  %1731 = vmatmul.bf16.gmra.mxu1 %v6580_v14 }
 0x169   : > { %1780 = vmatmul.bf16.gmra.mxu2 %v6582_v15 }
 0x16a   : > { %1829 = vmatmul.bf16.gmra.mxu3 %v6584_v16 }
 0x178   : > { %1687 = vmatmul.bf16.gmra.mxu0 %v6606_v41  ;;  %1736 = vmatmul.bf16.gmra.mxu1 %v6608_v42 }
 0x179   : > { %1785 = vmatmul.bf16.gmra.mxu2 %v6610_v43 }
 0x17a   : > { %1834 = vmatmul.bf16.gmra.mxu3 %v6612_v44 }
 0x188   : > { %1692 = vmatmul.bf16.gmra.mxu0 %v6634_v9  ;;  %1741 = vmatmul.bf16.gmra.mxu1 %v6636_v10 }
 0x189   : > { %1790 = vmatmul.bf16.gmra.mxu2 %v6638_v11 }
 0x18a   : > { %1839 = vmatmul.bf16.gmra.mxu3 %v6640_v12 }
 0x198   : > { %1697 = vmatmul.bf16.gmra.mxu0 %v6662_v45  ;;  %1746 = vmatmul.bf16.gmra.mxu1 %v6664_v46 }
 0x199   : > { %1795 = vmatmul.bf16.gmra.mxu2 %v6666_v47 }
 0x19a   : > { %1844 = vmatmul.bf16.gmra.mxu3 %v6668_v48 }
 0x1a8   : > { %1702 = vmatmul.bf16.gmra.mxu0 %v6686_v7  ;;  %1751 = vmatmul.bf16.gmra.mxu1 %v6688_v8 }
 0x1a9   : > { %1800 = vmatmul.bf16.gmra.mxu2 %v6690_v17 }
 0x1aa   : > { %1849 = vmatmul.bf16.gmra.mxu3 %v6692_v18 }
 0x1b5   : > { %v1668_v19 = vpop.f32.mrf.mxu0  ;;  %v1717_v20 = vpop.f32.mrf.mxu1 }
 0x1b6   : > { %v1718_v21 = vadd.f32 %v1717_v20, %v1668_v19  ;;  %v4741_v19 = vld [vmem:[%s6338_s21 + $0xc8] sm:$0xf]  ;;  %v5499_v20 = vld [vmem:[%s6338_s21 + $0xd4] sm:$0xf0] }
 0x1b8   : > { %1863 = vmatmul.bf16.vlgmr.msrb.gmra.mxu0 %v6485_v49  ;;  %1912 = vmatmul.bf16.vlgmr.msrb.gmra.mxu1 %v6490_v54 }
 0x1b9   : > { %1961 = vmatmul.bf16.vlgmr.msrb.gmra.mxu2 %v6492_v55 }
 0x1ba   : > { %2010 = vmatmul.bf16.vlgmr.msrb.gmra.mxu3 %v6496_v58 }
 0x1bc   : > { %v1766_v22 = vpop.f32.mrf.mxu2 }
 0x1bd   : > { %v1767_v23 = vadd.f32 %v1766_v22, %v1718_v21  ;;  %v1815_v24 = vpop.f32.mrf.mxu3  ;;  %v1670_v32 = vpop.f32.mrf.mxu0  ;;  %v4869_v21 = vld [vmem:[%s6338_s21 + $0x1c8] sm:$0xf] }
 0x1be   : > { %v1719_v35 = vpop.f32.mrf.mxu1 }
 0x1bf   : > { %v6706_v36 = vadd.f32 %v1815_v24, %v1767_v23  ;;  %v1720_v38 = vadd.f32 %v1719_v35, %v1670_v32  ;;  %v4742_v23 = vor.u32 %v5499_v20, %v4741_v19  ;;  %v5531_v24 = vld [vmem:[%s6338_s21 + $0x1d4] sm:$0xf0]  ;;  %v4853_v19 = vld [vmem:[%s6338_s21 + $0x1a8] sm:$0xf] }
 0x1c0   : > { %v4870_v31 = vor.u32 %v5531_v24, %v4869_v21  ;;  %v5527_v20 = vld [vmem:[%s6338_s21 + $0x1b4] sm:$0xf0] }
 0x1c1   : > { %2052 = vmatpush.bf16.msra.mxu0 %v4742_v23  ;;  %v4854_v23 = vor.u32 %v5527_v20, %v4853_v19 }
 0x1c2   : > { %2101 = vmatpush.bf16.msra.mxu1 %v4870_v31 }
 0x1c4   : > { %v1768_v39 = vpop.f32.mrf.mxu2 }
 0x1c5   : > { %v1769_v40 = vadd.f32 %v1768_v39, %v1720_v38  ;;  %v1817_v56 = vpop.f32.mrf.mxu3  ;;  %v1673_v57 = vpop.f32.mrf.mxu0  ;;  %v4981_v38 = vld [vmem:[%s6338_s21 + $0x2a8] sm:$0xf]  ;;  %v5559_v39 = vld [vmem:[%s6338_s21 + $0x2b4] sm:$0xf0] }
 0x1c6   : > { %v1722_v62 = vpop.f32.mrf.mxu1  ;;  %2102 = vmatpush.bf16.msra.mxu1 %v4854_v23 }
 0x1c7   : > { %v6712_v1 = vadd.f32 %v1817_v56, %v1769_v40  ;;  %v1723_v2 = vadd.f32 %v1722_v62, %v1673_v57  ;;  %v4982_v56 = vor.u32 %v5559_v39, %v4981_v38  ;;  %v5109_v57 = vld [vmem:[%s6338_s21 + $0x3a8] sm:$0xf] }
 0x1c8   : > { %1868 = vmatmul.bf16.gmra.mxu0 %v6522_v25  ;;  %1917 = vmatmul.bf16.gmra.mxu1 %v6524_v26  ;;  %v5110_v62 = vor.u32 %v5591_v59, %v5109_v57  ;;  %v5093_v39 = vld [vmem:[%s6338_s21 + $0x388] sm:$0xf] }
 0x1c9   : > { %1966 = vmatmul.bf16.gmra.mxu2 %v6526_v27 }
 0x1ca   : > { %2015 = vmatmul.bf16.gmra.mxu3 %v6528_v28  ;;  %2151 = vmatpush.bf16.msra.mxu2 %v4982_v56 }
 0x1cb   : > { %2200 = vmatpush.bf16.msra.mxu3 %v5110_v62 }
 0x1cc   : > { %v1771_v4 = vpop.f32.mrf.mxu2 }
 0x1cd   : > { %v1772_v5 = vadd.f32 %v1771_v4, %v1723_v2  ;;  %v1820_v6 = vpop.f32.mrf.mxu3  ;;  %v1675_v22 = vpop.f32.mrf.mxu0  ;;  %v5495_v4 = vld [vmem:[%s6338_s21 + $0xb4] sm:$0xf0] }
 0x1ce   : > { %v1724_v29 = vpop.f32.mrf.mxu1 }
 0x1cf   : > { %v6722_v30 = vadd.f32 %v1820_v6, %v1772_v5  ;;  %v1725_v32 = vadd.f32 %v1724_v29, %v1675_v22  ;;  %v4726_v6 = vor.u32 %v5495_v4, %v4725_v3 }
 0x1d1   : > { %2053 = vmatpush.bf16.msra.mxu0 %v4726_v6  ;;  %v5523_v6 = vld [vmem:[%s6338_s21 + $0x194] sm:$0xf0] }
 0x1d4   : > { %v1773_v33 = vpop.f32.mrf.mxu2 }
 0x1d5   : > { %v1774_v34 = vadd.f32 %v1773_v33, %v1725_v32  ;;  %v1822_v35 = vpop.f32.mrf.mxu3  ;;  %v1678_v37 = vpop.f32.mrf.mxu0 }
 0x1d6   : > { %v1727_v40 = vpop.f32.mrf.mxu1 }
 0x1d7   : > { %v6728_v60 = vadd.f32 %v1822_v35, %v1774_v34  ;;  %v1728_v61 = vadd.f32 %v1727_v40, %v1678_v37  ;;  %v4965_v34 = vld [vmem:[%s6338_s21 + $0x288] sm:$0xf]  ;;  %v5555_v35 = vld [vmem:[%s6338_s21 + $0x294] sm:$0xf0] }
 0x1d8   : > { %1873 = vmatmul.bf16.gmra.mxu0 %v6550_v50  ;;  %1922 = vmatmul.bf16.gmra.mxu1 %v6552_v51  ;;  %v4966_v38 = vor.u32 %v5555_v35, %v4965_v34  ;;  %v5587_v40 = vld [vmem:[%s6338_s21 + $0x394] sm:$0xf0] }
 0x1d9   : > { %1971 = vmatmul.bf16.gmra.mxu2 %v6554_v52  ;;  %v5094_v59 = vor.u32 %v5587_v40, %v5093_v39  ;;  %v5551_v34 = vld [vmem:[%s6338_s21 + $0x274] sm:$0xf0] }
 0x1da   : > { %2020 = vmatmul.bf16.gmra.mxu3 %v6556_v53  ;;  %2152 = vmatpush.bf16.msra.mxu2 %v4966_v38  ;;  %v5077_v38 = vld [vmem:[%s6338_s21 + $0x368] sm:$0xf]  ;;  %v5583_v39 = vld [vmem:[%s6338_s21 + $0x374] sm:$0xf0] }
 0x1db   : > { %2201 = vmatpush.bf16.msra.mxu3 %v5094_v59  ;;  %v5078_v59 = vor.u32 %v5583_v39, %v5077_v38  ;;  %v5061_v39 = vld [vmem:[%s6338_s21 + $0x348] sm:$0xf] }
 0x1dc   : > { %v1776_v63 = vpop.f32.mrf.mxu2 }
 0x1dd   : > { %v1777_v0 = vadd.f32 %v1776_v63, %v1728_v61  ;;  %v1825_v2 = vpop.f32.mrf.mxu3  ;;  %v1680_v5 = vpop.f32.mrf.mxu0 }
 0x1de   : > { %v1729_v21 = vpop.f32.mrf.mxu1 }
 0x1df   : > { %v6738_v22 = vadd.f32 %v1825_v2, %v1777_v0  ;;  %v1730_v24 = vadd.f32 %v1729_v21, %v1680_v5  ;;  %v4709_v0 = vld [vmem:[%s6338_s21 + $0x88] sm:$0xf]  ;;  %v5491_v2 = vld [vmem:[%s6338_s21 + $0x94] sm:$0xf0]  ;;  %2202 = vmatpush.bf16.msra.mxu3 %v5078_v59 }
 0x1e0   : > { %v4710_v4 = vor.u32 %v5491_v2, %v4709_v0  ;;  %v4837_v5 = vld [vmem:[%s6338_s21 + $0x188] sm:$0xf]  ;;  %v5487_v2 = vld [vmem:[%s6338_s21 + $0x74] sm:$0xf0] }
 0x1e1   : > { %v4838_v21 = vor.u32 %v5523_v6, %v4837_v5  ;;  %v4693_v0 = vld [vmem:[%s6338_s21 + $0x68] sm:$0xf]  ;;  %v5519_v6 = vld [vmem:[%s6338_s21 + $0x174] sm:$0xf0] }
 0x1e2   : > { %2054 = vmatpush.bf16.msra.mxu0 %v4710_v4  ;;  %v4694_v4 = vor.u32 %v5487_v2, %v4693_v0  ;;  %v4821_v5 = vld [vmem:[%s6338_s21 + $0x168] sm:$0xf]  ;;  %v5483_v2 = vld [vmem:[%s6338_s21 + $0x54] sm:$0xf0] }
 0x1e3   : > { %2103 = vmatpush.bf16.msra.mxu1 %v4838_v21  ;;  %v4677_v0 = vld [vmem:[%s6338_s21 + $0x48] sm:$0xf] }
 0x1e4   : > { %v1778_v29 = vpop.f32.mrf.mxu2 }
 0x1e5   : > { %v1779_v31 = vadd.f32 %v1778_v29, %v1730_v24  ;;  %v1827_v32 = vpop.f32.mrf.mxu3  ;;  %v1683_v33 = vpop.f32.mrf.mxu0 }
 0x1e6   : > { %v1732_v37 = vpop.f32.mrf.mxu1  ;;  %2055 = vmatpush.bf16.msra.mxu0 %v4694_v4 }
 0x1e7   : > { %v6744_v56 = vadd.f32 %v1827_v32, %v1779_v31  ;;  %v1733_v57 = vadd.f32 %v1732_v37, %v1683_v33  ;;  %v4949_v33 = vld [vmem:[%s6338_s21 + $0x268] sm:$0xf] }
 0x1e8   : > { %1878 = vmatmul.bf16.gmra.mxu0 %v6578_v13  ;;  %1927 = vmatmul.bf16.gmra.mxu1 %v6580_v14  ;;  %v4950_v37 = vor.u32 %v5551_v34, %v4949_v33  ;;  %v4933_v34 = vld [vmem:[%s6338_s21 + $0x248] sm:$0xf] }
 0x1e9   : > { %1976 = vmatmul.bf16.gmra.mxu2 %v6582_v15 }
 0x1ea   : > { %2025 = vmatmul.bf16.gmra.mxu3 %v6584_v16  ;;  %2153 = vmatpush.bf16.msra.mxu2 %v4950_v37 }
 0x1ec   : > { %v1781_v61 = vpop.f32.mrf.mxu2 }
 0x1ed   : > { %v1782_v62 = vadd.f32 %v1781_v61, %v1733_v57  ;;  %v1830_v63 = vpop.f32.mrf.mxu3  ;;  %v1685_v3 = vpop.f32.mrf.mxu0 }
 0x1ee   : > { %v1734_v19 = vpop.f32.mrf.mxu1 }
 0x1ef   : > { %v6754_v20 = vadd.f32 %v1830_v63, %v1782_v62  ;;  %v1735_v23 = vadd.f32 %v1734_v19, %v1685_v3 }
 0x1f4   : > { %v1783_v24 = vpop.f32.mrf.mxu2 }
 0x1f5   : > { %v1784_v29 = vadd.f32 %v1783_v24, %v1735_v23  ;;  %v1832_v31 = vpop.f32.mrf.mxu3  ;;  %v1688_v32 = vpop.f32.mrf.mxu0  ;;  %v4822_v23 = vor.u32 %v5519_v6, %v4821_v5  ;;  %v4805_v5 = vld [vmem:[%s6338_s21 + $0x148] sm:$0xf]  ;;  %v5515_v6 = vld [vmem:[%s6338_s21 + $0x154] sm:$0xf0] }
 0x1f6   : > { %v1737_v35 = vpop.f32.mrf.mxu1 }
 0x1f7   : > { %v6760_v40 = vadd.f32 %v1832_v31, %v1784_v29  ;;  %v1738_v57 = vadd.f32 %v1737_v35, %v1688_v32  ;;  %2104 = vmatpush.bf16.msra.mxu1 %v4822_v23  ;;  %v5547_v35 = vld [vmem:[%s6338_s21 + $0x254] sm:$0xf0]  ;;  %v4678_v23 = vor.u32 %v5483_v2, %v4677_v0  ;;  %v4901_v2 = vld [vmem:[%s6338_s21 + $0x208] sm:$0xf] }
 0x1f8   : > { %1883 = vmatmul.bf16.gmra.mxu0 %v6606_v41  ;;  %1932 = vmatmul.bf16.gmra.mxu1 %v6608_v42  ;;  %v4934_v38 = vor.u32 %v5547_v35, %v4933_v34  ;;  %v5543_v34 = vld [vmem:[%s6338_s21 + $0x234] sm:$0xf0]  ;;  %v5045_v35 = vld [vmem:[%s6338_s21 + $0x328] sm:$0xf] }
 0x1f9   : > { %1981 = vmatmul.bf16.gmra.mxu2 %v6610_v43  ;;  %2056 = vmatpush.bf16.msra.mxu0 %v4678_v23  ;;  %v5571_v23 = vld [vmem:[%s6338_s21 + $0x314] sm:$0xf0] }
 0x1fa   : > { %2030 = vmatmul.bf16.gmra.mxu3 %v6612_v44  ;;  %2154 = vmatpush.bf16.msra.mxu2 %v4934_v38  ;;  %v5575_v38 = vld [vmem:[%s6338_s21 + $0x334] sm:$0xf0] }
 0x1fc   : > { %v1786_v61 = vpop.f32.mrf.mxu2 }
 0x1fd   : > { %v1787_v62 = vadd.f32 %v1786_v61, %v1738_v57  ;;  %v1835_v63 = vpop.f32.mrf.mxu3  ;;  %v1690_v3 = vpop.f32.mrf.mxu0  ;;  %v5579_v57 = vld [vmem:[%s6338_s21 + $0x354] sm:$0xf0] }
 0x1fe   : > { %v1739_v19 = vpop.f32.mrf.mxu1 }
 0x1ff   : > { %v6770_v21 = vadd.f32 %v1835_v63, %v1787_v62  ;;  %v1740_v24 = vadd.f32 %v1739_v19, %v1690_v3  ;;  %v5062_v62 = vor.u32 %v5579_v57, %v5061_v39  ;;  %v5046_v39 = vor.u32 %v5575_v38, %v5045_v35  ;;  %v4661_v57 = vld [vmem:[%s6338_s21 + $0x28] sm:$0xf] }
 0x201   : > { %8151 = vst [vmem:[#allocation17_spill] sm:$0xff] %v6770_v21  ;;  %2203 = vmatpush.bf16.msra.mxu3 %v5062_v62  ;;  %v4789_v62 = vld [vmem:[%s6338_s21 + $0x128] sm:$0xf] }
 0x204   : > { %v1788_v29 = vpop.f32.mrf.mxu2 }
 0x205   : > { %v1789_v31 = vadd.f32 %v1788_v29, %v1740_v24  ;;  %v1837_v32 = vpop.f32.mrf.mxu3  ;;  %v1693_v33 = vpop.f32.mrf.mxu0  ;;  %v4806_v24 = vor.u32 %v5515_v6, %v4805_v5  ;;  %2204 = vmatpush.bf16.msra.mxu3 %v5046_v39  ;;  %v5507_v39 = vld [vmem:[%s6338_s21 + $0x114] sm:$0xf0] }
 0x206   : > { %v1742_v37 = vpop.f32.mrf.mxu1 }
 0x207   : > { %v6776_v59 = vadd.f32 %v1837_v32, %v1789_v31  ;;  %v1743_v61 = vadd.f32 %v1742_v37, %v1693_v33  ;;  %2105 = vmatpush.bf16.msra.mxu1 %v4806_v24  ;;  %v4917_v33 = vld [vmem:[%s6338_s21 + $0x228] sm:$0xf] }
 0x208   : > { %1888 = vmatmul.bf16.gmra.mxu0 %v6634_v9  ;;  %1937 = vmatmul.bf16.gmra.mxu1 %v6636_v10  ;;  %v4918_v37 = vor.u32 %v5543_v34, %v4917_v33  ;;  %v4645_v34 = vld [vmem:[%s6338_s21 + $0x8] sm:$0xf] }
 0x209   : > { %8152 = vst [vmem:[#allocation18_spill] sm:$0xff] %v6776_v59  ;;  %1986 = vmatmul.bf16.gmra.mxu2 %v6638_v11  ;;  %v4773_v59 = vld [vmem:[%s6338_s21 + $0x108] sm:$0xf] }
 0x20a   : > { %2035 = vmatmul.bf16.gmra.mxu3 %v6640_v12  ;;  %2155 = vmatpush.bf16.msra.mxu2 %v4918_v37 }
 0x20c   : > { %v1791_v63 = vpop.f32.mrf.mxu2 }
 0x20d   : > { %v1792_v3 = vadd.f32 %v1791_v63, %v1743_v61  ;;  %v1840_v4 = vpop.f32.mrf.mxu3  ;;  %v1695_v19 = vpop.f32.mrf.mxu0  ;;  %v5479_v61 = vld [vmem:[%s6338_s21 + $0x34] sm:$0xf0] }
 0x20e   : > { %v1744_v29 = vpop.f32.mrf.mxu1  ;;  %v5511_v63 = vld [vmem:[%s6338_s21 + $0x134] sm:$0xf0] }
 0x20f   : > { %v6786_v31 = vadd.f32 %v1840_v4, %v1792_v3  ;;  %v1745_v32 = vadd.f32 %v1744_v29, %v1695_v19  ;;  %v5539_v3 = vld [vmem:[%s6338_s21 + $0x214] sm:$0xf0]  ;;  %v5029_v19 = vld [vmem:[%s6338_s21 + $0x308] sm:$0xf]  ;;  %v4662_v29 = vor.u32 %v5479_v61, %v4661_v57  ;;  %v4790_v33 = vor.u32 %v5511_v63, %v4789_v62 }
 0x210   : > { %v4902_v38 = vor.u32 %v5539_v3, %v4901_v2  ;;  %v5030_v21 = vor.u32 %v5571_v23, %v5029_v19 }
 0x211   : > { %8153 = vst [vmem:[#allocation19_spill] sm:$0xff] %v6786_v31  ;;  %v5475_v31 = vld [vmem:[%s6338_s21 + $0x14] sm:$0xf0]  ;;  %2106 = vmatpush.bf16.msra.mxu1 %v4790_v33  ;;  %2057 = vmatpush.bf16.msra.mxu0 %v4662_v29 }
 0x212   : > { %v4646_v57 = vor.u32 %v5475_v31, %v4645_v34  ;;  %2156 = vmatpush.bf16.msra.mxu2 %v4902_v38  ;;  %2205 = vmatpush.bf16.msra.mxu3 %v5030_v21 }
 0x214   : > { %v1793_v0 = vpop.f32.mrf.mxu2 }
 0x215   : > { %v1794_v4 = vadd.f32 %v1793_v0, %v1745_v32  ;;  %v1842_v5 = vpop.f32.mrf.mxu3  ;;  %v1698_v6 = vpop.f32.mrf.mxu0  ;;  %v4774_v32 = vor.u32 %v5507_v39, %v4773_v59  ;;  %2058 = vmatpush.bf16.msra.mxu0 %v4646_v57  ;;  %v5940_v57 = vmov 0  }
 0x216   : > { %v1747_v24 = vpop.f32.mrf.mxu1  ;;  %5724 = vset.pattern.permute.xlu0 %v5940_v57  ;;  %5725 = vset.pattern.permute.xlu1 %v5940_v57 }
 0x217   : > { %v6801_v35 = vadd.f32 %v1842_v5, %v1794_v4  ;;  %v1748_v37 = vadd.f32 %v1747_v24, %v1698_v6  ;;  %2107 = vmatpush.bf16.msra.mxu1 %v4774_v32  ;;  %v3115_v32 = vld [vmem:[%s6325_s17] sm:$0xff]  ;;  %5726 = vset.pattern.permute.xlu2 %v5940_v57 }
 0x218   : > { %1893 = vmatmul.bf16.gmra.mxu0 %v6662_v45  ;;  %1942 = vmatmul.bf16.gmra.mxu1 %v6664_v46 }
 0x219   : > { %1991 = vmatmul.bf16.gmra.mxu2 %v6666_v47  ;;  %3133 = vperm.xlu0 %5724, %v3115_v32   ;;  %v4759_v32 = vld [vmem:[%s6338_s21 + $0xf8] sm:$0xf0] }
 0x21a   : > { %2040 = vmatmul.bf16.gmra.mxu3 %v6668_v48 }
 0x21c   : > { %v1796_v61 = vpop.f32.mrf.mxu2 }
 0x21d   : > { %v1797_v62 = vadd.f32 %v1796_v61, %v1748_v37  ;;  %v1845_v63 = vpop.f32.mrf.mxu3  ;;  %v1700_v0 = vpop.f32.mrf.mxu0 }
 0x21e   : > { %v1749_v2 = vpop.f32.mrf.mxu1 }
 0x21f   : > { %v6810_v3 = vadd.f32 %v1845_v63, %v1797_v62  ;;  %v1750_v59 = vadd.f32 %v1749_v2, %v1700_v0  ;;  %v5565_v2 = vld [vmem:[%s6338_s21 + $0x2ec] sm:$0xf] }
 0x224   : > { %v1798_v4 = vpop.f32.mrf.mxu2 }
 0x225   : > { %v1799_v5 = vadd.f32 %v1798_v4, %v1750_v59  ;;  %v1847_v6 = vpop.f32.mrf.mxu3  ;;  %v1703_v19 = vpop.f32.mrf.mxu0  ;;  %v5015_v59 = vld [vmem:[%s6338_s21 + $0x2f8] sm:$0xf0] }
 0x226   : > { %v1752_v23 = vpop.f32.mrf.mxu1 }
 0x227   : > { %v6812_v24 = vadd.f32 %v1847_v6, %v1799_v5  ;;  %v1753_v31 = vadd.f32 %v1752_v23, %v1703_v19  ;;  %v5018_v5 = vor.u32 %v5565_v2, %v5015_v59  ;;  %v5597_v6 = vld [vmem:[%s6338_s21 + $0x3ec] sm:$0xf]  ;;  %v5143_v19 = vld [vmem:[%s6338_s21 + $0x3f8] sm:$0xf0] }
 0x228   : > { %1898 = vmatmul.bf16.gmra.mxu0 %v6686_v7  ;;  %1947 = vmatmul.bf16.gmra.mxu1 %v6688_v8 }
 0x229   : > { %1996 = vmatmul.bf16.gmra.mxu2 %v6690_v17 }
 0x22a   : > { %2045 = vmatmul.bf16.gmra.mxu3 %v6692_v18  ;;  %2345 = vmatpush.bf16.msrb.mxu2 %v5018_v5  ;;  %v3117_v5 = vld [vmem:[%s6325_s17 + $0x10] sm:$0xff] }
 0x22b   : > { %3143 = vperm.xlu1 %5725, %v3117_v5   ;;  %v4743_v5 = vld [vmem:[%s6338_s21 + $0xd8] sm:$0xf0] }
 0x22c   : > { %v1801_v21 = vpop.f32.mrf.mxu2 }
 0x22d   : > { %v1802_v29 = vadd.f32 %v1801_v21, %v1753_v31  ;;  %v1850_v33 = vpop.f32.mrf.mxu3  ;;  %v1705_v34 = vpop.f32.mrf.mxu0  ;;  %v5146_v21 = vor.u32 %v5597_v6, %v5143_v19 }
 0x22e   : > { %v1754_v37 = vpop.f32.mrf.mxu1 }
 0x22f   : > { %v6818_v38 = vadd.f32 %v1850_v33, %v1802_v29  ;;  %v1755_v39 = vadd.f32 %v1754_v37, %v1705_v34  ;;  %v3116_v29 = vld [vmem:[%s6325_s17 + $0x8] sm:$0xff]  ;;  %2394 = vmatpush.bf16.msrb.mxu3 %v5146_v21 }
 0x230   : > { %3138 = vperm.xlu0 %5724, %v3116_v29   ;;  %v5561_v29 = vld [vmem:[%s6338_s21 + $0x2cc] sm:$0xf] }
 0x231   : > { %8154 = vst [vmem:[#allocation20_spill] sm:$0xff] %v6818_v38 }
 0x234   : > { %v1803_v61 = vpop.f32.mrf.mxu2 }
 0x235   : > { %v1804_v62 = vadd.f32 %v1803_v61, %v1755_v39  ;;  %v1852_v63 = vpop.f32.mrf.mxu3  ;;  %v1864_v0 = vpop.f32.mrf.mxu0  ;;  %v5501_v39 = vld [vmem:[%s6338_s21 + $0xec] sm:$0xf] }
 0x236   : > { %v1913_v4 = vpop.f32.mrf.mxu1  ;;  %v4762_v61 = vor.u32 %v5501_v39, %v4759_v32 }
 0x237   : > { %v6825_v23 = vadd.f32 %v1852_v63, %v1804_v62  ;;  %v1914_v31 = vadd.f32 %v1913_v4, %v1864_v0  ;;  %v5533_v62 = vld [vmem:[%s6338_s21 + $0x1ec] sm:$0xf]  ;;  %v4887_v63 = vld [vmem:[%s6338_s21 + $0x1f8] sm:$0xf0] }
 0x238   : > { %2059 = vmatmul.bf16.vlgmr.msra.gmra.mxu0 %v6485_v49  ;;  %2108 = vmatmul.bf16.vlgmr.msra.gmra.mxu1 %v6490_v54  ;;  %v4890_v59 = vor.u32 %v5533_v62, %v4887_v63  ;;  %v3118_v62 = vld [vmem:[%s6325_s17 + $0x18] sm:$0xff] }
 0x239   : > { %8155 = vst [vmem:[#allocation21_spill] sm:$0xff] %v6825_v23  ;;  %2157 = vmatmul.bf16.vlgmr.msra.gmra.mxu2 %v6492_v55  ;;  %2247 = vmatpush.bf16.msrb.mxu0 %v4762_v61  ;;  %v5593_v23 = vld [vmem:[%s6338_s21 + $0x3cc] sm:$0xf] }
 0x23a   : > { %2206 = vmatmul.bf16.vlgmr.msra.gmra.mxu3 %v6496_v58  ;;  %2296 = vmatpush.bf16.msrb.mxu1 %v4890_v59 }
 0x23b   : > { %3148 = vperm.xlu1 %5725, %v3118_v62   ;;  %v5557_v62 = vld [vmem:[%s6338_s21 + $0x2ac] sm:$0xf] }
 0x23c   : > { %v1962_v33 = vpop.f32.mrf.mxu2 }
 0x23d   : > { %v1963_v34 = vadd.f32 %v1962_v33, %v1914_v31  ;;  %v2011_v37 = vpop.f32.mrf.mxu3  ;;  %v1866_v57 = vpop.f32.mrf.mxu0  ;;  %v4999_v33 = vld [vmem:[%s6338_s21 + $0x2d8] sm:$0xf0] }
 0x23e   : > { %v1915_v0 = vpop.f32.mrf.mxu1  ;;  %v5002_v32 = vor.u32 %v5561_v29, %v4999_v33 }
 0x23f   : > { %v6836_v2 = vadd.f32 %v2011_v37, %v1963_v34  ;;  %v1916_v4 = vadd.f32 %v1915_v0, %v1866_v57  ;;  %v5127_v34 = vld [vmem:[%s6338_s21 + $0x3d8] sm:$0xf0] }
 0x240   : > { %2346 = vmatpush.bf16.msrb.mxu2 %v5002_v32  ;;  %v5130_v57 = vor.u32 %v5593_v23, %v5127_v34  ;;  %v4871_v23 = vld [vmem:[%s6338_s21 + $0x1d8] sm:$0xf0] }
 0x241   : > { %8156 = vst [vmem:[#allocation22_spill] sm:$0xff] %v6836_v2  ;;  %v5111_v2 = vld [vmem:[%s6338_s21 + $0x3b8] sm:$0xf0] }
 0x242   : > { %2395 = vmatpush.bf16.msrb.mxu3 %v5130_v57 }
 0x244   : > { %v1964_v6 = vpop.f32.mrf.mxu2 }
 0x245   : > { %v1965_v19 = vadd.f32 %v1964_v6, %v1916_v4  ;;  %v2013_v31 = vpop.f32.mrf.mxu3  ;;  %v1869_v21 = vpop.f32.mrf.mxu0  ;;  %v5497_v4 = vld [vmem:[%s6338_s21 + $0xcc] sm:$0xf] }
 0x246   : > { %v1918_v39 = vpop.f32.mrf.mxu1 }
 0x247   : > { %v6843_v37 = vadd.f32 %v2013_v31, %v1965_v19  ;;  %v1919_v61 = vadd.f32 %v1918_v39, %v1869_v21  ;;  %v4746_v19 = vor.u32 %v5497_v4, %v4743_v5  ;;  %v5529_v31 = vld [vmem:[%s6338_s21 + $0x1cc] sm:$0xf] }
 0x248   : > { %2064 = vmatmul.bf16.gmra.mxu0 %v6522_v25  ;;  %2113 = vmatmul.bf16.gmra.mxu1 %v6524_v26  ;;  %v4874_v33 = vor.u32 %v5529_v31, %v4871_v23  ;;  %v5589_v5 = vld [vmem:[%s6338_s21 + $0x3ac] sm:$0xf] }
 0x249   : > { %8157 = vst [vmem:[#allocation23_spill] sm:$0xff] %v6843_v37  ;;  %2162 = vmatmul.bf16.gmra.mxu2 %v6526_v27  ;;  %2248 = vmatpush.bf16.msrb.mxu0 %v4746_v19  ;;  %v5493_v23 = vld [vmem:[%s6338_s21 + $0xac] sm:$0xf] }
 0x24a   : > { %2211 = vmatmul.bf16.gmra.mxu3 %v6528_v28  ;;  %2297 = vmatpush.bf16.msrb.mxu1 %v4874_v33 }
 0x24c   : > { %v1967_v63 = vpop.f32.mrf.mxu2 }
 0x24d   : > { %v1968_v0 = vadd.f32 %v1967_v63, %v1919_v61  ;;  %v2016_v59 = vpop.f32.mrf.mxu3  ;;  %v1871_v6 = vpop.f32.mrf.mxu0  ;;  %v4983_v63 = vld [vmem:[%s6338_s21 + $0x2b8] sm:$0xf0] }
 0x24e   : > { %v1920_v21 = vpop.f32.mrf.mxu1  ;;  %v4986_v4 = vor.u32 %v5557_v62, %v4983_v63  ;;  %v3121_v62 = vld [vmem:[%s6325_s17 + $0x30] sm:$0xff] }
 0x24f   : > { %v6854_v29 = vadd.f32 %v2016_v59, %v1968_v0  ;;  %v1921_v39 = vadd.f32 %v1920_v21, %v1871_v6  ;;  %v5114_v59 = vor.u32 %v5589_v5, %v5111_v2  ;;  %v4727_v21 = vld [vmem:[%s6338_s21 + $0xb8] sm:$0xf0]  ;;  %3163 = vperm.xlu0 %5724, %v3121_v62   ;;  %v5489_v62 = vld [vmem:[%s6338_s21 + $0x8c] sm:$0xf] }
 0x250   : > { %2347 = vmatpush.bf16.msrb.mxu2 %v4986_v4 }
 0x251   : > { %8158 = vst [vmem:[#allocation24_spill] sm:$0xff] %v6854_v29  ;;  %2396 = vmatpush.bf16.msrb.mxu3 %v5114_v59  ;;  %v5553_v59 = vld [vmem:[%s6338_s21 + $0x28c] sm:$0xf] }
 0x254   : > { %v1969_v32 = vpop.f32.mrf.mxu2 }
 0x255   : > { %v1970_v34 = vadd.f32 %v1969_v32, %v1921_v39  ;;  %v2018_v61 = vpop.f32.mrf.mxu3  ;;  %v1874_v57 = vpop.f32.mrf.mxu0  ;;  %v5525_v39 = vld [vmem:[%s6338_s21 + $0x1ac] sm:$0xf]  ;;  %v4855_v32 = vld [vmem:[%s6338_s21 + $0x1b8] sm:$0xf0] }
 0x256   : > { %v1923_v37 = vpop.f32.mrf.mxu1 }
 0x257   : > { %v6860_v38 = vadd.f32 %v2018_v61, %v1970_v34  ;;  %v1924_v0 = vadd.f32 %v1923_v37, %v1874_v57  ;;  %v4730_v37 = vor.u32 %v5493_v23, %v4727_v21  ;;  %v4858_v61 = vor.u32 %v5525_v39, %v4855_v32  ;;  %v3119_v39 = vld [vmem:[%s6325_s17 + $0x20] sm:$0xff]  ;;  %v3122_v32 = vld [vmem:[%s6325_s17 + $0x38] sm:$0xff] }
 0x258   : > { %2069 = vmatmul.bf16.gmra.mxu0 %v6550_v50  ;;  %2118 = vmatmul.bf16.gmra.mxu1 %v6552_v51 }
 0x259   : > { %8159 = vst [vmem:[#allocation25_spill] sm:$0xff] %v6860_v38  ;;  %2167 = vmatmul.bf16.gmra.mxu2 %v6554_v52  ;;  %2249 = vmatpush.bf16.msrb.mxu0 %v4730_v37  ;;  %v5585_v38 = vld [vmem:[%s6338_s21 + $0x38c] sm:$0xf] }
 0x25a   : > { %2216 = vmatmul.bf16.gmra.mxu3 %v6556_v53  ;;  %2298 = vmatpush.bf16.msrb.mxu1 %v4858_v61 }
 0x25b   : > { %3153 = vperm.xlu2 %5726, %v3119_v39   ;;  %3168 = vperm.xlu1 %5725, %v3122_v32  }
 0x25c   : > { %v1972_v6 = vpop.f32.mrf.mxu2 }
 0x25d   : > { %v1973_v19 = vadd.f32 %v1972_v6, %v1924_v0  ;;  %v2021_v31 = vpop.f32.mrf.mxu3  ;;  %v1876_v33 = vpop.f32.mrf.mxu0  ;;  %v4967_v6 = vld [vmem:[%s6338_s21 + $0x298] sm:$0xf0] }
 0x25e   : > { %v1925_v2 = vpop.f32.mrf.mxu1  ;;  %v4970_v21 = vor.u32 %v5553_v59, %v4967_v6 }
 0x25f   : > { %v6870_v34 = vadd.f32 %v2021_v31, %v1973_v19  ;;  %v1926_v57 = vadd.f32 %v1925_v2, %v1876_v33  ;;  %v5095_v19 = vld [vmem:[%s6338_s21 + $0x398] sm:$0xf0] }
 0x260   : > { %2348 = vmatpush.bf16.msrb.mxu2 %v4970_v21  ;;  %v5098_v33 = vor.u32 %v5585_v38, %v5095_v19  ;;  %v3120_v19 = vld [vmem:[%s6325_s17 + $0x28] sm:$0xff] }
 0x261   : > { %8160 = vst [vmem:[#allocation26_spill] sm:$0xff] %v6870_v34  ;;  %v5581_v34 = vld [vmem:[%s6338_s21 + $0x36c] sm:$0xf] }
 0x262   : > { %2397 = vmatpush.bf16.msrb.mxu3 %v5098_v33 }
 0x263   : > { %3158 = vperm.xlu2 %5726, %v3120_v19   ;;  %v4695_v19 = vld [vmem:[%s6338_s21 + $0x78] sm:$0xf0] }
 0x264   : > { %v1974_v63 = vpop.f32.mrf.mxu2 }
 0x265   : > { %v1975_v4 = vadd.f32 %v1974_v63, %v1926_v57  ;;  %v2023_v5 = vpop.f32.mrf.mxu3  ;;  %v1879_v0 = vpop.f32.mrf.mxu0  ;;  %v4711_v63 = vld [vmem:[%s6338_s21 + $0x98] sm:$0xf0] }
 0x266   : > { %v1928_v23 = vpop.f32.mrf.mxu1 }
 0x267   : > { %v6877_v31 = vadd.f32 %v2023_v5, %v1975_v4  ;;  %v1929_v37 = vadd.f32 %v1928_v23, %v1879_v0  ;;  %v4714_v4 = vor.u32 %v5489_v62, %v4711_v63  ;;  %v5521_v5 = vld [vmem:[%s6338_s21 + $0x18c] sm:$0xf]  ;;  %v4839_v0 = vld [vmem:[%s6338_s21 + $0x198] sm:$0xf0] }
 0x268   : > { %2074 = vmatmul.bf16.gmra.mxu0 %v6578_v13  ;;  %2123 = vmatmul.bf16.gmra.mxu1 %v6580_v14  ;;  %v4842_v23 = vor.u32 %v5521_v5, %v4839_v0  ;;  %v4951_v62 = vld [vmem:[%s6338_s21 + $0x278] sm:$0xf0]  ;;  %v3124_v5 = vld [vmem:[%s6325_s17 + $0x48] sm:$0xff] }
 0x269   : > { %8161 = vst [vmem:[#allocation27_spill] sm:$0xff] %v6877_v31  ;;  %2172 = vmatmul.bf16.gmra.mxu2 %v6582_v15  ;;  %2250 = vmatpush.bf16.msrb.mxu0 %v4714_v4 }
 0x26a   : > { %2221 = vmatmul.bf16.gmra.mxu3 %v6584_v16  ;;  %2299 = vmatpush.bf16.msrb.mxu1 %v4842_v23 }
 0x26b   : > { %3178 = vperm.xlu0 %5724, %v3124_v5  }
 0x26c   : > { %v1977_v2 = vpop.f32.mrf.mxu2 }
 0x26d   : > { %v1978_v61 = vadd.f32 %v1977_v2, %v1929_v37  ;;  %v2026_v57 = vpop.f32.mrf.mxu3  ;;  %v1881_v38 = vpop.f32.mrf.mxu0  ;;  %v5549_v2 = vld [vmem:[%s6338_s21 + $0x26c] sm:$0xf] }
 0x26e   : > { %v1930_v59 = vpop.f32.mrf.mxu1  ;;  %v4954_v31 = vor.u32 %v5549_v2, %v4951_v62 }
 0x26f   : > { %v6889_v6 = vadd.f32 %v2026_v57, %v1978_v61  ;;  %v1931_v21 = vadd.f32 %v1930_v59, %v1881_v38  ;;  %v5079_v61 = vld [vmem:[%s6338_s21 + $0x378] sm:$0xf0] }
 0x270   : > { %2349 = vmatpush.bf16.msrb.mxu2 %v4954_v31  ;;  %v5082_v38 = vor.u32 %v5581_v34, %v5079_v61  ;;  %v5517_v34 = vld [vmem:[%s6338_s21 + $0x16c] sm:$0xf] }
 0x271   : > { %8162 = vst [vmem:[#allocation28_spill] sm:$0xff] %v6889_v6  ;;  %v5473_v6 = vld [vmem:[%s6338_s21 + $0xc] sm:$0xf] }
 0x272   : > { %2398 = vmatpush.bf16.msrb.mxu3 %v5082_v38 }
 0x274   : > { %v1979_v37 = vpop.f32.mrf.mxu2 }
 0x275   : > { %v1980_v33 = vadd.f32 %v1979_v37, %v1931_v21  ;;  %v2028_v39 = vpop.f32.mrf.mxu3  ;;  %v1884_v32 = vpop.f32.mrf.mxu0  ;;  %v5485_v21 = vld [vmem:[%s6338_s21 + $0x6c] sm:$0xf] }
 0x276   : > { %v1933_v63 = vpop.f32.mrf.mxu1  ;;  %v4698_v31 = vor.u32 %v5485_v21, %v4695_v19  ;;  %v4935_v21 = vld [vmem:[%s6338_s21 + $0x258] sm:$0xf0] }
 0x277   : > { %v6896_v57 = vadd.f32 %v2028_v39, %v1980_v33  ;;  %v1934_v4 = vadd.f32 %v1933_v63, %v1884_v32  ;;  %v4823_v33 = vld [vmem:[%s6338_s21 + $0x178] sm:$0xf0]  ;;  %v3125_v63 = vld [vmem:[%s6325_s17 + $0x50] sm:$0xff] }
 0x278   : > { %2079 = vmatmul.bf16.gmra.mxu0 %v6606_v41  ;;  %2128 = vmatmul.bf16.gmra.mxu1 %v6608_v42  ;;  %v4826_v2 = vor.u32 %v5517_v34, %v4823_v33  ;;  %v3123_v34 = vld [vmem:[%s6325_s17 + $0x40] sm:$0xff] }
 0x279   : > { %8163 = vst [vmem:[#allocation29_spill] sm:$0xff] %v6896_v57  ;;  %2177 = vmatmul.bf16.gmra.mxu2 %v6610_v43  ;;  %2251 = vmatpush.bf16.msrb.mxu0 %v4698_v31 }
 0x27a   : > { %2226 = vmatmul.bf16.gmra.mxu3 %v6612_v44  ;;  %2300 = vmatpush.bf16.msrb.mxu1 %v4826_v2  ;;  %v4679_v2 = vld [vmem:[%s6338_s21 + $0x58] sm:$0xf0] }
 0x27b   : > { %3183 = vperm.xlu1 %5725, %v3125_v63   ;;  %3173 = vperm.xlu2 %5726, %v3123_v34  }
 0x27c   : > { %v1982_v0 = vpop.f32.mrf.mxu2 }
 0x27d   : > { %v1983_v59 = vadd.f32 %v1982_v0, %v1934_v4  ;;  %v2031_v23 = vpop.f32.mrf.mxu3  ;;  %v1886_v37 = vpop.f32.mrf.mxu0  ;;  %v5545_v0 = vld [vmem:[%s6338_s21 + $0x24c] sm:$0xf] }
 0x27e   : > { %v1935_v39 = vpop.f32.mrf.mxu1  ;;  %v4938_v57 = vor.u32 %v5545_v0, %v4935_v21  ;;  %v5147_v21 = vmul.f32 -1.442695, %v6706_v36 }
 0x27f   : > { %v6907_v32 = vadd.f32 %v2031_v23, %v1983_v59  ;;  %v1936_v62 = vadd.f32 %v1935_v39, %v1886_v37  ;;  %v5577_v59 = vld [vmem:[%s6338_s21 + $0x34c] sm:$0xf]  ;;  %v5063_v23 = vld [vmem:[%s6338_s21 + $0x358] sm:$0xf0] }
 0x280   : > { %2350 = vmatpush.bf16.msrb.mxu2 %v4938_v57  ;;  %v5066_v31 = vor.u32 %v5577_v59, %v5063_v23  ;;  %v5481_v39 = vld [vmem:[%s6338_s21 + $0x4c] sm:$0xf]  ;;  %5727 = vpow2.f32 %v5147_v21  ;;  %v5149_v21 = vmul.f32 -1.442695, %v6712_v1 }
 0x281   : > { %8164 = vst [vmem:[#allocation30_spill] sm:$0xff] %v6907_v32  ;;  %v5513_v57 = vld [vmem:[%s6338_s21 + $0x14c] sm:$0xf] }
 0x282   : > { %2399 = vmatpush.bf16.msrb.mxu3 %v5066_v31  ;;  %v5541_v23 = vld [vmem:[%s6338_s21 + $0x22c] sm:$0xf]  ;;  %5729 = vpow2.f32 %v5149_v21 }
 0x283   : > { %v5573_v31 = vld [vmem:[%s6338_s21 + $0x32c] sm:$0xf] }
 0x284   : > { %v1984_v61 = vpop.f32.mrf.mxu2 }
 0x285   : > { %v1985_v4 = vadd.f32 %v1984_v61, %v1936_v62  ;;  %v2033_v38 = vpop.f32.mrf.mxu3  ;;  %v1889_v5 = vpop.f32.mrf.mxu0  ;;  %v4807_v61 = vld [vmem:[%s6338_s21 + $0x158] sm:$0xf0] }
 0x286   : > { %v1938_v19 = vpop.f32.mrf.mxu1 }
 0x287   : > { %v6914_v32 = vadd.f32 %v2033_v38, %v1985_v4  ;;  %v1939_v37 = vadd.f32 %v1938_v19, %v1889_v5  ;;  %v4682_v38 = vor.u32 %v5481_v39, %v4679_v2  ;;  %v4810_v5 = vor.u32 %v5513_v57, %v4807_v61  ;;  %v5477_v2 = vld [vmem:[%s6338_s21 + $0x2c] sm:$0xf]  ;;  %v3127_v57 = vld [vmem:[%s6325_s17 + $0x60] sm:$0xff]  ;;  %v4791_v61 = vld [vmem:[%s6338_s21 + $0x138] sm:$0xf0] }
 0x288   : > { %2084 = vmatmul.bf16.gmra.mxu0 %v6634_v9  ;;  %2133 = vmatmul.bf16.gmra.mxu1 %v6636_v10  ;;  %v4775_v10 = vld [vmem:[%s6338_s21 + $0x118] sm:$0xf0]  ;;  %v5728_v9 = vpop.eup %5727 }
 0x289   : > { %8165 = vst [vmem:[#allocation31_spill] sm:$0xff] %v6914_v32  ;;  %2182 = vmatmul.bf16.gmra.mxu2 %v6638_v11  ;;  %2252 = vmatpush.bf16.msrb.mxu0 %v4682_v38  ;;  %v5537_v38 = vld [vmem:[%s6338_s21 + $0x20c] sm:$0xf] }
 0x28a   : > { %2231 = vmatmul.bf16.gmra.mxu3 %v6640_v12  ;;  %2301 = vmatpush.bf16.msrb.mxu1 %v4810_v5  ;;  %v4903_v5 = vld [vmem:[%s6338_s21 + $0x218] sm:$0xf0]  ;;  %v5505_v11 = vld [vmem:[%s6338_s21 + $0x10c] sm:$0xf] }
 0x28b   : > { %3193 = vperm.xlu0 %5724, %v3127_v57   ;;  %v4906_v29 = vor.u32 %v5537_v38, %v4903_v5  ;;  %v4647_v12 = vld [vmem:[%s6338_s21 + $0x18] sm:$0xf0]  ;;  %v5151_v38 = vmul.f32 -1.442695, %v6722_v30 }
 0x28c   : > { %v1987_v33 = vpop.f32.mrf.mxu2 }
 0x28d   : > { %v1988_v62 = vadd.f32 %v1987_v33, %v1939_v37  ;;  %v2036_v63 = vpop.f32.mrf.mxu3  ;;  %v1891_v4 = vpop.f32.mrf.mxu0  ;;  %v4919_v37 = vld [vmem:[%s6338_s21 + $0x238] sm:$0xf0] }
 0x28e   : > { %v1940_v0 = vpop.f32.mrf.mxu1  ;;  %v4922_v34 = vor.u32 %v5541_v23, %v4919_v37  ;;  %v5047_v33 = vld [vmem:[%s6338_s21 + $0x338] sm:$0xf0] }
 0x28f   : > { %v6926_v19 = vadd.f32 %v2036_v63, %v1988_v62  ;;  %v1941_v59 = vadd.f32 %v1940_v0, %v1891_v4  ;;  %v5050_v39 = vor.u32 %v5573_v31, %v5047_v33  ;;  %v4663_v62 = vld [vmem:[%s6338_s21 + $0x38] sm:$0xf0]  ;;  %v5509_v63 = vld [vmem:[%s6338_s21 + $0x12c] sm:$0xf] }
 0x290   : > { %2351 = vmatpush.bf16.msrb.mxu2 %v4922_v34  ;;  %v5569_v31 = vld [vmem:[%s6338_s21 + $0x30c] sm:$0xf]  ;;  %v5031_v33 = vld [vmem:[%s6338_s21 + $0x318] sm:$0xf0]  ;;  %v4794_v32 = vor.u32 %v5509_v63, %v4791_v61  ;;  %v6953_v63 = vadd.f32 1.0, %v5728_v9 }
 0x291   : > { %8166 = vst [vmem:[#allocation32_spill] sm:$0xff] %v6926_v19  ;;  %2400 = vmatpush.bf16.msrb.mxu3 %v5050_v39  ;;  %v4666_v19 = vor.u32 %v5477_v2, %v4663_v62  ;;  %v3128_v2 = vld [vmem:[%s6325_s17 + $0x68] sm:$0xff]  ;;  %v4650_v62 = vor.u32 %v5473_v6, %v4647_v12  ;;  %v3126_v12 = vld [vmem:[%s6325_s17 + $0x58] sm:$0xff] }
 0x292   : > { %2302 = vmatpush.bf16.msrb.mxu1 %v4794_v32  ;;  %3198 = vperm.xlu1 %5725, %v3128_v2   ;;  %5731 = vrcp.f32 %v6953_v63  ;;  %v3130_v2 = vld [vmem:[%s6325_s17 + $0x78] sm:$0xff]  ;;  %vm2576_vm1 = vweird.f32 %v6953_v63 }
 0x293   : > { %2253 = vmatpush.bf16.msrb.mxu0 %v4666_v19  ;;  %3188 = vperm.xlu2 %5726, %v3126_v12   ;;  %5733 = vpow2.f32 %v5151_v38  ;;  %v5155_v12 = vmul.f32 -1.442695, %v6738_v22 }
 0x294   : > { %v1989_v4 = vpop.f32.mrf.mxu2  ;;  %2352 = vmatpush.bf16.msrb.mxu2 %v4906_v29  ;;  %v5730_v29 = vpop.eup %5729  ;;  %3208 = vperm.xlu0 %5724, %v3130_v2  }
 0x295   : > { %v1990_v0 = vadd.f32 %v1989_v4, %v1941_v59  ;;  %v2038_v23 = vpop.f32.mrf.mxu3  ;;  %v1894_v37 = vpop.f32.mrf.mxu0  ;;  %v5034_v59 = vor.u32 %v5569_v31, %v5031_v33  ;;  %v4778_v4 = vor.u32 %v5505_v11, %v4775_v10  ;;  %v6960_v9 = vadd.f32 1.0, %v5730_v29 }
 0x296   : > { %v1943_v34 = vpop.f32.mrf.mxu1 }
 0x297   : > { %v6943_v57 = vadd.f32 %v2038_v23, %v1990_v0  ;;  %v1944_v39 = vadd.f32 %v1943_v34, %v1894_v37  ;;  %2401 = vmatpush.bf16.msrb.mxu3 %v5034_v59  ;;  %2303 = vmatpush.bf16.msrb.mxu1 %v4778_v4  ;;  %v5153_v34 = vmul.f32 -1.442695, %v6728_v60  ;;  %5735 = vrcp.f32 %v6960_v9 }
 0x298   : > { %2089 = vmatmul.bf16.gmra.mxu0 %v6662_v45  ;;  %2138 = vmatmul.bf16.gmra.mxu1 %v6664_v46  ;;  %v6962_v33 = vpop.eup %5731  ;;  %vm2606_vm5 = vweird.f32 %v6960_v9 }
 0x299   : > { %8167 = vst [vmem:[#allocation33_spill] sm:$0xff] %v6943_v57  ;;  %2187 = vmatmul.bf16.gmra.mxu2 %v6666_v47  ;;  %2254 = vmatpush.bf16.msrb.mxu0 %v4650_v62  ;;  %v5734_v4 = vpop.eup %5733  ;;  %v2572_v62 = vmul.f32 %v6962_v33, %v6953_v63  ;;  %5737 = vpow2.f32 %v5153_v34  ;;  %v2580_v34 = vand.u32 2147483647, %v6953_v63  ;;  %vm2577_vm0 = vweird.f32 %v6962_v33 }
 0x29a   : > { %2236 = vmatmul.bf16.gmra.mxu3 %v6668_v48  ;;  %vm7006_vm2 = vmor %vm2576_vm1, %vm2577_vm0 }
 0x29b   : > { %vm2581_vm3 = vcmp.eq.f32.partialorder %v2580_v34, 8.507059e+37 }
 0x29c   : > { %v1992_v61 = vpop.f32.mrf.mxu2 }
 0x29d   : > { %v1993_v10 = vadd.f32 %v1992_v61, %v1944_v39  ;;  %v2041_v11 = vpop.f32.mrf.mxu3  ;;  %v1896_v32 = vpop.f32.mrf.mxu0  ;;  %v6975_v61 = vadd.f32 1.0, %v5734_v4 }
 0x29e   : > { %v1945_v5 = vpop.f32.mrf.mxu1 }
 0x29f   : > { %v6956_v0 = vadd.f32 %v2041_v11, %v1993_v10  ;;  %v1946_v19 = vadd.f32 %v1945_v5, %v1896_v32  ;;  %v2573_v11 = vsub.f32 1.0, %v2572_v62  ;;  %5739 = vrcp.f32 %v6975_v61 }
 0x2a0   : > { %5741 = vpow2.f32 %v5155_v12  ;;  %v5295_v12 = vld [vmem:[%s6336_s27 + $0xf0] sm:$0xf0]  ;;  %vm2636_vm9 = vweird.f32 %v6975_v61 }
 0x2a1   : > { %8168 = vst [vmem:[#allocation34_spill] sm:$0xff] %v6956_v0  ;;  %v5423_v0 = vld [vmem:[%s6336_s27 + $0x1f0] sm:$0xf0] }
 0x2a4   : > { %v1994_v6 = vpop.f32.mrf.mxu2 }
 0x2a5   : > { %v1995_v23 = vadd.f32 %v1994_v6, %v1946_v19  ;;  %v2043_v37 = vpop.f32.mrf.mxu3  ;;  %v1899_v31 = vpop.f32.mrf.mxu0 }
 0x2a6   : > { %v1948_v21 = vpop.f32.mrf.mxu1  ;;  %v6977_v19 = vpop.eup %5735 }
 0x2a7   : > { %v6965_v39 = vadd.f32 %v2043_v37, %v1995_v23  ;;  %v1949_v59 = vadd.f32 %v1948_v21, %v1899_v31  ;;  %v5738_v37 = vpop.eup %5737  ;;  %v2574_v31 = vmul.f32 %v6962_v33, %v2573_v11  ;;  %v2602_v21 = vmul.f32 %v6977_v19, %v6960_v9 }
 0x2a8   : > { %2094 = vmatmul.bf16.gmra.mxu0 %v6686_v7  ;;  %2143 = vmatmul.bf16.gmra.mxu1 %v6688_v8  ;;  %v6989_v2 = vpop.eup %5739  ;;  %v3129_v8 = vld [vmem:[%s6325_s17 + $0x70] sm:$0xff]  ;;  %vm2607_vm4 = vweird.f32 %v6977_v19 }
 0x2a9   : > { %8169 = vst [vmem:[#allocation35_spill] sm:$0xff] %v6965_v39  ;;  %2192 = vmatmul.bf16.gmra.mxu2 %v6690_v17  ;;  %v2575_v62 = vadd.f32 %v6962_v33, %v2574_v31  ;;  %v5660_v39 = vld [vmem:[%s6336_s27 + $0x1e4] sm:$0xf]  ;;  %v5157_v31 = vmul.f32 -1.442695, %v6744_v56  ;;  %3203 = vperm.xlu2 %5726, %v3129_v8   ;;  %vm2608_vm6 = vmor %vm2606_vm5, %vm2607_vm4  ;;  %vm2637_vm8 = vweird.f32 %v6989_v2 }
 0x2aa   : > { %2241 = vmatmul.bf16.gmra.mxu3 %v6692_v18  ;;  %v5742_v18 = vpop.eup %5741  ;;  %vm7060_vm10 = vmor %vm2636_vm9, %vm2637_vm8 }
 0x2ac   : > { %v1997_v10 = vpop.f32.mrf.mxu2 }
 0x2ad   : > { %v1998_v32 = vadd.f32 %v1997_v10, %v1949_v59  ;;  %v2046_v38 = vpop.f32.mrf.mxu3  ;;  %v1901_v5 = vpop.f32.mrf.mxu0  ;;  %v6987_v59 = vadd.f32 1.0, %v5738_v37  ;;  %v2603_v10 = vsub.f32 1.0, %v2602_v21 }
 0x2ae   : > { %v1950_v29 = vpop.f32.mrf.mxu1 }
 0x2af   : > { %v6981_v6 = vadd.f32 %v2046_v38, %v1998_v32  ;;  %v1951_v23 = vadd.f32 %v1950_v29, %v1901_v5  ;;  %v5628_v5 = vld [vmem:[%s6336_s27 + $0xe4] sm:$0xf]  ;;  %v2582_v29 = vand.u32 2147483648, %v6953_v63  ;;  %5743 = vrcp.f32 %v6987_v59 }
 0x2b0   : > { %v5298_v37 = vor.u32 %v5628_v5, %v5295_v12  ;;  %v2632_v5 = vmul.f32 %v6989_v2, %v6975_v61  ;;  %v5426_v63 = vor.u32 %v5660_v39, %v5423_v0  ;;  %v2604_v12 = vmul.f32 %v6977_v19, %v2603_v10 }
 0x2b1   : > { %8170 = vst [vmem:[#allocation36_spill] sm:$0xff] %v6981_v6  ;;  %v2583_v7 = vor.u32 1.1754944e-38, %v2582_v29  ;;  %5745 = vpow2.f32 %v5157_v31  ;;  %vm2666_vm13 = vweird.f32 %v6987_v59 }
 0x2b2   : > { %3805 = vmatpush.bf16.msra.mxu2 %v5298_v37  ;;  %3854 = vmatpush.bf16.msra.mxu3 %v5426_v63  ;;  %v2633_v0 = vsub.f32 1.0, %v2632_v5  ;;  %v5624_v5 = vld [vmem:[%s6336_s27 + $0xc4] sm:$0xf] }
 0x2b4   : > { %v1999_v4 = vpop.f32.mrf.mxu2  ;;  %v2634_v31 = vmul.f32 %v6989_v2, %v2633_v0 }
 0x2b5   : > { %v2000_v11 = vadd.f32 %v1999_v4, %v1951_v23  ;;  %v2048_v32 = vpop.f32.mrf.mxu3  ;;  %v2060_v38 = vpop.f32.mrf.mxu0  ;;  %v5293_v23 = vld [vmem:[%s6336_s27 + $0xe0] sm:$0xf]  ;;  %v5630_v4 = vld [vmem:[%s6336_s27 + $0xec] sm:$0xf0] }
 0x2b6   : > { %v2109_v6 = vpop.f32.mrf.mxu1  ;;  %v7028_v10 = vpop.eup %5743 }
 0x2b7   : > { %v7000_v57 = vadd.f32 %v2048_v32, %v2000_v11  ;;  %v2110_v21 = vadd.f32 %v2109_v6, %v2060_v38  ;;  %v5294_v6 = vor.u32 %v5630_v4, %v5293_v23  ;;  %v5421_v11 = vld [vmem:[%s6336_s27 + $0x1e0] sm:$0xf]  ;;  %v5662_v32 = vld [vmem:[%s6336_s27 + $0x1ec] sm:$0xf0]  ;;  %v2579_v38 = vsel %vm7006_vm2, %v6962_v33, %v2575_v62 }
 0x2b8   : > { %2255 = vmatmul.bf16.vlgmr.msrb.gmra.mxu0 %v6485_v49  ;;  %2304 = vmatmul.bf16.vlgmr.msrb.gmra.mxu1 %v6490_v54  ;;  %v7024_v49 = vadd.f32 1.0, %v5742_v18  ;;  %v2584_v17 = vsel %vm2581_vm3, %v2583_v7, %v2579_v38  ;;  %v2605_v54 = vadd.f32 %v6977_v19, %v2604_v12  ;;  %v2612_v7 = vand.u32 2147483648, %v6960_v9 }
 0x2b9   : > { %8171 = vst [vmem:[#allocation37_spill] sm:$0xff] %v7000_v57  ;;  %2353 = vmatmul.bf16.vlgmr.msrb.gmra.mxu2 %v6492_v55  ;;  %v5422_v57 = vor.u32 %v5662_v32, %v5421_v11  ;;  %3707 = vmatpush.bf16.msra.mxu0 %v5294_v6  ;;  %v5159_v18 = vmul.f32 -1.442695, %v6754_v20  ;;  %v3051_v34 = vmul.f32 %v2584_v17, %v6706_v36  ;;  %v5279_v36 = vld [vmem:[%s6336_s27 + $0xd0] sm:$0xf0]  ;;  %vm2667_vm12 = vweird.f32 %v7028_v10 }
 0x2ba   : > { %2402 = vmatmul.bf16.vlgmr.msrb.gmra.mxu3 %v6496_v58  ;;  %v2610_v58 = vand.u32 2147483647, %v6960_v9  ;;  %5747 = vrcp.f32 %v7024_v49  ;;  %v2609_v9 = vsel %vm2608_vm6, %v6977_v19, %v2605_v54  ;;  %v2662_v23 = vmul.f32 %v7028_v10, %v6987_v59  ;;  %v5656_v11 = vld [vmem:[%s6336_s27 + $0x1c4] sm:$0xf]  ;;  %v5407_v32 = vld [vmem:[%s6336_s27 + $0x1d0] sm:$0xf0]  ;;  %vm7102_vm14 = vmor %vm2666_vm13, %vm2667_vm12 }
 0x2bb   : > { %3756 = vmatpush.bf16.msra.mxu1 %v5422_v57  ;;  %v7034_v57 = vpop.permute.xlu0 %3133  ;;  %v2613_v63 = vor.u32 1.1754944e-38, %v2612_v7  ;;  %5749 = vpow2.f32 %v5159_v18  ;;  %v5282_v6 = vor.u32 %v5624_v5, %v5279_v36  ;;  %v2635_v12 = vadd.f32 %v6989_v2, %v2634_v31 }
 0x2bc   : > { %v2158_v33 = vpop.f32.mrf.mxu2  ;;  %vm2611_vm7 = vcmp.eq.f32.partialorder %v2610_v58, 8.507059e+37  ;;  %v2642_v58 = vand.u32 2147483648, %v6975_v61  ;;  %v5410_v18 = vor.u32 %v5656_v11, %v5407_v32  ;;  %vm2696_vm1 = vweird.f32 %v7024_v49 }
 0x2bd   : > { %v2159_v55 = vadd.f32 %v2158_v33, %v2110_v21  ;;  %v2207_v39 = vpop.f32.mrf.mxu3  ;;  %v2062_v62 = vpop.f32.mrf.mxu0  ;;  %v2614_v38 = vsel %vm2611_vm7, %v2613_v63, %v2609_v9  ;;  %3806 = vmatpush.bf16.msra.mxu2 %v5282_v6  ;;  %v2663_v33 = vsub.f32 1.0, %v2662_v23  ;;  %v5626_v9 = vld [vmem:[%s6336_s27 + $0xcc] sm:$0xf0]  ;;  %v5405_v63 = vld [vmem:[%s6336_s27 + $0x1c0] sm:$0xf] }
 0x2be   : > { %v2111_v8 = vpop.f32.mrf.mxu1  ;;  %v5746_v21 = vpop.eup %5745  ;;  %3855 = vmatpush.bf16.msra.mxu3 %v5410_v18  ;;  %v5658_v6 = vld [vmem:[%s6336_s27 + $0x1cc] sm:$0xf0]  ;;  %v8176_v18 = vld [vmem:[#allocation17_spill] sm:$0xff] }
 0x2bf   : > { %v2208_v29 = vadd.f32 %v2207_v39, %v2159_v55  ;;  %v2112_v37 = vadd.f32 %v2111_v8, %v2062_v62  ;;  %v7050_v17 = vadd.f32 1.0, %v5746_v21  ;;  %v2640_v62 = vand.u32 2147483647, %v6975_v61  ;;  %v5277_v21 = vld [vmem:[%s6336_s27 + $0xc0] sm:$0xf] }
 0x2c0   : > { %v7052_v0 = vpop.eup %5747  ;;  %v3053_v8 = vmul.f32 %v2614_v38, %v6712_v1  ;;  %v2639_v61 = vsel %vm7060_vm10, %v6989_v2, %v2635_v12  ;;  %v5278_v36 = vor.u32 %v5626_v9, %v5277_v21  ;;  %v2664_v11 = vmul.f32 %v7028_v10, %v2663_v33 }
 0x2c1   : > { %v3083_v4 = vmul.f32 %v3051_v34, %v2208_v29  ;;  %v5161_v29 = vmul.f32 -1.442695, %v6760_v40  ;;  %v5750_v23 = vpop.eup %5749  ;;  %v2692_v1 = vmul.f32 %v7052_v0, %v7024_v49  ;;  %5751 = vrcp.f32 %v7050_v17 }
 0x2c2   : > { %v5406_v32 = vor.u32 %v5658_v6, %v5405_v63  ;;  %vm2641_vm11 = vcmp.eq.f32.partialorder %v2640_v62, 8.507059e+37  ;;  %v2643_v38 = vor.u32 1.1754944e-38, %v2642_v58  ;;  %3708 = vmatpush.bf16.msra.mxu0 %v5278_v36  ;;  %v5620_v36 = vld [vmem:[%s6336_s27 + $0xa4] sm:$0xf]  ;;  %v5263_v63 = vld [vmem:[%s6336_s27 + $0xb0] sm:$0xf0]  ;;  %vm2697_vm0 = vweird.f32 %v7052_v0 }
 0x2c3   : > { %v7074_v5 = vpop.permute.xlu0 %3138  ;;  %5753 = vpow2.f32 %v5161_v29  ;;  %v3211_v12 = vmul.f32 %v7034_v57, %v3083_v4  ;;  %v2670_v4 = vand.u32 2147483647, %v6987_v59  ;;  %v7096_v29 = vpop.permute.xlu1 %3143  ;;  %v5652_v6 = vld [vmem:[%s6336_s27 + $0x1a4] sm:$0xf]  ;;  %vm7126_vm2 = vmor %vm2696_vm1, %vm2697_vm0  ;;  %vm2726_vm5 = vweird.f32 %v7050_v17 }
 0x2c4   : > { %v2160_v19 = vpop.f32.mrf.mxu2  ;;  %3757 = vmatpush.bf16.msra.mxu1 %v5406_v32  ;;  %v2644_v33 = vsel %vm2641_vm11, %v2643_v38, %v2639_v61  ;;  %v5391_v32 = vld [vmem:[%s6336_s27 + $0x1b0] sm:$0xf0] }
 0x2c5   : > { %v2161_v54 = vadd.f32 %v2160_v19, %v2112_v37  ;;  %v2209_v55 = vpop.f32.mrf.mxu3  ;;  %v2065_v39 = vpop.f32.mrf.mxu0  ;;  %vm2671_vm15 = vcmp.eq.f32.partialorder %v2670_v4, 8.507059e+37  ;;  %v5394_v38 = vor.u32 %v5652_v6, %v5391_v32  ;;  %v5654_v6 = vld [vmem:[%s6336_s27 + $0x1ac] sm:$0xf0]  ;;  %v2732_v4 = vand.u32 2147483648, %v7050_v17 }
 0x2c6   : > { %v2114_v7 = vpop.f32.mrf.mxu1 }
 0x2c7   : > { %v2210_v37 = vadd.f32 %v2209_v55, %v2161_v54  ;;  %v2115_v31 = vadd.f32 %v2114_v7, %v2065_v39  ;;  %v2693_v54 = vsub.f32 1.0, %v2692_v1  ;;  %v7090_v58 = vpop.eup %5751  ;;  %v2672_v7 = vand.u32 2147483648, %v6987_v59  ;;  %3856 = vmatpush.bf16.msra.mxu3 %v5394_v38 }
 0x2c8   : > { %2260 = vmatmul.bf16.gmra.mxu0 %v6522_v25  ;;  %2309 = vmatmul.bf16.gmra.mxu1 %v6524_v26  ;;  %v7082_v25 = vadd.f32 1.0, %v5750_v23  ;;  %vm2727_vm4 = vweird.f32 %v7090_v58 }
 0x2c9   : > { %2358 = vmatmul.bf16.gmra.mxu2 %v6526_v27  ;;  %v3085_v2 = vmul.f32 %v3053_v8, %v2210_v37  ;;  %v2665_v27 = vadd.f32 %v7028_v10, %v2664_v11  ;;  %v5163_v8 = vmul.f32 -1.442695, %v8176_v18  ;;  %v3055_v37 = vmul.f32 %v2644_v33, %v6722_v30  ;;  %v5754_v23 = vpop.eup %5753  ;;  %vm7170_vm6 = vmor %vm2726_vm5, %vm2727_vm4 }
 0x2ca   : > { %2407 = vmatmul.bf16.gmra.mxu3 %v6528_v28  ;;  %5755 = vrcp.f32 %v7082_v25  ;;  %v2694_v59 = vmul.f32 %v7052_v0, %v2693_v54  ;;  %v2722_v30 = vmul.f32 %v7090_v58, %v7050_v17  ;;  %v2673_v11 = vor.u32 1.1754944e-38, %v2672_v7 }
 0x2cb   : > { %v3213_v19 = vmul.f32 %v7074_v5, %v3085_v2  ;;  %v2669_v61 = vsel %vm7102_vm14, %v7028_v10, %v2665_v27  ;;  %5757 = vpow2.f32 %v5163_v8  ;;  %v5266_v2 = vor.u32 %v5620_v36, %v5263_v63  ;;  %v8181_v8 = vld [vmem:[#allocation18_spill] sm:$0xff] }
 0x2cc   : > { %v2163_v26 = vpop.f32.mrf.mxu2  ;;  %v7118_v33 = vadd.f32 1.0, %v5754_v23  ;;  %v2723_v27 = vsub.f32 1.0, %v2722_v30  ;;  %v2700_v7 = vand.u32 2147483647, %v7024_v49  ;;  %v5622_v23 = vld [vmem:[%s6336_s27 + $0xac] sm:$0xf0]  ;;  %vm2756_vm9 = vweird.f32 %v7082_v25 }
 0x2cd   : > { %v7088_v55 = vpack.c.bf16 %v3213_v19, %v3211_v12  ;;  %v2164_v39 = vadd.f32 %v2163_v26, %v2115_v31  ;;  %v2212_v28 = vpop.f32.mrf.mxu3  ;;  %v2067_v62 = vpop.f32.mrf.mxu0  ;;  %v2674_v12 = vsel %vm2671_vm15, %v2673_v11, %v2669_v61  ;;  %v2695_v19 = vadd.f32 %v7052_v0, %v2694_v59  ;;  %3807 = vmatpush.bf16.msra.mxu2 %v5266_v2  ;;  %v5389_v61 = vld [vmem:[%s6336_s27 + $0x1a0] sm:$0xf] }
 0x2ce   : > { %v2116_v34 = vpop.f32.mrf.mxu1  ;;  %v2702_v26 = vand.u32 2147483648, %v7024_v49  ;;  %5759 = vrcp.f32 %v7118_v33  ;;  %v7143_v49 = vpop.permute.xlu1 %3148  ;;  %v2724_v2 = vmul.f32 %v7090_v58, %v2723_v27  ;;  %vm2701_vm3 = vcmp.eq.f32.partialorder %v2700_v7, 8.507059e+37 }
 0x2cf   : > { %v2213_v31 = vadd.f32 %v2212_v28, %v2164_v39  ;;  %v2117_v21 = vadd.f32 %v2116_v34, %v2067_v62  ;;  %v5165_v34 = vmul.f32 -1.442695, %v8181_v8  ;;  %v2699_v36 = vsel %vm7126_vm2, %v7052_v0, %v2695_v19 }
 0x2d0   : > { %v7120_v54 = vpop.eup %5755  ;;  %v2703_v11 = vor.u32 1.1754944e-38, %v2702_v26  ;;  %v5390_v0 = vor.u32 %v5654_v6, %v5389_v61  ;;  %v2733_v6 = vor.u32 1.1754944e-38, %v2732_v4  ;;  %vm2786_vm13 = vweird.f32 %v7118_v33 }
 0x2d1   : > { %v3087_v1 = vmul.f32 %v3055_v37, %v2213_v31  ;;  %v3057_v31 = vmul.f32 %v2674_v12, %v6728_v60  ;;  %v5758_v30 = vpop.eup %5757  ;;  %v2752_v63 = vmul.f32 %v7120_v54, %v7082_v25  ;;  %5761 = vpow2.f32 %v5165_v34  ;;  %v7164_v34 = vpop.permute.xlu2 %3153 }
 0x2d2   : > { %v2704_v38 = vsel %vm2701_vm3, %v2703_v11, %v2699_v36  ;;  %3758 = vmatpush.bf16.msra.mxu1 %v5390_v0  ;;  %v5616_v36 = vld [vmem:[%s6336_s27 + $0x84] sm:$0xf]  ;;  %vm2757_vm8 = vweird.f32 %v7120_v54 }
 0x2d3   : > { %v3215_v12 = vmul.f32 %v7096_v29, %v3087_v1  ;;  %v2730_v1 = vand.u32 2147483647, %v7050_v17  ;;  %vm7193_vm10 = vmor %vm2756_vm9, %vm2757_vm8 }
 0x2d4   : > { %v2165_v10 = vpop.f32.mrf.mxu2 }
 0x2d5   : > { %v2166_v39 = vadd.f32 %v2165_v10, %v2117_v21  ;;  %v2214_v28 = vpop.f32.mrf.mxu3  ;;  %v2070_v62 = vpop.f32.mrf.mxu0  ;;  %v5261_v21 = vld [vmem:[%s6336_s27 + $0xa0] sm:$0xf]  ;;  %v2753_v10 = vsub.f32 1.0, %v2752_v63  ;;  %v5247_v63 = vld [vmem:[%s6336_s27 + $0x90] sm:$0xf0]  ;;  %vm2731_vm7 = vcmp.eq.f32.partialorder %v2730_v1, 8.507059e+37 }
 0x2d6   : > { %v2119_v37 = vpop.f32.mrf.mxu1  ;;  %v5262_v60 = vor.u32 %v5622_v23, %v5261_v21  ;;  %v5250_v11 = vor.u32 %v5616_v36, %v5247_v63  ;;  %v5169_v1 = vmul.f32 -1.442695, %v6801_v35  ;;  %v5373_v21 = vld [vmem:[%s6336_s27 + $0x180] sm:$0xf] }
 0x2d7   : > { %v2215_v9 = vadd.f32 %v2214_v28, %v2166_v39  ;;  %v2120_v59 = vadd.f32 %v2119_v37, %v2070_v62  ;;  %v7158_v28 = vpop.eup %5759  ;;  %v3059_v62 = vmul.f32 %v2704_v38, %v6738_v22  ;;  %v8182_v37 = vld [vmem:[#allocation19_spill] sm:$0xff]  ;;  %v2754_v23 = vmul.f32 %v7120_v54, %v2753_v10 }
 0x2d8   : > { %2265 = vmatmul.bf16.gmra.mxu0 %v6550_v50  ;;  %2314 = vmatmul.bf16.gmra.mxu1 %v6552_v51  ;;  %v7150_v50 = vadd.f32 1.0, %v5758_v30  ;;  %v2725_v51 = vadd.f32 %v7090_v58, %v2724_v2  ;;  %v5762_v22 = vpop.eup %5761  ;;  %v2782_v61 = vmul.f32 %v7158_v28, %v7118_v33  ;;  %v5375_v2 = vld [vmem:[%s6336_s27 + $0x190] sm:$0xf0]  ;;  %vm2787_vm12 = vweird.f32 %v7158_v28 }
 0x2d9   : > { %2363 = vmatmul.bf16.gmra.mxu2 %v6554_v52  ;;  %v3089_v32 = vmul.f32 %v3057_v31, %v2215_v9  ;;  %3709 = vmatpush.bf16.msra.mxu0 %v5262_v60  ;;  %v5167_v31 = vmul.f32 -1.442695, %v8182_v37  ;;  %v5648_v60 = vld [vmem:[%s6336_s27 + $0x184] sm:$0xf]  ;;  %vm7233_vm14 = vmor %vm2786_vm13, %vm2787_vm12 }
 0x2da   : > { %2412 = vmatmul.bf16.gmra.mxu3 %v6556_v53  ;;  %5763 = vrcp.f32 %v7150_v50  ;;  %v2729_v17 = vsel %vm7170_vm6, %v7090_v58, %v2725_v51  ;;  %v5378_v0 = vor.u32 %v5648_v60, %v5375_v2  ;;  %v2755_v58 = vadd.f32 %v7120_v54, %v2754_v23  ;;  %3808 = vmatpush.bf16.msra.mxu2 %v5250_v11 }
 0x2db   : > { %v3217_v19 = vmul.f32 %v7143_v49, %v3089_v32  ;;  %v7185_v32 = vadd.f32 1.0, %v5762_v22  ;;  %5765 = vpow2.f32 %v5167_v31  ;;  %v2734_v38 = vsel %vm2731_vm7, %v2733_v6, %v2729_v17  ;;  %v5618_v22 = vld [vmem:[%s6336_s27 + $0x8c] sm:$0xf0] }
 0x2dc   : > { %v2168_v26 = vpop.f32.mrf.mxu2  ;;  %v2783_v10 = vsub.f32 1.0, %v2782_v61  ;;  %3857 = vmatpush.bf16.msra.mxu3 %v5378_v0  ;;  %v2759_v23 = vsel %vm7193_vm10, %v7120_v54, %v2755_v58  ;;  %vm2816_vm1 = vweird.f32 %v7150_v50 }
 0x2dd   : > { %v7156_v52 = vpack.c.bf16 %v3217_v19, %v3215_v12  ;;  %v2169_v27 = vadd.f32 %v2168_v26, %v2120_v59  ;;  %v2217_v39 = vpop.f32.mrf.mxu3  ;;  %v2072_v53 = vpop.f32.mrf.mxu0  ;;  %5767 = vrcp.f32 %v7185_v32  ;;  %vm2846_vm5 = vweird.f32 %v7185_v32 }
 0x2de   : > { %v2121_v7 = vpop.f32.mrf.mxu1  ;;  %v2784_v63 = vmul.f32 %v7158_v28, %v2783_v10  ;;  %5769 = vpow2.f32 %v5169_v1 }
 0x2df   : > { %v2218_v9 = vadd.f32 %v2217_v39, %v2169_v27  ;;  %v2122_v59 = vadd.f32 %v2121_v7, %v2072_v53  ;;  %v2760_v53 = vand.u32 2147483647, %v7082_v25  ;;  %v3061_v7 = vmul.f32 %v2734_v38, %v6744_v56  ;;  %v5650_v56 = vld [vmem:[%s6336_s27 + $0x18c] sm:$0xf0] }
 0x2e0   : > { %v7188_v19 = vpop.eup %5763  ;;  %v5374_v6 = vor.u32 %v5650_v56, %v5373_v21  ;;  %v5644_v21 = vld [vmem:[%s6336_s27 + $0x164] sm:$0xf] }
 0x2e1   : > { %v3091_v30 = vmul.f32 %v3059_v62, %v2218_v9  ;;  %v2762_v62 = vand.u32 2147483648, %v7082_v25  ;;  %v2812_v17 = vmul.f32 %v7188_v19, %v7150_v50  ;;  %v7211_v25 = vpop.permute.xlu2 %3158  ;;  %v5766_v36 = vpop.eup %5765  ;;  %vm2761_vm11 = vcmp.eq.f32.partialorder %v2760_v53, 8.507059e+37 }
 0x2e2   : > { %3759 = vmatpush.bf16.msra.mxu1 %v5374_v6  ;;  %v7220_v38 = vadd.f32 1.0, %v5766_v36  ;;  %v2790_v53 = vand.u32 2147483647, %v7118_v33  ;;  %vm2817_vm0 = vweird.f32 %v7188_v19 }
 0x2e3   : > { %v2763_v11 = vor.u32 1.1754944e-38, %v2762_v62  ;;  %v2813_v0 = vsub.f32 1.0, %v2812_v17  ;;  %v7222_v58 = vpop.eup %5767  ;;  %vm7255_vm2 = vmor %vm2816_vm1, %vm2817_vm0 }
 0x2e4   : > { %v2170_v12 = vpop.f32.mrf.mxu2  ;;  %5771 = vrcp.f32 %v7220_v38  ;;  %vm2791_vm15 = vcmp.eq.f32.partialorder %v2790_v53, 8.507059e+37  ;;  %v5357_v53 = vld [vmem:[%s6336_s27 + $0x160] sm:$0xf]  ;;  %vm2847_vm4 = vweird.f32 %v7222_v58  ;;  %vm2876_vm9 = vweird.f32 %v7220_v38 }
 0x2e5   : > { %v2171_v26 = vadd.f32 %v2170_v12, %v2122_v59  ;;  %v2219_v51 = vpop.f32.mrf.mxu3  ;;  %v2075_v27 = vpop.f32.mrf.mxu0  ;;  %v5245_v59 = vld [vmem:[%s6336_s27 + $0x80] sm:$0xf]  ;;  %v2764_v2 = vsel %vm2761_vm11, %v2763_v11, %v2759_v23  ;;  %vm7300_vm6 = vmor %vm2846_vm5, %vm2847_vm4 }
 0x2e6   : > { %v2124_v4 = vpop.f32.mrf.mxu1  ;;  %v5246_v61 = vor.u32 %v5618_v22, %v5245_v59  ;;  %v3063_v39 = vmul.f32 %v2764_v2, %v6754_v20  ;;  %v5612_v59 = vld [vmem:[%s6336_s27 + $0x64] sm:$0xf]  ;;  %v5231_v22 = vld [vmem:[%s6336_s27 + $0x70] sm:$0xf0] }
 0x2e7   : > { %v2220_v31 = vadd.f32 %v2219_v51, %v2171_v26  ;;  %v2125_v9 = vadd.f32 %v2124_v4, %v2075_v27  ;;  %v5171_v51 = vmul.f32 -1.442695, %v6810_v3  ;;  %v5770_v4 = vpop.eup %5769  ;;  %v5234_v17 = vor.u32 %v5612_v59, %v5231_v22 }
 0x2e8   : > { %2270 = vmatmul.bf16.gmra.mxu0 %v6578_v13  ;;  %2319 = vmatmul.bf16.gmra.mxu1 %v6580_v14  ;;  %v3219_v13 = vmul.f32 %v7164_v34, %v3091_v30  ;;  %v2792_v30 = vand.u32 2147483648, %v7118_v33  ;;  %v7249_v56 = vadd.f32 1.0, %v5770_v4  ;;  %v7271_v4 = vpop.permute.xlu0 %3163 }
 0x2e9   : > { %2368 = vmatmul.bf16.gmra.mxu2 %v6582_v15  ;;  %v3093_v60 = vmul.f32 %v3061_v7, %v2220_v31  ;;  %3710 = vmatpush.bf16.msra.mxu0 %v5246_v61  ;;  %v2785_v15 = vadd.f32 %v7158_v28, %v2784_v63  ;;  %v2814_v31 = vmul.f32 %v7188_v19, %v2813_v0  ;;  %5773 = vpow2.f32 %v5171_v51  ;;  %v5359_v61 = vld [vmem:[%s6336_s27 + $0x170] sm:$0xf0]  ;;  %v7274_v7 = vpop.permute.xlu1 %3168 }
 0x2ea   : > { %2417 = vmatmul.bf16.gmra.mxu3 %v6584_v16  ;;  %v2793_v23 = vor.u32 1.1754944e-38, %v2792_v30  ;;  %v5362_v36 = vor.u32 %v5644_v21, %v5359_v61  ;;  %3809 = vmatpush.bf16.msra.mxu2 %v5234_v17  ;;  %v7253_v2 = vpop.eup %5771  ;;  %5775 = vrcp.f32 %v7249_v56  ;;  %vm2906_vm13 = vweird.f32 %v7249_v56 }
 0x2eb   : > { %v3221_v54 = vmul.f32 %v7211_v25, %v3093_v60  ;;  %v2789_v20 = vsel %vm7233_vm14, %v7158_v28, %v2785_v15  ;;  %v2815_v60 = vadd.f32 %v7188_v19, %v2814_v31  ;;  %v2822_v15 = vand.u32 2147483648, %v7150_v50  ;;  %v5646_v31 = vld [vmem:[%s6336_s27 + $0x16c] sm:$0xf0] }
 0x2ec   : > { %v2173_v14 = vpop.f32.mrf.mxu2  ;;  %v2794_v63 = vsel %vm2791_vm15, %v2793_v23, %v2789_v20  ;;  %3858 = vmatpush.bf16.msra.mxu3 %v5362_v36  ;;  %v5358_v59 = vor.u32 %v5646_v31, %v5357_v53  ;;  %v5343_v53 = vld [vmem:[%s6336_s27 + $0x150] sm:$0xf0]  ;;  %vm2877_vm8 = vweird.f32 %v7253_v2 }
 0x2ed   : > { %v7226_v12 = vpack.c.bf16 %v3221_v54, %v3219_v13  ;;  %v2174_v16 = vadd.f32 %v2173_v14, %v2125_v9  ;;  %v2222_v10 = vpop.f32.mrf.mxu3  ;;  %v2077_v26 = vpop.f32.mrf.mxu0  ;;  %v2842_v9 = vmul.f32 %v7222_v58, %v7185_v32  ;;  %v2820_v14 = vand.u32 2147483647, %v7150_v50  ;;  %vm7330_vm10 = vmor %vm2876_vm9, %vm2877_vm8 }
 0x2ee   : > { %v2126_v27 = vpop.f32.mrf.mxu1  ;;  %3760 = vmatpush.bf16.msra.mxu1 %v5358_v59 }
 0x2ef   : > { %v2223_v62 = vadd.f32 %v2222_v10, %v2174_v16  ;;  %v2127_v1 = vadd.f32 %v2126_v27, %v2077_v26  ;;  %v2843_v6 = vsub.f32 1.0, %v2842_v9  ;;  %v5173_v16 = vmul.f32 -1.442695, %v6812_v24  ;;  %v5229_v27 = vld [vmem:[%s6336_s27 + $0x60] sm:$0xf] }
 0x2f0   : > { %v3065_v26 = vmul.f32 %v2794_v63, %v6760_v40  ;;  %v2872_v9 = vmul.f32 %v7253_v2, %v7220_v38  ;;  %vm2821_vm3 = vcmp.eq.f32.partialorder %v2820_v14, 8.507059e+37  ;;  %v8197_v14 = vld [vmem:[#allocation9_spill] sm:$0xff] }
 0x2f1   : > { %v3095_v33 = vmul.f32 %v3063_v39, %v2223_v62  ;;  %v5614_v39 = vld [vmem:[%s6336_s27 + $0x6c] sm:$0xf0]  ;;  %v5774_v62 = vpop.eup %5773  ;;  %v2844_v50 = vmul.f32 %v7222_v58, %v2843_v6  ;;  %5777 = vpow2.f32 %v5173_v16  ;;  %v8191_v6 = vld [vmem:[#allocation20_spill] sm:$0xff] }
 0x2f2   : > { %v5230_v40 = vor.u32 %v5614_v39, %v5229_v27  ;;  %v7282_v22 = vadd.f32 1.0, %v5774_v62  ;;  %v2873_v61 = vsub.f32 1.0, %v2872_v9 }
 0x2f3   : > { %v2845_v17 = vadd.f32 %v7222_v58, %v2844_v50 }
 0x2f4   : > { %v2175_v11 = vpop.f32.mrf.mxu2  ;;  %3711 = vmatpush.bf16.msra.mxu0 %v5230_v40  ;;  %5779 = vrcp.f32 %v7282_v22  ;;  %vm2936_vm0 = vweird.f32 %v7282_v22 }
 0x2f5   : > { %v2176_v28 = vadd.f32 %v2175_v11, %v2127_v1  ;;  %v2224_v13 = vpop.f32.mrf.mxu3  ;;  %v2080_v54 = vpop.f32.mrf.mxu0  ;;  %v2819_v1 = vsel %vm7255_vm2, %v7188_v19, %v2815_v60  ;;  %v2823_v19 = vor.u32 1.1754944e-38, %v2822_v15  ;;  %v5175_v11 = vmul.f32 -1.442695, %v8191_v6 }
 0x2f6   : > { %v2129_v10 = vpop.f32.mrf.mxu1 }
 0x2f7   : > { %v2225_v30 = vadd.f32 %v2224_v13, %v2176_v28  ;;  %v2130_v51 = vadd.f32 %v2129_v10, %v2080_v54  ;;  %v2824_v23 = vsel %vm2821_vm3, %v2823_v19, %v2819_v1  ;;  %v2850_v54 = vand.u32 2147483647, %v7185_v32 }
 0x2f8   : > { %2275 = vmatmul.bf16.gmra.mxu0 %v6606_v41  ;;  %2324 = vmatmul.bf16.gmra.mxu1 %v6608_v42  ;;  %v3223_v41 = vmul.f32 %v7271_v4, %v3095_v33  ;;  %v2852_v33 = vand.u32 2147483648, %v7185_v32  ;;  %v3067_v13 = vmul.f32 %v2824_v23, %v8176_v18  ;;  %v2849_v18 = vsel %vm7300_vm6, %v7222_v58, %v2845_v17 }
 0x2f9   : > { %2373 = vmatmul.bf16.gmra.mxu2 %v6610_v43  ;;  %v3097_v20 = vmul.f32 %v3065_v26, %v2225_v30  ;;  %v7287_v43 = vpop.eup %5775  ;;  %v2874_v10 = vmul.f32 %v7253_v2, %v2873_v61  ;;  %v5608_v26 = vld [vmem:[%s6336_s27 + $0x44] sm:$0xf]  ;;  %v5215_v30 = vld [vmem:[%s6336_s27 + $0x50] sm:$0xf0]  ;;  %5781 = vpow2.f32 %v5175_v11  ;;  %vm2851_vm7 = vcmp.eq.f32.partialorder %v2850_v54, 8.507059e+37 }
 0x2fa   : > { %2422 = vmatmul.bf16.gmra.mxu3 %v6612_v44  ;;  %v2902_v15 = vmul.f32 %v7287_v43, %v7249_v56  ;;  %v5778_v16 = vpop.eup %5777  ;;  %v2853_v27 = vor.u32 1.1754944e-38, %v2852_v33  ;;  %v5218_v39 = vor.u32 %v5608_v26, %v5215_v30  ;;  %v2882_v23 = vand.u32 2147483648, %v7220_v38  ;;  %v5213_v33 = vld [vmem:[%s6336_s27 + $0x40] sm:$0xf]  ;;  %v5610_v11 = vld [vmem:[%s6336_s27 + $0x4c] sm:$0xf0] }
 0x2fb   : > { %v3225_v21 = vmul.f32 %v7274_v7, %v3097_v20  ;;  %v7314_v31 = vadd.f32 1.0, %v5778_v16  ;;  %v7316_v58 = vpop.eup %5779  ;;  %v2875_v20 = vadd.f32 %v7253_v2, %v2874_v10  ;;  %v5214_v16 = vor.u32 %v5610_v11, %v5213_v33  ;;  %v8198_v26 = vld [vmem:[#allocation10_spill] sm:$0xff]  ;;  %v8199_v30 = vld [vmem:[#allocation11_spill] sm:$0xff]  ;;  %v5604_v33 = vld [vmem:[%s6336_s27 + $0x24] sm:$0xf] }
 0x2fc   : > { %v2178_v42 = vpop.f32.mrf.mxu2  ;;  %v2854_v50 = vsel %vm2851_vm7, %v2853_v27, %v2849_v18  ;;  %v2903_v40 = vsub.f32 1.0, %v2902_v15  ;;  %3810 = vmatpush.bf16.msra.mxu2 %v5218_v39  ;;  %v7341_v15 = vpop.permute.xlu0 %3178  ;;  %v5642_v18 = vld [vmem:[%s6336_s27 + $0x14c] sm:$0xf0]  ;;  %v2883_v39 = vor.u32 1.1754944e-38, %v2882_v23  ;;  %vm2907_vm12 = vweird.f32 %v7287_v43  ;;  %v5199_v11 = vld [vmem:[%s6336_s27 + $0x30] sm:$0xf0] }
 0x2fd   : > { %v7290_v36 = vpack.c.bf16 %v3225_v21, %v3223_v41  ;;  %v2179_v44 = vadd.f32 %v2178_v42, %v2130_v51  ;;  %v2227_v63 = vpop.f32.mrf.mxu3  ;;  %v2082_v60 = vpop.f32.mrf.mxu0  ;;  %v5640_v51 = vld [vmem:[%s6336_s27 + $0x144] sm:$0xf]  ;;  %v2880_v21 = vand.u32 2147483647, %v7220_v38  ;;  %5783 = vrcp.f32 %v7314_v31  ;;  %3712 = vmatpush.bf16.msra.mxu0 %v5214_v16  ;;  %vm7363_vm14 = vmor %vm2906_vm13, %vm2907_vm12  ;;  %v5197_v16 = vld [vmem:[%s6336_s27 + $0x20] sm:$0xf] }
 0x2fe   : > { %v2131_v28 = vpop.f32.mrf.mxu1  ;;  %v5346_v1 = vor.u32 %v5640_v51, %v5343_v53  ;;  %v8194_v42 = vld [vmem:[#allocation21_spill] sm:$0xff]  ;;  %v7338_v38 = vpop.permute.xlu2 %3173  ;;  %v2879_v10 = vsel %vm7330_vm10, %v7253_v2, %v2875_v20  ;;  %v8200_v53 = vld [vmem:[#allocation12_spill] sm:$0xff]  ;;  %vm2937_vm1 = vweird.f32 %v7316_v58  ;;  %vm2966_vm5 = vweird.f32 %v7314_v31 }
 0x2ff   : > { %v2228_v0 = vadd.f32 %v2227_v63, %v2179_v44  ;;  %v2132_v62 = vadd.f32 %v2131_v28, %v2082_v60  ;;  %v5177_v17 = vmul.f32 -1.442695, %v8194_v42  ;;  %v3069_v44 = vmul.f32 %v2854_v50, %v8181_v8  ;;  %v5341_v28 = vld [vmem:[%s6336_s27 + $0x140] sm:$0xf]  ;;  %vm7405_vm2 = vmor %vm2936_vm0, %vm2937_vm1 }
 0x300   : > { %3859 = vmatpush.bf16.msra.mxu3 %v5346_v1  ;;  %v2932_v8 = vmul.f32 %v7316_v58, %v7282_v22  ;;  %v5342_v27 = vor.u32 %v5642_v18, %v5341_v28  ;;  %vm2881_vm11 = vcmp.eq.f32.partialorder %v2880_v21, 8.507059e+37  ;;  %v5636_v28 = vld [vmem:[%s6336_s27 + $0x124] sm:$0xf] }
 0x301   : > { %v3099_v32 = vmul.f32 %v3067_v13, %v2228_v0  ;;  %v5782_v13 = vpop.eup %5781  ;;  %v2904_v0 = vmul.f32 %v7287_v43, %v2903_v40  ;;  %5785 = vpow2.f32 %v5177_v17  ;;  %v2884_v50 = vsel %vm2881_vm11, %v2883_v39, %v2879_v10 }
 0x302   : > { %3761 = vmatpush.bf16.msra.mxu1 %v5342_v27  ;;  %v2910_v17 = vand.u32 2147483647, %v7249_v56 }
 0x303   : > { %v3227_v1 = vmul.f32 %v7338_v38, %v3099_v32  ;;  %v2905_v40 = vadd.f32 %v7287_v43, %v2904_v0  ;;  %v7359_v32 = vpop.eup %5783 }
 0x304   : > { %v2180_v9 = vpop.f32.mrf.mxu2  ;;  %vm2911_vm15 = vcmp.eq.f32.partialorder %v2910_v17, 8.507059e+37  ;;  %vm2967_vm4 = vweird.f32 %v7359_v32 }
 0x305   : > { %v2181_v59 = vadd.f32 %v2180_v9, %v2132_v62  ;;  %v2229_v19 = vpop.f32.mrf.mxu3  ;;  %v2085_v41 = vpop.f32.mrf.mxu0  ;;  %v7351_v62 = vadd.f32 1.0, %v5782_v13  ;;  %v2933_v9 = vsub.f32 1.0, %v2932_v8  ;;  %v2909_v54 = vsel %vm7363_vm14, %v7287_v43, %v2905_v40  ;;  %v8203_v43 = vld [vmem:[#allocation22_spill] sm:$0xff]  ;;  %v5600_v40 = vld [vmem:[%s6336_s27 + $0x4] sm:$0xf]  ;;  %vm2968_vm6 = vmor %vm2966_vm5, %vm2967_vm4 }
 0x306   : > { %v2134_v61 = vpop.f32.mrf.mxu1  ;;  %v5202_v8 = vor.u32 %v5604_v33, %v5199_v11  ;;  %v5148_v27 = vmul.f32 -1.442695, %v8203_v43 }
 0x307   : > { %v2230_v63 = vadd.f32 %v2229_v19, %v2181_v59  ;;  %v2135_v60 = vadd.f32 %v2134_v61, %v2085_v41  ;;  %v2912_v61 = vand.u32 2147483648, %v7249_v56  ;;  %5787 = vrcp.f32 %v7351_v62  ;;  %v5786_v13 = vpop.eup %5785  ;;  %v5606_v56 = vld [vmem:[%s6336_s27 + $0x2c] sm:$0xf0] }
 0x308   : > { %2280 = vmatmul.bf16.gmra.mxu0 %v8197_v14  ;;  %2329 = vmatmul.bf16.gmra.mxu1 %v8198_v26  ;;  %v2934_v0 = vmul.f32 %v7316_v58, %v2933_v9  ;;  %v5327_v14 = vld [vmem:[%s6336_s27 + $0x130] sm:$0xf0]  ;;  %v5198_v26 = vor.u32 %v5606_v56, %v5197_v16  ;;  %5789 = vpow2.f32 %v5148_v27  ;;  %vm2996_vm9 = vweird.f32 %v7351_v62 }
 0x309   : > { %2378 = vmatmul.bf16.gmra.mxu2 %v8199_v30  ;;  %v3101_v51 = vmul.f32 %v3069_v44, %v2230_v63  ;;  %v3071_v63 = vmul.f32 %v2884_v50, %v8182_v37  ;;  %v2962_v37 = vmul.f32 %v7359_v32, %v7314_v31  ;;  %v5330_v10 = vor.u32 %v5636_v28, %v5327_v14  ;;  %v5602_v50 = vld [vmem:[%s6336_s27 + $0xc] sm:$0xf0] }
 0x30a   : > { %2427 = vmatmul.bf16.gmra.mxu3 %v8200_v53  ;;  %v2913_v30 = vor.u32 1.1754944e-38, %v2912_v61  ;;  %3811 = vmatpush.bf16.msra.mxu2 %v5202_v8  ;;  %v5183_v61 = vld [vmem:[%s6336_s27 + $0x10] sm:$0xf0]  ;;  %v5325_v8 = vld [vmem:[%s6336_s27 + $0x120] sm:$0xf] }
 0x30b   : > { %v3229_v2 = vmul.f32 %v7341_v15, %v3101_v51  ;;  %v7383_v51 = vadd.f32 1.0, %v5786_v13  ;;  %3860 = vmatpush.bf16.msra.mxu3 %v5330_v10  ;;  %3713 = vmatpush.bf16.msra.mxu0 %v5198_v26  ;;  %v5186_v28 = vor.u32 %v5600_v40, %v5183_v61  ;;  %v5638_v14 = vld [vmem:[%s6336_s27 + $0x12c] sm:$0xf0] }
 0x30c   : > { %v2183_v20 = vpop.f32.mrf.mxu2  ;;  %v2914_v53 = vsel %vm2911_vm15, %v2913_v30, %v2909_v54  ;;  %v5326_v10 = vor.u32 %v5638_v14, %v5325_v8  ;;  %v8207_v14 = vld [vmem:[#allocation24_spill] sm:$0xff] }
 0x30d   : > { %v7357_v59 = vpack.c.bf16 %v3229_v2, %v3227_v1  ;;  %v2184_v19 = vadd.f32 %v2183_v20, %v2135_v60  ;;  %v2232_v41 = vpop.f32.mrf.mxu3  ;;  %v2087_v21 = vpop.f32.mrf.mxu0  ;;  %v5181_v2 = vld [vmem:[%s6336_s27] sm:$0xf]  ;;  %v2935_v20 = vadd.f32 %v7316_v58, %v2934_v0  ;;  %v3073_v13 = vmul.f32 %v2914_v53, %v6801_v35 }
 0x30e   : > { %v2136_v44 = vpop.f32.mrf.mxu1  ;;  %v7391_v9 = vpop.eup %5787  ;;  %v5182_v17 = vor.u32 %v5602_v50, %v5181_v2  ;;  %5791 = vrcp.f32 %v7383_v51  ;;  %3812 = vmatpush.bf16.msra.mxu2 %v5186_v28  ;;  %3762 = vmatpush.bf16.msra.mxu1 %v5326_v10  ;;  %vm3026_vm13 = vweird.f32 %v7383_v51 }
 0x30f   : > { %v2233_v60 = vadd.f32 %v2232_v41, %v2184_v19  ;;  %v2137_v39 = vadd.f32 %v2136_v44, %v2087_v21  ;;  %v2963_v19 = vsub.f32 1.0, %v2962_v37  ;;  %v2940_v44 = vand.u32 2147483647, %v7282_v22  ;;  %v7412_v35 = vpop.permute.xlu1 %3183  ;;  %v7415_v37 = vpop.permute.xlu2 %3188 }
 0x310   : > { %3714 = vmatpush.bf16.msra.mxu0 %v5182_v17  ;;  %v2992_v56 = vmul.f32 %v7391_v9, %v7351_v62  ;;  %v5790_v2 = vpop.eup %5789  ;;  %vm2997_vm8 = vweird.f32 %v7391_v9 }
 0x311   : > { %v3103_v18 = vmul.f32 %v3071_v63, %v2233_v60  ;;  %v2942_v63 = vand.u32 2147483648, %v7282_v22  ;;  %v8204_v60 = vld [vmem:[#allocation23_spill] sm:$0xff]  ;;  %v2939_v22 = vsel %vm7405_vm2, %v7316_v58, %v2935_v20  ;;  %v2964_v26 = vmul.f32 %v7359_v32, %v2963_v19  ;;  %vm7458_vm10 = vmor %vm2996_vm9, %vm2997_vm8 }
 0x312   : > { %v5150_v33 = vmul.f32 -1.442695, %v8204_v60  ;;  %vm2941_vm3 = vcmp.eq.f32.partialorder %v2940_v44, 8.507059e+37  ;;  %v2972_v19 = vand.u32 2147483648, %v7314_v31 }
 0x313   : > { %v2943_v27 = vor.u32 1.1754944e-38, %v2942_v63  ;;  %v2965_v50 = vadd.f32 %v7359_v32, %v2964_v26 }
 0x314   : > { %v2185_v1 = vpop.f32.mrf.mxu2  ;;  %5793 = vpow2.f32 %v5150_v33  ;;  %v7440_v33 = vadd.f32 1.0, %v5790_v2 }
 0x315   : > { %v2186_v41 = vadd.f32 %v2185_v1, %v2137_v39  ;;  %v2234_v21 = vpop.f32.mrf.mxu3  ;;  %v2090_v23 = vpop.f32.mrf.mxu0  ;;  %v2944_v53 = vsel %vm2941_vm3, %v2943_v27, %v2939_v22  ;;  %v2993_v1 = vsub.f32 1.0, %v2992_v56  ;;  %v2969_v44 = vsel %vm2968_vm6, %v7359_v32, %v2965_v50  ;;  %v8208_v22 = vld [vmem:[#allocation25_spill] sm:$0xff] }
 0x316   : > { %v2139_v11 = vpop.f32.mrf.mxu1  ;;  %v5152_v32 = vmul.f32 -1.442695, %v8207_v14  ;;  %5795 = vrcp.f32 %v7440_v33  ;;  %v5154_v26 = vmul.f32 -1.442695, %v8208_v22  ;;  %vm2591_vm0 = vweird.f32 %v7440_v33 }
 0x317   : > { %v2235_v54 = vadd.f32 %v2234_v21, %v2186_v41  ;;  %v2140_v0 = vadd.f32 %v2139_v11, %v2090_v23  ;;  %v3075_v41 = vmul.f32 %v2944_v53, %v6810_v3  ;;  %v2970_v21 = vand.u32 2147483647, %v7314_v31 }
 0x318   : > { %2285 = vmatmul.bf16.gmra.mxu0 %v6662_v45  ;;  %2334 = vmatmul.bf16.gmra.mxu1 %v6664_v46  ;;  %v3231_v45 = vmul.f32 %v7412_v35, %v3103_v18  ;;  %v2994_v61 = vmul.f32 %v7391_v9, %v2993_v1  ;;  %v2973_v3 = vor.u32 1.1754944e-38, %v2972_v19  ;;  %v3002_v53 = vand.u32 2147483648, %v7351_v62 }
 0x319   : > { %2383 = vmatmul.bf16.gmra.mxu2 %v6666_v47  ;;  %v3105_v30 = vmul.f32 %v3073_v13, %v2235_v54  ;;  %vm2971_vm7 = vcmp.eq.f32.partialorder %v2970_v21, 8.507059e+37  ;;  %v5632_v13 = vld [vmem:[%s6336_s27 + $0x104] sm:$0xf]  ;;  %v5311_v54 = vld [vmem:[%s6336_s27 + $0x110] sm:$0xf0] }
 0x31a   : > { %2432 = vmatmul.bf16.gmra.mxu3 %v6668_v48  ;;  %v7430_v48 = vpop.eup %5791  ;;  %v2995_v8 = vadd.f32 %v7391_v9, %v2994_v61  ;;  %v5314_v56 = vor.u32 %v5632_v13, %v5311_v54  ;;  %v5309_v61 = vld [vmem:[%s6336_s27 + $0x100] sm:$0xf] }
 0x31b   : > { %v3233_v39 = vmul.f32 %v7415_v37, %v3105_v30  ;;  %v5794_v17 = vpop.eup %5793  ;;  %v3022_v63 = vmul.f32 %v7430_v48, %v7383_v51  ;;  %vm3027_vm12 = vweird.f32 %v7430_v48 }
 0x31c   : > { %v2188_v58 = vpop.f32.mrf.mxu2  ;;  %v7443_v28 = vadd.f32 1.0, %v5794_v17  ;;  %3861 = vmatpush.bf16.msra.mxu3 %v5314_v56  ;;  %v8214_v17 = vld [vmem:[#allocation16_spill] sm:$0xff]  ;;  %vm3028_vm14 = vmor %vm3026_vm13, %vm3027_vm12 }
 0x31d   : > { %v7428_v46 = vpack.c.bf16 %v3233_v39, %v3231_v45  ;;  %v2189_v47 = vadd.f32 %v2188_v58, %v2140_v0  ;;  %v2237_v40 = vpop.f32.mrf.mxu3  ;;  %v2092_v20 = vpop.f32.mrf.mxu0  ;;  %v2974_v0 = vsel %vm2971_vm7, %v2973_v3, %v2969_v44  ;;  %v3023_v10 = vsub.f32 1.0, %v3022_v63  ;;  %v5634_v44 = vld [vmem:[%s6336_s27 + $0x10c] sm:$0xf0] }
 0x31e   : > { %v2141_v18 = vpop.f32.mrf.mxu1  ;;  %v3000_v39 = vand.u32 2147483647, %v7351_v62  ;;  %v3077_v58 = vmul.f32 %v2974_v0, %v6812_v24  ;;  %5797 = vrcp.f32 %v7443_v28  ;;  %v8211_v62 = vld [vmem:[#allocation13_spill] sm:$0xff]  ;;  %v2999_v24 = vsel %vm7458_vm10, %v7391_v9, %v2995_v8  ;;  %v7476_v63 = vpop.eup %5795 }
 0x31f   : > { %v2238_v23 = vadd.f32 %v2237_v40, %v2189_v47  ;;  %v2142_v31 = vadd.f32 %v2141_v18, %v2092_v20  ;;  %5799 = vpow2.f32 %v5152_v32  ;;  %v7462_v40 = vpop.permute.xlu0 %3193  ;;  %v7465_v20 = vpop.permute.xlu1 %3198  ;;  %v3024_v19 = vmul.f32 %v7430_v48, %v3023_v10  ;;  %v8212_v18 = vld [vmem:[#allocation14_spill] sm:$0xff] }
 0x320   : > { %5801 = vpow2.f32 %v5154_v26  ;;  %vm3001_vm11 = vcmp.eq.f32.partialorder %v3000_v39, 8.507059e+37  ;;  %vm2592_vm1 = vweird.f32 %v7476_v63  ;;  %vm2621_vm4 = vweird.f32 %v7443_v28 }
 0x321   : > { %v3107_v11 = vmul.f32 %v3075_v41, %v2238_v23  ;;  %v8213_v41 = vld [vmem:[#allocation15_spill] sm:$0xff]  ;;  %v3003_v23 = vor.u32 1.1754944e-38, %v3002_v53  ;;  %v3025_v8 = vadd.f32 %v7430_v48, %v3024_v19  ;;  %vm7543_vm3 = vmor %vm2591_vm0, %vm2592_vm1 }
 0x323   : > { %v3235_v3 = vmul.f32 %v7462_v40, %v3107_v11  ;;  %v3004_v13 = vsel %vm3001_vm11, %v3003_v23, %v2999_v24  ;;  %v3030_v11 = vand.u32 2147483647, %v7383_v51 }
 0x324   : > { %v2190_v16 = vpop.f32.mrf.mxu2  ;;  %v7480_v0 = vpop.eup %5797  ;;  %v3079_v53 = vmul.f32 %v3004_v13, %v8191_v6 }
 0x325   : > { %v2191_v30 = vadd.f32 %v2190_v16, %v2142_v31  ;;  %v2239_v27 = vpop.f32.mrf.mxu3  ;;  %v2095_v45 = vpop.f32.mrf.mxu0  ;;  %v5310_v31 = vor.u32 %v5634_v44, %v5309_v61  ;;  %vm3031_vm15 = vcmp.eq.f32.partialorder %v3030_v11, 8.507059e+37  ;;  %vm2622_vm2 = vweird.f32 %v7480_v0 }
 0x326   : > { %v2144_v1 = vpop.f32.mrf.mxu1  ;;  %v5800_v26 = vpop.eup %5799  ;;  %vm2623_vm5 = vmor %vm2621_vm4, %vm2622_vm2 }
 0x327   : > { %v2240_v2 = vadd.f32 %v2239_v27, %v2191_v30  ;;  %v2145_v50 = vadd.f32 %v2144_v1, %v2095_v45  ;;  %3763 = vmatpush.bf16.msra.mxu1 %v5310_v31  ;;  %v3032_v30 = vand.u32 2147483648, %v7383_v51  ;;  %v2587_v27 = vmul.f32 %v7476_v63, %v7440_v33  ;;  %v5802_v39 = vpop.eup %5801  ;;  %v5629_v51 = vld [vmem:[%s6336_s27 + $0xec] sm:$0xf] }
 0x328   : > { %2290 = vmatmul.bf16.gmra.mxu0 %v8211_v62  ;;  %2339 = vmatmul.bf16.gmra.mxu1 %v8212_v18  ;;  %v7499_v19 = vadd.f32 1.0, %v5802_v39  ;;  %v5303_v18 = vld [vmem:[%s6336_s27 + $0xf8] sm:$0xf0]  ;;  %v2595_v39 = vand.u32 2147483647, %v7440_v33 }
 0x329   : > { %2388 = vmatmul.bf16.gmra.mxu2 %v8213_v41  ;;  %v3109_v21 = vmul.f32 %v3077_v58, %v2240_v2  ;;  %v2617_v58 = vmul.f32 %v7480_v0, %v7443_v28  ;;  %v3029_v2 = vsel %vm3028_vm14, %v7430_v48, %v3025_v8  ;;  %v3033_v62 = vor.u32 1.1754944e-38, %v3032_v30  ;;  %v5661_v41 = vld [vmem:[%s6336_s27 + $0x1ec] sm:$0xf]  ;;  %v5431_v48 = vld [vmem:[%s6336_s27 + $0x1f8] sm:$0xf0] }
 0x32a   : > { %2437 = vmatmul.bf16.gmra.mxu3 %v8214_v17  ;;  %v2588_v24 = vsub.f32 1.0, %v2587_v27  ;;  %v8215_v17 = vld [vmem:[#allocation26_spill] sm:$0xff]  ;;  %v7512_v27 = vpop.permute.xlu2 %3203  ;;  %vm2596_vm6 = vcmp.eq.f32.partialorder %v2595_v39, 8.507059e+37  ;;  %vm2681_vm12 = vweird.f32 %v7499_v19 }
 0x32b   : > { %v3237_v9 = vmul.f32 %v7465_v20, %v3109_v21  ;;  %v3034_v21 = vsel %vm3031_vm15, %v3033_v62, %v3029_v2  ;;  %v2618_v23 = vsub.f32 1.0, %v2617_v58  ;;  %v5156_v61 = vmul.f32 -1.442695, %v8215_v17 }
 0x32c   : > { %v2193_v54 = vpop.f32.mrf.mxu2 }
 0x32d   : > { %v7484_v32 = vpack.c.bf16 %v3237_v9, %v3235_v3  ;;  %v2194_v16 = vadd.f32 %v2193_v54, %v2145_v50  ;;  %v2242_v56 = vpop.f32.mrf.mxu3  ;;  %v2097_v10 = vpop.f32.mrf.mxu0  ;;  %v7497_v50 = vadd.f32 1.0, %v5800_v26  ;;  %v5306_v3 = vor.u32 %v5629_v51, %v5303_v18  ;;  %v8216_v9 = vld [vmem:[#allocation27_spill] sm:$0xff]  ;;  %v5429_v51 = vld [vmem:[%s6336_s27 + $0x1e8] sm:$0xf] }
 0x32e   : > { %v2146_v45 = vpop.f32.mrf.mxu1  ;;  %v5158_v31 = vmul.f32 -1.442695, %v8216_v9  ;;  %v2589_v26 = vmul.f32 %v7476_v63, %v2588_v24  ;;  %v2619_v30 = vmul.f32 %v7480_v0, %v2618_v23  ;;  %v5301_v24 = vld [vmem:[%s6336_s27 + $0xe8] sm:$0xf]  ;;  %v2597_v18 = vand.u32 2147483648, %v7440_v33 }
 0x32f   : > { %v2243_v1 = vadd.f32 %v2242_v56, %v2194_v16  ;;  %v2147_v6 = vadd.f32 %v2146_v45, %v2097_v10  ;;  %5803 = vrcp.f32 %v7497_v50  ;;  %v5434_v16 = vor.u32 %v5661_v41, %v5431_v48  ;;  %4001 = vmatpush.bf16.msrb.mxu2 %v5306_v3  ;;  %v7515_v45 = vpop.permute.xlu0 %3208 }
 0x330   : > { %v3081_v10 = vmul.f32 %v3034_v21, %v8194_v42  ;;  %5805 = vrcp.f32 %v7499_v19  ;;  %v2620_v41 = vadd.f32 %v7480_v0, %v2619_v30  ;;  %v2625_v3 = vand.u32 2147483647, %v7443_v28 }
 0x331   : > { %v3111_v47 = vmul.f32 %v3079_v53, %v2243_v1  ;;  %4050 = vmatpush.bf16.msrb.mxu3 %v5434_v16  ;;  %5807 = vpow2.f32 %v5156_v61  ;;  %v2590_v1 = vadd.f32 %v7476_v63, %v2589_v26  ;;  %v5663_v61 = vld [vmem:[%s6336_s27 + $0x1f4] sm:$0xf0]  ;;  %v2598_v30 = vor.u32 1.1754944e-38, %v2597_v18 }
 0x332   : > { %5809 = vpow2.f32 %v5158_v31  ;;  %vm2626_vm7 = vcmp.eq.f32.partialorder %v2625_v3, 8.507059e+37  ;;  %v5415_v3 = vld [vmem:[%s6336_s27 + $0x1d8] sm:$0xf0]  ;;  %vm2651_vm8 = vweird.f32 %v7497_v50 }
 0x333   : > { %v3239_v58 = vmul.f32 %v7512_v27, %v3111_v47  ;;  %v2627_v47 = vand.u32 2147483648, %v7443_v28  ;;  %v2624_v28 = vsel %vm2623_vm5, %v7480_v0, %v2620_v41  ;;  %v5287_v0 = vld [vmem:[%s6336_s27 + $0xd8] sm:$0xf0]  ;;  %v5657_v41 = vld [vmem:[%s6336_s27 + $0x1cc] sm:$0xf] }
 0x334   : > { %v2195_v44 = vpop.f32.mrf.mxu2 }
 0x335   : > { %v2196_v13 = vadd.f32 %v2195_v44, %v2147_v6  ;;  %v2244_v54 = vpop.f32.mrf.mxu3  ;;  %v2256_v8 = vpop.f32.mrf.mxu0  ;;  %v5631_v6 = vld [vmem:[%s6336_s27 + $0xf4] sm:$0xf0] }
 0x336   : > { %v2305_v56 = vpop.f32.mrf.mxu1  ;;  %v7521_v53 = vpop.eup %5803  ;;  %v5302_v23 = vor.u32 %v5631_v6, %v5301_v24 }
 0x337   : > { %v2245_v11 = vadd.f32 %v2244_v54, %v2196_v13  ;;  %v2306_v2 = vadd.f32 %v2305_v56, %v2256_v8  ;;  %v7533_v44 = vpop.eup %5805  ;;  %v5430_v54 = vor.u32 %v5663_v61, %v5429_v51  ;;  %v2647_v56 = vmul.f32 %v7521_v53, %v7497_v50 }
 0x338   : > { %3715 = vmatmul.bf16.vlgmr.msra.gmra.mxu0 %v7088_v55  ;;  %v5808_v8 = vpop.eup %5807  ;;  %vm2652_vm9 = vweird.f32 %v7521_v53  ;;  %vm2682_vm10 = vweird.f32 %v7533_v44 }
 0x339   : > { %3813 = vmatmul.bf16.vlgmr.msra.gmra.mxu2 %v7088_v55  ;;  %v3113_v42 = vmul.f32 %v3081_v10, %v2245_v11  ;;  %3903 = vmatpush.bf16.msrb.mxu0 %v5302_v23  ;;  %v5810_v26 = vpop.eup %5809  ;;  %v2594_v11 = vsel %vm7543_vm3, %v7476_v63, %v2590_v1  ;;  %v2648_v1 = vsub.f32 1.0, %v2647_v56  ;;  %v5625_v23 = vld [vmem:[%s6336_s27 + $0xcc] sm:$0xf]  ;;  %vm7600_vm11 = vmor %vm2651_vm8, %vm2652_vm9 }
 0x33a   : > { %3952 = vmatpush.bf16.msrb.mxu1 %v5430_v54  ;;  %v2599_v63 = vsel %vm2596_vm6, %v2598_v30, %v2594_v11  ;;  %v7560_v24 = vadd.f32 1.0, %v5810_v26  ;;  %v5290_v39 = vor.u32 %v5625_v23, %v5287_v0  ;;  %v5418_v26 = vor.u32 %v5657_v41, %v5415_v3  ;;  %vm7613_vm13 = vmor %vm2681_vm12, %vm2682_vm10 }
 0x33b   : > { %v3241_v62 = vmul.f32 %v7515_v45, %v3113_v42  ;;  %v2677_v42 = vmul.f32 %v7533_v44, %v7499_v19  ;;  %v2657_v0 = vand.u32 2147483648, %v7497_v50 }
 0x33c   : > { %v2354_v21 = vpop.f32.mrf.mxu2  ;;  %4002 = vmatpush.bf16.msrb.mxu2 %v5290_v39  ;;  %4051 = vmatpush.bf16.msrb.mxu3 %v5418_v26  ;;  %v5659_v39 = vld [vmem:[%s6336_s27 + $0x1d4] sm:$0xf0]  ;;  %vm2741_vm4 = vweird.f32 %v7560_v24 }
 0x33d   : > { %v7537_v48 = vpack.c.bf16 %v3241_v62, %v3239_v58  ;;  %v2403_v31 = vpop.f32.mrf.mxu3  ;;  %v2258_v13 = vpop.f32.mrf.mxu0  ;;  %v2355_v33 = vadd.f32 %v2354_v21, %v2306_v2  ;;  %v2628_v58 = vor.u32 1.1754944e-38, %v2627_v47  ;;  %v7558_v62 = vadd.f32 1.0, %v5808_v8  ;;  %v8219_v2 = vld [vmem:[#allocation28_spill] sm:$0xff] }
 0x33e   : > { %v2307_v10 = vpop.f32.mrf.mxu1  ;;  %v5160_v6 = vmul.f32 -1.442695, %v8219_v2  ;;  %v2678_v61 = vsub.f32 1.0, %v2677_v42  ;;  %v3052_v47 = vmul.f32 %v2599_v63, %v8203_v43 }
 0x33f   : > { %v2629_v51 = vsel %vm2626_vm7, %v2628_v58, %v2624_v28  ;;  %v2404_v18 = vadd.f32 %v2403_v31, %v2355_v33  ;;  %v2308_v21 = vadd.f32 %v2307_v10, %v2258_v13  ;;  %5811 = vrcp.f32 %v7558_v62  ;;  %v8220_v10 = vld [vmem:[#allocation29_spill] sm:$0xff] }
 0x340   : > { %v3054_v11 = vmul.f32 %v2629_v51, %v8204_v60  ;;  %v2649_v31 = vmul.f32 %v7521_v53, %v2648_v1  ;;  %5813 = vpow2.f32 %v5160_v6  ;;  %v5162_v33 = vmul.f32 -1.442695, %v8220_v10  ;;  %v5285_v51 = vld [vmem:[%s6336_s27 + $0xc8] sm:$0xf] }
 0x341   : > { %5815 = vrcp.f32 %v7560_v24  ;;  %v3084_v30 = vmul.f32 %v3052_v47, %v2404_v18  ;;  %v2679_v28 = vmul.f32 %v7533_v44, %v2678_v61  ;;  %v5627_v18 = vld [vmem:[%s6336_s27 + $0xd4] sm:$0xf0]  ;;  %vm2711_vm0 = vweird.f32 %v7558_v62 }
 0x342   : > { %v2650_v42 = vadd.f32 %v7521_v53, %v2649_v31  ;;  %5817 = vpow2.f32 %v5162_v33 }
 0x343   : > { %v3212_v63 = vmul.f32 %v7034_v57, %v3084_v30  ;;  %v2680_v41 = vadd.f32 %v7533_v44, %v2679_v28  ;;  %v2655_v57 = vand.u32 2147483647, %v7497_v50 }
 0x344   : > { %v2356_v54 = vpop.f32.mrf.mxu2  ;;  %v2654_v33 = vsel %vm7600_vm11, %v7521_v53, %v2650_v42 }
 0x345   : > { %v2357_v8 = vadd.f32 %v2356_v54, %v2308_v21  ;;  %v2405_v16 = vpop.f32.mrf.mxu3  ;;  %v2261_v56 = vpop.f32.mrf.mxu0  ;;  %v5413_v21 = vld [vmem:[%s6336_s27 + $0x1c8] sm:$0xf]  ;;  %v5286_v54 = vor.u32 %v5627_v18, %v5285_v51  ;;  %v2684_v53 = vsel %vm7613_vm13, %v7533_v44, %v2680_v41  ;;  %vm2656_vm14 = vcmp.eq.f32.partialorder %v2655_v57, 8.507059e+37  ;;  %v5621_v44 = vld [vmem:[%s6336_s27 + $0xac] sm:$0xf] }
 0x346   : > { %v2310_v13 = vpop.f32.mrf.mxu1  ;;  %v7579_v58 = vpop.eup %5811  ;;  %v5653_v41 = vld [vmem:[%s6336_s27 + $0x1ac] sm:$0xf] }
 0x347   : > { %v2406_v43 = vadd.f32 %v2405_v16, %v2357_v8  ;;  %v2311_v6 = vadd.f32 %v2310_v13, %v2261_v56  ;;  %v5814_v23 = vpop.eup %5813  ;;  %v5414_v56 = vor.u32 %v5659_v39, %v5413_v21  ;;  %v2707_v31 = vmul.f32 %v7579_v58, %v7558_v62  ;;  %3904 = vmatpush.bf16.msrb.mxu0 %v5286_v54 }
 0x348   : > { %3720 = vmatmul.bf16.gmra.mxu0 %v7156_v52  ;;  %v7590_v3 = vpop.eup %5815  ;;  %v7617_v30 = vadd.f32 1.0, %v5814_v23  ;;  %vm2712_vm1 = vweird.f32 %v7579_v58 }
 0x349   : > { %v3086_v60 = vmul.f32 %v3054_v11, %v2406_v43  ;;  %3818 = vmatmul.bf16.gmra.mxu2 %v7156_v52  ;;  %v2685_v11 = vand.u32 2147483647, %v7499_v19  ;;  %v2737_v28 = vmul.f32 %v7590_v3, %v7560_v24  ;;  %3953 = vmatpush.bf16.msrb.mxu1 %v5414_v56  ;;  %vm2742_vm2 = vweird.f32 %v7590_v3  ;;  %vm7663_vm3 = vmor %vm2711_vm0, %vm2712_vm1 }
 0x34a   : > { %5819 = vrcp.f32 %v7617_v30  ;;  %vm7679_vm5 = vmor %vm2741_vm4, %vm2742_vm2  ;;  %vm2771_vm9 = vweird.f32 %v7617_v30 }
 0x34b   : > { %v3214_v1 = vmul.f32 %v7074_v5, %v3086_v60  ;;  %v2687_v5 = vand.u32 2147483648, %v7499_v19  ;;  %v2658_v19 = vor.u32 1.1754944e-38, %v2657_v0  ;;  %v5818_v60 = vpop.eup %5817  ;;  %vm2686_vm15 = vcmp.eq.f32.partialorder %v2685_v11, 8.507059e+37  ;;  %v5271_v0 = vld [vmem:[%s6336_s27 + $0xb8] sm:$0xf0] }
 0x34c   : > { %v2359_v61 = vpop.f32.mrf.mxu2  ;;  %v7631_v54 = vadd.f32 1.0, %v5818_v60  ;;  %v5274_v57 = vor.u32 %v5621_v44, %v5271_v0  ;;  %v5397_v44 = vld [vmem:[%s6336_s27 + $0x1a8] sm:$0xf] }
 0x34d   : > { %v7594_v47 = vpack.c.bf16 %v3214_v1, %v3212_v63  ;;  %v2408_v8 = vpop.f32.mrf.mxu3  ;;  %v2263_v16 = vpop.f32.mrf.mxu0  ;;  %v2360_v43 = vadd.f32 %v2359_v61, %v2311_v6  ;;  %v2688_v42 = vor.u32 1.1754944e-38, %v2687_v5  ;;  %v2659_v63 = vsel %vm2656_vm14, %v2658_v19, %v2654_v33  ;;  %v8225_v6 = vld [vmem:[#allocation30_spill] sm:$0xff]  ;;  %v5399_v5 = vld [vmem:[%s6336_s27 + $0x1b8] sm:$0xf0] }
 0x34e   : > { %v2312_v13 = vpop.f32.mrf.mxu1  ;;  %v2708_v1 = vsub.f32 1.0, %v2707_v31  ;;  %v5164_v51 = vmul.f32 -1.442695, %v8225_v6  ;;  %v2738_v61 = vsub.f32 1.0, %v2737_v28  ;;  %v3056_v56 = vmul.f32 %v2659_v63, %v8207_v14  ;;  %4003 = vmatpush.bf16.msrb.mxu2 %v5274_v57  ;;  %v5655_v57 = vld [vmem:[%s6336_s27 + $0x1b4] sm:$0xf0] }
 0x34f   : > { %3764 = vmatmul.bf16.vlgmr.msra.gmra.mxu1 %v7594_v47  ;;  %3862 = vmatmul.bf16.vlgmr.msra.gmra.mxu3 %v7594_v47  ;;  %v2689_v18 = vsel %vm2686_vm15, %v2688_v42, %v2684_v53  ;;  %v2409_v21 = vadd.f32 %v2408_v8, %v2360_v43  ;;  %v2313_v23 = vadd.f32 %v2312_v13, %v2263_v16  ;;  %v8226_v13 = vld [vmem:[#allocation31_spill] sm:$0xff]  ;;  %v2715_v42 = vand.u32 2147483647, %v7558_v62 }
 0x350   : > { %v5402_v33 = vor.u32 %v5653_v41, %v5399_v5  ;;  %v3058_v50 = vmul.f32 %v2689_v18, %v8208_v22  ;;  %v2709_v8 = vmul.f32 %v7579_v58, %v2708_v1  ;;  %5821 = vpow2.f32 %v5164_v51  ;;  %v7641_v14 = vpop.eup %5819 }
 0x351   : > { %v5166_v43 = vmul.f32 -1.442695, %v8226_v13  ;;  %v3088_v19 = vmul.f32 %v3056_v56, %v2409_v21  ;;  %v2739_v28 = vmul.f32 %v7590_v3, %v2738_v61  ;;  %5823 = vrcp.f32 %v7631_v54  ;;  %v5269_v21 = vld [vmem:[%s6336_s27 + $0xa8] sm:$0xf] }
 0x352   : > { %4052 = vmatpush.bf16.msrb.mxu3 %v5402_v33  ;;  %v2710_v60 = vadd.f32 %v7579_v58, %v2709_v8  ;;  %v2717_v63 = vand.u32 2147483648, %v7558_v62  ;;  %v2767_v41 = vmul.f32 %v7641_v14, %v7617_v30  ;;  %v2745_v62 = vand.u32 2147483647, %v7560_v24 }
 0x353   : > { %5825 = vpow2.f32 %v5166_v43  ;;  %v3216_v1 = vmul.f32 %v7096_v29, %v3088_v19  ;;  %v2740_v0 = vadd.f32 %v7590_v3, %v2739_v28  ;;  %vm2716_vm6 = vcmp.eq.f32.partialorder %v2715_v42, 8.507059e+37  ;;  %v5383_v29 = vld [vmem:[%s6336_s27 + $0x198] sm:$0xf0] }
 0x354   : > { %v2361_v39 = vpop.f32.mrf.mxu2  ;;  %vm2746_vm7 = vcmp.eq.f32.partialorder %v2745_v62, 8.507059e+37  ;;  %vm2772_vm8 = vweird.f32 %v7641_v14  ;;  %vm2801_vm13 = vweird.f32 %v7631_v54 }
 0x355   : > { %v2362_v26 = vadd.f32 %v2361_v39, %v2313_v23  ;;  %v2410_v11 = vpop.f32.mrf.mxu3  ;;  %v2266_v31 = vpop.f32.mrf.mxu0  ;;  %v5623_v23 = vld [vmem:[%s6336_s27 + $0xb4] sm:$0xf0]  ;;  %vm7713_vm10 = vmor %vm2771_vm9, %vm2772_vm8 }
 0x356   : > { %v2315_v16 = vpop.f32.mrf.mxu1  ;;  %v5270_v39 = vor.u32 %v5623_v23, %v5269_v21  ;;  %v5822_v5 = vpop.eup %5821  ;;  %v5617_v23 = vld [vmem:[%s6336_s27 + $0x8c] sm:$0xf] }
 0x357   : > { %v2411_v53 = vadd.f32 %v2410_v11, %v2362_v26  ;;  %v2316_v18 = vadd.f32 %v2315_v16, %v2266_v31  ;;  %v5398_v31 = vor.u32 %v5655_v57, %v5397_v44  ;;  %v7670_v33 = vpop.eup %5823  ;;  %v2718_v16 = vor.u32 1.1754944e-38, %v2717_v63  ;;  %v5255_v44 = vld [vmem:[%s6336_s27 + $0x98] sm:$0xf0] }
 0x358   : > { %3725 = vmatmul.bf16.gmra.mxu0 %v7226_v12  ;;  %v7690_v63 = vadd.f32 1.0, %v5822_v5  ;;  %v5258_v57 = vor.u32 %v5617_v23, %v5255_v44  ;;  %v5381_v23 = vld [vmem:[%s6336_s27 + $0x188] sm:$0xf]  ;;  %vm2802_vm11 = vweird.f32 %v7670_v33 }
 0x359   : > { %v3090_v22 = vmul.f32 %v3058_v50, %v2411_v53  ;;  %3823 = vmatmul.bf16.gmra.mxu2 %v7226_v12  ;;  %v2714_v50 = vsel %vm7663_vm3, %v7579_v58, %v2710_v60  ;;  %3905 = vmatpush.bf16.msrb.mxu0 %v5270_v39  ;;  %v2768_v58 = vsub.f32 1.0, %v2767_v41  ;;  %v5826_v53 = vpop.eup %5825  ;;  %v2797_v60 = vmul.f32 %v7670_v33, %v7631_v54  ;;  %vm7745_vm14 = vmor %vm2801_vm13, %vm2802_vm11 }
 0x35a   : > { %3954 = vmatpush.bf16.msrb.mxu1 %v5398_v31  ;;  %v2719_v28 = vsel %vm2716_vm6, %v2718_v16, %v2714_v50  ;;  %5827 = vrcp.f32 %v7690_v63  ;;  %4004 = vmatpush.bf16.msrb.mxu2 %v5258_v57  ;;  %vm2831_vm1 = vweird.f32 %v7690_v63 }
 0x35b   : > { %v3218_v51 = vmul.f32 %v7143_v49, %v3090_v22  ;;  %v2747_v49 = vand.u32 2147483648, %v7560_v24  ;;  %v2744_v24 = vsel %vm7679_vm5, %v7590_v3, %v2740_v0  ;;  %v5649_v3 = vld [vmem:[%s6336_s27 + $0x18c] sm:$0xf]  ;;  %v3060_v0 = vmul.f32 %v2719_v28, %v8215_v17  ;;  %v8232_v17 = vld [vmem:[#allocation33_spill] sm:$0xff] }
 0x35c   : > { %v2364_v61 = vpop.f32.mrf.mxu2  ;;  %v2769_v41 = vmul.f32 %v7641_v14, %v2768_v58  ;;  %v2798_v5 = vsub.f32 1.0, %v2797_v60  ;;  %v2777_v28 = vand.u32 2147483648, %v7617_v30 }
 0x35d   : > { %v2413_v56 = vpop.f32.mrf.mxu3  ;;  %v2268_v26 = vpop.f32.mrf.mxu0  ;;  %v7668_v11 = vpack.c.bf16 %v3218_v51, %v3216_v1  ;;  %v2365_v19 = vadd.f32 %v2364_v61, %v2316_v18  ;;  %v2748_v22 = vor.u32 1.1754944e-38, %v2747_v49  ;;  %v8231_v1 = vld [vmem:[#allocation32_spill] sm:$0xff]  ;;  %v7698_v61 = vadd.f32 1.0, %v5826_v53 }
 0x35e   : > { %v2317_v8 = vpop.f32.mrf.mxu1  ;;  %v5168_v51 = vmul.f32 -1.442695, %v8231_v1  ;;  %v2775_v53 = vand.u32 2147483647, %v7617_v30 }
 0x35f   : > { %3769 = vmatmul.bf16.gmra.mxu1 %v7668_v11  ;;  %3867 = vmatmul.bf16.gmra.mxu3 %v7668_v11  ;;  %v2749_v42 = vsel %vm2746_vm7, %v2748_v22, %v2744_v24  ;;  %v2414_v18 = vadd.f32 %v2413_v56, %v2365_v19  ;;  %v2318_v21 = vadd.f32 %v2317_v8, %v2268_v26  ;;  %v5170_v8 = vmul.f32 -1.442695, %v8232_v17 }
 0x360   : > { %v5386_v56 = vor.u32 %v5649_v3, %v5383_v29  ;;  %v3062_v26 = vmul.f32 %v2749_v42, %v8216_v9  ;;  %5829 = vpow2.f32 %v5168_v51  ;;  %v2770_v19 = vadd.f32 %v7641_v14, %v2769_v41  ;;  %v7719_v22 = vpop.eup %5827  ;;  %v5651_v41 = vld [vmem:[%s6336_s27 + $0x194] sm:$0xf0] }
 0x361   : > { %v3092_v16 = vmul.f32 %v3060_v0, %v2414_v18  ;;  %5831 = vrcp.f32 %v7698_v61  ;;  %v2799_v9 = vmul.f32 %v7670_v33, %v2798_v5  ;;  %v5253_v18 = vld [vmem:[%s6336_s27 + $0x88] sm:$0xf]  ;;  %vm2776_vm12 = vcmp.eq.f32.partialorder %v2775_v53, 8.507059e+37 }
 0x362   : > { %4053 = vmatpush.bf16.msrb.mxu3 %v5386_v56  ;;  %5833 = vpow2.f32 %v5170_v8  ;;  %v2774_v44 = vsel %vm7713_vm10, %v7641_v14, %v2770_v19  ;;  %v2807_v14 = vand.u32 2147483648, %v7631_v54  ;;  %vm2832_vm0 = vweird.f32 %v7719_v22 }
 0x363   : > { %v3220_v60 = vmul.f32 %v7164_v34, %v3092_v16  ;;  %v2800_v30 = vadd.f32 %v7670_v33, %v2799_v9  ;;  %vm7785_vm2 = vmor %vm2831_vm1, %vm2832_vm0  ;;  %vm2861_vm4 = vweird.f32 %v7698_v61 }
 0x364   : > { %v2366_v39 = vpop.f32.mrf.mxu2  ;;  %v2808_v9 = vor.u32 1.1754944e-38, %v2807_v14 }
 0x365   : > { %v2367_v49 = vadd.f32 %v2366_v39, %v2318_v21  ;;  %v2415_v31 = vpop.f32.mrf.mxu3  ;;  %v2271_v50 = vpop.f32.mrf.mxu0  ;;  %v5619_v21 = vld [vmem:[%s6336_s27 + $0x94] sm:$0xf0] }
 0x366   : > { %v2320_v62 = vpop.f32.mrf.mxu1  ;;  %v5254_v0 = vor.u32 %v5619_v21, %v5253_v18  ;;  %v5830_v39 = vpop.eup %5829 }
 0x367   : > { %v2416_v43 = vadd.f32 %v2415_v31, %v2367_v49  ;;  %v2321_v42 = vadd.f32 %v2320_v62, %v2271_v50  ;;  %v7734_v5 = vpop.eup %5831  ;;  %v2778_v49 = vor.u32 1.1754944e-38, %v2777_v28  ;;  %v2805_v31 = vand.u32 2147483647, %v7631_v54 }
 0x368   : > { %3730 = vmatmul.bf16.gmra.mxu0 %v7290_v36  ;;  %v2827_v50 = vmul.f32 %v7719_v22, %v7690_v63  ;;  %v7749_v16 = vadd.f32 1.0, %v5830_v39  ;;  %v2804_v54 = vsel %vm7745_vm14, %v7670_v33, %v2800_v30  ;;  %v2857_v19 = vmul.f32 %v7734_v5, %v7698_v61 }
 0x369   : > { %v3094_v24 = vmul.f32 %v3062_v26, %v2416_v43  ;;  %3828 = vmatmul.bf16.gmra.mxu2 %v7290_v36  ;;  %3906 = vmatpush.bf16.msrb.mxu0 %v5254_v0  ;;  %v2779_v62 = vsel %vm2776_vm12, %v2778_v49, %v2774_v44  ;;  %v5834_v43 = vpop.eup %5833  ;;  %vm2806_vm15 = vcmp.eq.f32.partialorder %v2805_v31, 8.507059e+37  ;;  %v5367_v44 = vld [vmem:[%s6336_s27 + $0x178] sm:$0xf0]  ;;  %v8237_v0 = vld [vmem:[#allocation34_spill] sm:$0xff]  ;;  %v8238_v31 = vld [vmem:[#allocation35_spill] sm:$0xff]  ;;  %vm2862_vm3 = vweird.f32 %v7734_v5 }
 0x36a   : > { %v3064_v58 = vmul.f32 %v2779_v62, %v8219_v2  ;;  %v2809_v18 = vsel %vm2806_vm15, %v2808_v9, %v2804_v54  ;;  %5835 = vrcp.f32 %v7749_v16  ;;  %v7761_v21 = vadd.f32 1.0, %v5834_v43  ;;  %vm7807_vm6 = vmor %vm2861_vm4, %vm2862_vm3 }
 0x36b   : > { %v3222_v51 = vmul.f32 %v7211_v25, %v3094_v24  ;;  %v5382_v25 = vor.u32 %v5651_v41, %v5381_v23  ;;  %v2828_v24 = vsub.f32 1.0, %v2827_v50  ;;  %v5172_v41 = vmul.f32 -1.442695, %v8237_v0 }
 0x36c   : > { %v2369_v3 = vpop.f32.mrf.mxu2  ;;  %v3066_v49 = vmul.f32 %v2809_v18, %v8220_v10  ;;  %v5174_v14 = vmul.f32 -1.442695, %v8238_v31  ;;  %5837 = vrcp.f32 %v7761_v21  ;;  %v2837_v43 = vand.u32 2147483648, %v7690_v63 }
 0x36d   : > { %v2418_v57 = vpop.f32.mrf.mxu3  ;;  %v2273_v34 = vpop.f32.mrf.mxu0  ;;  %v7732_v29 = vpack.c.bf16 %v3222_v51, %v3220_v60  ;;  %v2370_v26 = vadd.f32 %v2369_v3, %v2321_v42  ;;  %3955 = vmatpush.bf16.msrb.mxu1 %v5382_v25  ;;  %v5613_v60 = vld [vmem:[%s6336_s27 + $0x6c] sm:$0xf]  ;;  %v5239_v51 = vld [vmem:[%s6336_s27 + $0x78] sm:$0xf0]  ;;  %v2858_v3 = vsub.f32 1.0, %v2857_v19  ;;  %5839 = vpow2.f32 %v5172_v41 }
 0x36e   : > { %v2322_v56 = vpop.f32.mrf.mxu1  ;;  %v5645_v42 = vld [vmem:[%s6336_s27 + $0x16c] sm:$0xf]  ;;  %v5242_v23 = vor.u32 %v5613_v60, %v5239_v51  ;;  %5841 = vpow2.f32 %v5174_v14  ;;  %v2865_v41 = vand.u32 2147483647, %v7698_v61  ;;  %vm2891_vm9 = vweird.f32 %v7749_v16 }
 0x36f   : > { %3774 = vmatmul.bf16.gmra.mxu1 %v7732_v29  ;;  %3872 = vmatmul.bf16.gmra.mxu3 %v7732_v29  ;;  %v2419_v53 = vadd.f32 %v2418_v57, %v2370_v26  ;;  %v2323_v28 = vadd.f32 %v2322_v56, %v2273_v34  ;;  %v5370_v2 = vor.u32 %v5645_v42, %v5367_v44  ;;  %v5647_v42 = vld [vmem:[%s6336_s27 + $0x174] sm:$0xf0]  ;;  %vm2921_vm13 = vweird.f32 %v7761_v21 }
 0x370   : > { %v2829_v57 = vmul.f32 %v7719_v22, %v2828_v24  ;;  %4005 = vmatpush.bf16.msrb.mxu2 %v5242_v23  ;;  %v2859_v26 = vmul.f32 %v7734_v5, %v2858_v3  ;;  %v7772_v10 = vpop.eup %5835  ;;  %v5237_v24 = vld [vmem:[%s6336_s27 + $0x68] sm:$0xf]  ;;  %vm2866_vm7 = vcmp.eq.f32.partialorder %v2865_v41, 8.507059e+37 }
 0x371   : > { %v3096_v50 = vmul.f32 %v3064_v58, %v2419_v53  ;;  %4054 = vmatpush.bf16.msrb.mxu3 %v5370_v2  ;;  %v5615_v58 = vld [vmem:[%s6336_s27 + $0x74] sm:$0xf0]  ;;  %v5365_v53 = vld [vmem:[%s6336_s27 + $0x168] sm:$0xf]  ;;  %vm2892_vm8 = vweird.f32 %v7772_v10 }
 0x372   : > { %v2830_v8 = vadd.f32 %v7719_v22, %v2829_v57  ;;  %v5238_v51 = vor.u32 %v5615_v58, %v5237_v24  ;;  %v5366_v44 = vor.u32 %v5647_v42, %v5365_v53  ;;  %v7793_v3 = vpop.eup %5837  ;;  %v2838_v57 = vor.u32 1.1754944e-38, %v2837_v43  ;;  %v8243_v42 = vld [vmem:[#allocation36_spill] sm:$0xff]  ;;  %vm7856_vm11 = vmor %vm2891_vm9, %vm2892_vm8 }
 0x373   : > { %v3224_v54 = vmul.f32 %v7271_v4, %v3096_v50  ;;  %v5840_v2 = vpop.eup %5839  ;;  %v2917_v50 = vmul.f32 %v7793_v3, %v7761_v21  ;;  %v5176_v18 = vmul.f32 -1.442695, %v8243_v42  ;;  %vm2922_vm10 = vweird.f32 %v7793_v3 }
 0x374   : > { %v2371_v33 = vpop.f32.mrf.mxu2  ;;  %3907 = vmatpush.bf16.msrb.mxu0 %v5238_v51  ;;  %3956 = vmatpush.bf16.msrb.mxu1 %v5366_v44  ;;  %vm7871_vm14 = vmor %vm2921_vm13, %vm2922_vm10 }
 0x375   : > { %v2372_v39 = vadd.f32 %v2371_v33, %v2323_v28  ;;  %v2420_v30 = vpop.f32.mrf.mxu3  ;;  %v2276_v25 = vpop.f32.mrf.mxu0  ;;  %v2835_v28 = vand.u32 2147483647, %v7690_v63  ;;  %v2860_v33 = vadd.f32 %v7734_v5, %v2859_v26  ;;  %v2834_v63 = vsel %vm7785_vm2, %v7719_v22, %v2830_v8 }
 0x376   : > { %v2325_v34 = vpop.f32.mrf.mxu1  ;;  %v2918_v51 = vsub.f32 1.0, %v2917_v50  ;;  %v2897_v22 = vand.u32 2147483648, %v7749_v16 }
 0x377   : > { %v2421_v56 = vadd.f32 %v2420_v30, %v2372_v39  ;;  %v2326_v9 = vadd.f32 %v2325_v34, %v2276_v25  ;;  %v2867_v39 = vand.u32 2147483648, %v7698_v61  ;;  %v2887_v30 = vmul.f32 %v7772_v10, %v7749_v16 }
 0x378   : > { %3735 = vmatmul.bf16.gmra.mxu0 %v7357_v59  ;;  %vm2836_vm5 = vcmp.eq.f32.partialorder %v2835_v28, 8.507059e+37  ;;  %v2864_v61 = vsel %vm7807_vm6, %v7734_v5, %v2860_v33 }
 0x379   : > { %v3098_v62 = vmul.f32 %v3066_v49, %v2421_v56  ;;  %3833 = vmatmul.bf16.gmra.mxu2 %v7357_v59  ;;  %v5842_v49 = vpop.eup %5841  ;;  %v2839_v14 = vsel %vm2836_vm5, %v2838_v57, %v2834_v63  ;;  %v2868_v56 = vor.u32 1.1754944e-38, %v2867_v39  ;;  %v2888_v26 = vsub.f32 1.0, %v2887_v30 }
 0x37a   : > { %v3068_v24 = vmul.f32 %v2839_v14, %v8225_v6  ;;  %v7822_v53 = vadd.f32 1.0, %v5842_v49  ;;  %v2919_v57 = vmul.f32 %v7793_v3, %v2918_v51 }
 0x37b   : > { %v3226_v19 = vmul.f32 %v7274_v7, %v3098_v62  ;;  %v7816_v62 = vadd.f32 1.0, %v5840_v2  ;;  %v2869_v58 = vsel %vm2866_vm7, %v2868_v56, %v2864_v61  ;;  %v2889_v30 = vmul.f32 %v7772_v10, %v2888_v26  ;;  %v5221_v56 = vld [vmem:[%s6336_s27 + $0x48] sm:$0xf]  ;;  %v5611_v26 = vld [vmem:[%s6336_s27 + $0x54] sm:$0xf0] }
 0x37c   : > { %v2374_v60 = vpop.f32.mrf.mxu2  ;;  %v3070_v6 = vmul.f32 %v2869_v58, %v8226_v13  ;;  %v2895_v13 = vand.u32 2147483647, %v7749_v16  ;;  %v2925_v58 = vand.u32 2147483647, %v7761_v21  ;;  %v5601_v16 = vld [vmem:[%s6336_s27 + $0xc] sm:$0xf]  ;;  %vm2981_vm4 = vweird.f32 %v7822_v53 }
 0x37d   : > { %v2423_v4 = vpop.f32.mrf.mxu3  ;;  %v2278_v7 = vpop.f32.mrf.mxu0  ;;  %v7791_v23 = vpack.c.bf16 %v3226_v19, %v3224_v54  ;;  %v2375_v34 = vadd.f32 %v2374_v60, %v2326_v9  ;;  %v5609_v54 = vld [vmem:[%s6336_s27 + $0x4c] sm:$0xf]  ;;  %v5223_v19 = vld [vmem:[%s6336_s27 + $0x58] sm:$0xf0]  ;;  %5843 = vrcp.f32 %v7816_v62  ;;  %v2890_v49 = vadd.f32 %v7772_v10, %v2889_v30 }
 0x37e   : > { %v2327_v25 = vpop.f32.mrf.mxu1  ;;  %v5641_v9 = vld [vmem:[%s6336_s27 + $0x14c] sm:$0xf]  ;;  %v5226_v28 = vor.u32 %v5609_v54, %v5223_v19  ;;  %v5351_v60 = vld [vmem:[%s6336_s27 + $0x158] sm:$0xf0]  ;;  %5845 = vrcp.f32 %v7822_v53  ;;  %v5222_v19 = vor.u32 %v5611_v26, %v5221_v56  ;;  %vm7860_vm12 = vcmp.eq.f32.partialorder %v2895_v13, 8.507059e+37 }
 0x37f   : > { %3779 = vmatmul.bf16.gmra.mxu1 %v7791_v23  ;;  %3877 = vmatmul.bf16.gmra.mxu3 %v7791_v23  ;;  %v2424_v8 = vadd.f32 %v2423_v4, %v2375_v34  ;;  %v2328_v43 = vadd.f32 %v2327_v25, %v2278_v7  ;;  %v5354_v41 = vor.u32 %v5641_v9, %v5351_v60  ;;  %v8244_v4 = vld [vmem:[#allocation37_spill] sm:$0xff]  ;;  %5847 = vpow2.f32 %v5176_v18  ;;  %v5643_v9 = vld [vmem:[%s6336_s27 + $0x154] sm:$0xf0]  ;;  %v5605_v30 = vld [vmem:[%s6336_s27 + $0x2c] sm:$0xf] }
 0x380   : > { %v5178_v7 = vmul.f32 -1.442695, %v8244_v4  ;;  %4006 = vmatpush.bf16.msrb.mxu2 %v5226_v28  ;;  %v2927_v18 = vand.u32 2147483648, %v7761_v21  ;;  %3908 = vmatpush.bf16.msrb.mxu0 %v5222_v19  ;;  %vm2926_vm15 = vcmp.eq.f32.partialorder %v2925_v58, 8.507059e+37  ;;  %v5607_v13 = vld [vmem:[%s6336_s27 + $0x34] sm:$0xf0]  ;;  %vm2951_vm1 = vweird.f32 %v7816_v62 }
 0x381   : > { %v3100_v25 = vmul.f32 %v3068_v24, %v2424_v8  ;;  %4055 = vmatpush.bf16.msrb.mxu3 %v5354_v41  ;;  %v5349_v8 = vld [vmem:[%s6336_s27 + $0x148] sm:$0xf]  ;;  %v2920_v24 = vadd.f32 %v7793_v3, %v2919_v57  ;;  %v2898_v41 = vor.u32 1.1754944e-38, %v2897_v22 }
 0x382   : > { %5849 = vpow2.f32 %v5178_v7  ;;  %v5350_v28 = vor.u32 %v5643_v9, %v5349_v8  ;;  %v5637_v8 = vld [vmem:[%s6336_s27 + $0x12c] sm:$0xf]  ;;  %v5189_v58 = vld [vmem:[%s6336_s27 + $0x8] sm:$0xf] }
 0x383   : > { %v3228_v14 = vmul.f32 %v7338_v38, %v3100_v25  ;;  %v5205_v25 = vld [vmem:[%s6336_s27 + $0x28] sm:$0xf] }
 0x384   : > { %v2376_v5 = vpop.f32.mrf.mxu2  ;;  %3957 = vmatpush.bf16.msrb.mxu1 %v5350_v28  ;;  %v5603_v28 = vld [vmem:[%s6336_s27 + $0x14] sm:$0xf0] }
 0x385   : > { %v2377_v33 = vadd.f32 %v2376_v5, %v2328_v43  ;;  %v2425_v44 = vpop.f32.mrf.mxu3  ;;  %v2281_v63 = vpop.f32.mrf.mxu0  ;;  %v5190_v7 = vor.u32 %v5603_v28, %v5189_v58  ;;  %v2985_v58 = vand.u32 2147483647, %v7822_v53 }
 0x386   : > { %v2330_v39 = vpop.f32.mrf.mxu1  ;;  %v7843_v43 = vpop.eup %5843 }
 0x387   : > { %v2426_v2 = vadd.f32 %v2425_v44, %v2377_v33  ;;  %v2331_v50 = vadd.f32 %v2330_v39, %v2281_v63  ;;  %v7852_v60 = vpop.eup %5845  ;;  %v2894_v63 = vsel %vm7856_vm11, %v7772_v10, %v2890_v49  ;;  %v2947_v39 = vmul.f32 %v7843_v43, %v7816_v62  ;;  %v5207_v10 = vld [vmem:[%s6336_s27 + $0x38] sm:$0xf0] }
 0x388   : > { %3740 = vmatmul.bf16.gmra.mxu0 %v7428_v46  ;;  %v5848_v44 = vpop.eup %5847  ;;  %v2977_v57 = vmul.f32 %v7852_v60, %v7822_v53  ;;  %v2899_v22 = vsel %vm7860_vm12, %v2898_v41, %v2894_v63  ;;  %v2928_v49 = vor.u32 1.1754944e-38, %v2927_v18  ;;  %vm2952_vm0 = vweird.f32 %v7843_v43 }
 0x389   : > { %v3102_v34 = vmul.f32 %v3070_v6, %v2426_v2  ;;  %3838 = vmatmul.bf16.gmra.mxu2 %v7428_v46  ;;  %v5850_v21 = vpop.eup %5849  ;;  %v2924_v2 = vsel %vm7871_vm14, %v7793_v3, %v2920_v24  ;;  %v3072_v51 = vmul.f32 %v2899_v22, %v8231_v1  ;;  %vm2982_vm2 = vweird.f32 %v7852_v60  ;;  %vm7927_vm3 = vmor %vm2951_vm1, %vm2952_vm0 }
 0x38a   : > { %v7892_v56 = vadd.f32 1.0, %v5850_v21  ;;  %v2929_v19 = vsel %vm2926_vm15, %v2928_v49, %v2924_v2  ;;  %v2978_v18 = vsub.f32 1.0, %v2977_v57  ;;  %v2957_v49 = vand.u32 2147483648, %v7816_v62  ;;  %vm2983_vm5 = vmor %vm2981_vm4, %vm2982_vm2 }
 0x38b   : > { %v3230_v61 = vmul.f32 %v7341_v15, %v3102_v34  ;;  %v5210_v34 = vor.u32 %v5605_v30, %v5207_v10  ;;  %vm2986_vm7 = vcmp.eq.f32.partialorder %v2985_v58, 8.507059e+37 }
 0x38c   : > { %v2379_v54 = vpop.f32.mrf.mxu2  ;;  %v2979_v1 = vmul.f32 %v7852_v60, %v2978_v18  ;;  %v5319_v18 = vld [vmem:[%s6336_s27 + $0x118] sm:$0xf0]  ;;  %vm3041_vm12 = vweird.f32 %v7892_v56 }
 0x38d   : > { %v2428_v38 = vpop.f32.mrf.mxu3  ;;  %v2283_v5 = vpop.f32.mrf.mxu0  ;;  %v7850_v15 = vpack.c.bf16 %v3230_v61, %v3228_v14  ;;  %v2380_v6 = vadd.f32 %v2379_v54, %v2331_v50  ;;  %v7890_v14 = vadd.f32 1.0, %v5848_v44  ;;  %v5206_v61 = vor.u32 %v5607_v13, %v5205_v25  ;;  %4007 = vmatpush.bf16.msrb.mxu2 %v5210_v34  ;;  %v5335_v54 = vld [vmem:[%s6336_s27 + $0x138] sm:$0xf0]  ;;  %v5333_v34 = vld [vmem:[%s6336_s27 + $0x128] sm:$0xf] }
 0x38e   : > { %v2332_v33 = vpop.f32.mrf.mxu1  ;;  %v2948_v50 = vsub.f32 1.0, %v2947_v39  ;;  %v5338_v24 = vor.u32 %v5637_v8, %v5335_v54  ;;  %v3074_v39 = vmul.f32 %v2929_v19, %v8232_v17  ;;  %v5639_v13 = vld [vmem:[%s6336_s27 + $0x134] sm:$0xf0] }
 0x38f   : > { %3784 = vmatmul.bf16.gmra.mxu1 %v7850_v15  ;;  %3882 = vmatmul.bf16.gmra.mxu3 %v7850_v15  ;;  %v2429_v3 = vadd.f32 %v2428_v38, %v2380_v6  ;;  %v2333_v26 = vadd.f32 %v2332_v33, %v2283_v5  ;;  %v5191_v38 = vld [vmem:[%s6336_s27 + $0x18] sm:$0xf0]  ;;  %5851 = vrcp.f32 %v7890_v14  ;;  %vm3011_vm9 = vweird.f32 %v7890_v14 }
 0x390   : > { %3909 = vmatpush.bf16.msrb.mxu0 %v5206_v61  ;;  %4056 = vmatpush.bf16.msrb.mxu3 %v5338_v24  ;;  %v5194_v33 = vor.u32 %v5601_v16, %v5191_v38  ;;  %v2949_v6 = vmul.f32 %v7843_v43, %v2948_v50  ;;  %5853 = vrcp.f32 %v7892_v56  ;;  %v5334_v50 = vor.u32 %v5639_v13, %v5333_v34 }
 0x391   : > { %v3104_v21 = vmul.f32 %v3072_v51, %v2429_v3  ;;  %v2955_v3 = vand.u32 2147483647, %v7816_v62  ;;  %v2987_v62 = vand.u32 2147483648, %v7822_v53  ;;  %v5633_v51 = vld [vmem:[%s6336_s27 + $0x10c] sm:$0xf] }
 0x392   : > { %4008 = vmatpush.bf16.msrb.mxu2 %v5194_v33  ;;  %v2950_v17 = vadd.f32 %v7843_v43, %v2949_v6  ;;  %3958 = vmatpush.bf16.msrb.mxu1 %v5334_v50 }
 0x393   : > { %v3232_v25 = vmul.f32 %v7412_v35, %v3104_v21  ;;  %vm2956_vm6 = vcmp.eq.f32.partialorder %v2955_v3, 8.507059e+37  ;;  %v5317_v21 = vld [vmem:[%s6336_s27 + $0x108] sm:$0xf] }
 0x394   : > { %v2381_v9 = vpop.f32.mrf.mxu2  ;;  %3910 = vmatpush.bf16.msrb.mxu0 %v5190_v7  ;;  %v2954_v24 = vsel %vm7927_vm3, %v7843_v43, %v2950_v17  ;;  %v2988_v7 = vor.u32 1.1754944e-38, %v2987_v62  ;;  %v3015_v62 = vand.u32 2147483647, %v7890_v14 }
 0x395   : > { %v2382_v44 = vadd.f32 %v2381_v9, %v2333_v26  ;;  %v2430_v63 = vpop.f32.mrf.mxu3  ;;  %v2286_v41 = vpop.f32.mrf.mxu0  ;;  %v2980_v26 = vadd.f32 %v7852_v60, %v2979_v1 }
 0x396   : > { %v2335_v5 = vpop.f32.mrf.mxu1  ;;  %v7914_v22 = vpop.eup %5851  ;;  %vm3016_vm14 = vcmp.eq.f32.partialorder %v3015_v62, 8.507059e+37 }
 0x397   : > { %v2431_v30 = vadd.f32 %v2430_v63, %v2382_v44  ;;  %v2336_v57 = vadd.f32 %v2335_v5, %v2286_v41  ;;  %v7923_v54 = vpop.eup %5853  ;;  %v3007_v28 = vmul.f32 %v7914_v22, %v7890_v14  ;;  %v2958_v44 = vor.u32 1.1754944e-38, %v2957_v49 }
 0x398   : > { %3745 = vmatmul.bf16.gmra.mxu0 %v7484_v32  ;;  %v5322_v63 = vor.u32 %v5633_v51, %v5319_v18  ;;  %v2984_v53 = vsel %vm2983_vm5, %v7852_v60, %v2980_v26  ;;  %v3037_v43 = vmul.f32 %v7923_v54, %v7892_v56  ;;  %vm3012_vm8 = vweird.f32 %v7914_v22 }
 0x399   : > { %v3106_v10 = vmul.f32 %v3074_v39, %v2431_v30  ;;  %3843 = vmatmul.bf16.gmra.mxu2 %v7484_v32  ;;  %v2959_v41 = vsel %vm2956_vm6, %v2958_v44, %v2954_v24  ;;  %v3008_v38 = vsub.f32 1.0, %v3007_v28  ;;  %v2989_v39 = vsel %vm2986_vm7, %v2988_v7, %v2984_v53  ;;  %v5635_v30 = vld [vmem:[%s6336_s27 + $0x114] sm:$0xf0]  ;;  %vm3013_vm11 = vmor %vm3011_vm9, %vm3012_vm8 }
 0x39a   : > { %4057 = vmatpush.bf16.msrb.mxu3 %v5322_v63  ;;  %v3076_v1 = vmul.f32 %v2959_v41, %v8237_v0  ;;  %v3078_v34 = vmul.f32 %v2989_v39, %v8238_v31  ;;  %vm3042_vm10 = vweird.f32 %v7923_v54 }
 0x39b   : > { %v3234_v2 = vmul.f32 %v7415_v37, %v3106_v10  ;;  %v3038_v10 = vsub.f32 1.0, %v3037_v43  ;;  %v3009_v13 = vmul.f32 %v7914_v22, %v3008_v38  ;;  %vm3043_vm13 = vmor %vm3041_vm12, %vm3042_vm10 }
 0x39c   : > { %v2384_v61 = vpop.f32.mrf.mxu2 }
 0x39d   : > { %v2433_v35 = vpop.f32.mrf.mxu3  ;;  %v2288_v37 = vpop.f32.mrf.mxu0  ;;  %v7921_v8 = vpack.c.bf16 %v3234_v2, %v3232_v25  ;;  %v2385_v16 = vadd.f32 %v2384_v61, %v2336_v57  ;;  %v5318_v2 = vor.u32 %v5635_v30, %v5317_v21  ;;  %v3039_v50 = vmul.f32 %v7923_v54, %v3038_v10 }
 0x39e   : > { %v2337_v9 = vpop.f32.mrf.mxu1  ;;  %v3010_v0 = vadd.f32 %v7914_v22, %v3009_v13 }
 0x39f   : > { %3789 = vmatmul.bf16.gmra.mxu1 %v7921_v8  ;;  %3887 = vmatmul.bf16.gmra.mxu3 %v7921_v8  ;;  %v2434_v5 = vadd.f32 %v2433_v35, %v2385_v16  ;;  %v2338_v33 = vadd.f32 %v2337_v9, %v2288_v37  ;;  %v3017_v37 = vand.u32 2147483648, %v7890_v14  ;;  %v3040_v9 = vadd.f32 %v7923_v54, %v3039_v50 }
 0x3a0   : > { %3959 = vmatpush.bf16.msrb.mxu1 %v5318_v2  ;;  %v3045_v16 = vand.u32 2147483647, %v7892_v56 }
 0x3a1   : > { %v3108_v49 = vmul.f32 %v3076_v1, %v2434_v5  ;;  %v3018_v14 = vor.u32 1.1754944e-38, %v3017_v37  ;;  %v3044_v44 = vsel %vm3043_vm13, %v7923_v54, %v3040_v9 }
 0x3a2   : > { %vm3046_vm15 = vcmp.eq.f32.partialorder %v3045_v16, 8.507059e+37  ;;  %v3252_v16 = vld [vmem:[#allocation2 + $0x110] sm:$0xff] }
 0x3a3   : > { %v3236_v26 = vmul.f32 %v7462_v40, %v3108_v49  ;;  %v3047_v40 = vand.u32 2147483648, %v7892_v56 }
 0x3a4   : > { %v2386_v6 = vpop.f32.mrf.mxu2 }
 0x3a5   : > { %v2387_v17 = vadd.f32 %v2386_v6, %v2338_v33  ;;  %v2435_v25 = vpop.f32.mrf.mxu3  ;;  %v2291_v60 = vpop.f32.mrf.mxu0  ;;  %v3048_v53 = vor.u32 1.1754944e-38, %v3047_v40 }
 0x3a6   : > { %v2340_v57 = vpop.f32.mrf.mxu1 }
 0x3a7   : > { %v2436_v61 = vadd.f32 %v2435_v25, %v2387_v17  ;;  %v2341_v35 = vadd.f32 %v2340_v57, %v2291_v60  ;;  %v3049_v41 = vsel %vm3046_vm15, %v3048_v53, %v3044_v44  ;;  %v3243_v60 = vld [vmem:[#allocation2 + $0xb0] sm:$0xff] }
 0x3a8   : > { %3750 = vmatmul.bf16.gmra.mxu0 %v7537_v48  ;;  %v3082_v39 = vmul.f32 %v3049_v41, %v8244_v4  ;;  %v3256_v41 = vld [vmem:[#allocation2 + $0x150] sm:$0xff] }
 0x3a9   : > { %v3110_v3 = vmul.f32 %v3078_v34, %v2436_v61  ;;  %3848 = vmatmul.bf16.gmra.mxu2 %v7537_v48  ;;  %v3244_v34 = vld [vmem:[#allocation2 + $0x1b0] sm:$0xff] }
 0x3aa   : > { %v3247_v61 = vld [vmem:[#allocation2 + $0x50] sm:$0xff] }
 0x3ab   : > { %v3238_v31 = vmul.f32 %v7465_v20, %v3110_v3  ;;  %v3014_v20 = vsel %vm3013_vm11, %v7914_v22, %v3010_v0 }
 0x3ac   : > { %v2389_v19 = vpop.f32.mrf.mxu2  ;;  %v3019_v63 = vsel %vm3016_vm14, %v3018_v14, %v3014_v20 }
 0x3ad   : > { %v2438_v24 = vpop.f32.mrf.mxu3  ;;  %v2293_v58 = vpop.f32.mrf.mxu0  ;;  %v7965_v28 = vpack.c.bf16 %v3238_v31, %v3236_v26  ;;  %v2390_v51 = vadd.f32 %v2389_v19, %v2341_v35  ;;  %v3080_v56 = vmul.f32 %v3019_v63, %v8243_v42  ;;  %v3248_v35 = vld [vmem:[#allocation2 + $0x168] sm:$0xff]  ;;  %v3251_v19 = vld [vmem:[#allocation2 + $0x180] sm:$0xff] }
 0x3ae   : > { %v2342_v18 = vpop.f32.mrf.mxu1 }
 0x3af   : > { %3794 = vmatmul.bf16.gmra.mxu1 %v7965_v28  ;;  %3892 = vmatmul.bf16.gmra.mxu3 %v7965_v28  ;;  %v2439_v43 = vadd.f32 %v2438_v24, %v2390_v51  ;;  %v2343_v22 = vadd.f32 %v2342_v18, %v2293_v58 }
 0x3b1   : > { %v3112_v6 = vmul.f32 %v3080_v56, %v2439_v43  ;;  %v3259_v56 = vld [vmem:[#allocation2 + $0xe0] sm:$0xff] }
 0x3b3   : > { %v3240_v54 = vmul.f32 %v7512_v27, %v3112_v6 }
 0x3b4   : > { %v2391_v7 = vpop.f32.mrf.mxu2 }
 0x3b5   : > { %v2392_v38 = vadd.f32 %v2391_v7, %v2343_v22  ;;  %v3716_v5 = vpop.f32.mrf.mxu0  ;;  %v2440_v33 = vpop.f32.mrf.mxu3 }
 0x3b7   : > { %v2441_v21 = vadd.f32 %v2440_v33, %v2392_v38 }
 0x3b8   : > { %3911 = vmatmul.bf16.vlgmr.msrb.gmra.mxu0 %v7088_v55 }
 0x3b9   : > { %v3114_v30 = vmul.f32 %v3082_v39, %v2441_v21  ;;  %4009 = vmatmul.bf16.vlgmr.msrb.gmra.mxu2 %v7088_v55 }
 0x3bb   : > { %v3242_v1 = vmul.f32 %v7515_v45, %v3114_v30  ;;  %v3260_v30 = vld [vmem:[#allocation2 + $0x188] sm:$0xff] }
 0x3bc   : > { %v3814_v10 = vpop.f32.mrf.mxu2 }
 0x3bd   : > { %v3718_v17 = vpop.f32.mrf.mxu0  ;;  %v7980_v25 = vpack.c.bf16 %v3242_v1, %v3240_v54 }
 0x3bf   : > { %3799 = vmatmul.bf16.gmra.mxu1 %v7980_v25  ;;  %3897 = vmatmul.bf16.gmra.mxu3 %v7980_v25 }
 0x3c4   : > { %v3816_v42 = vpop.f32.mrf.mxu2 }
 0x3c5   : > { %v3721_v4 = vpop.f32.mrf.mxu0 }
 0x3c8   : > { %3916 = vmatmul.bf16.gmra.mxu0 %v7156_v52 }
 0x3c9   : > { %4014 = vmatmul.bf16.gmra.mxu2 %v7156_v52 }
 0x3cc   : > { %v3765_v55 = vpop.f32.mrf.mxu1  ;;  %v3819_v2 = vpop.f32.mrf.mxu2 }
 0x3cd   : > { %v3766_v27 = vadd.f32 %v3765_v55, %v3716_v5  ;;  %v3723_v57 = vpop.f32.mrf.mxu0 }
 0x3cf   : > { %v4099_v45 = vadd.f32 %v3766_v27, %v3243_v60  ;;  %3960 = vmatmul.bf16.vlgmr.msrb.gmra.mxu1 %v7594_v47  ;;  %4058 = vmatmul.bf16.vlgmr.msrb.gmra.mxu3 %v7594_v47 }
 0x3d1   : > { %4163 = vst [vmem:[#allocation2 + $0xb0] sm:$0xff] %v4099_v45 }
 0x3d2   : > { %v3863_v13 = vpop.f32.mrf.mxu3 }
 0x3d3   : > { %v3864_v49 = vadd.f32 %v3863_v13, %v3814_v10 }
 0x3d4   : > { %v3767_v50 = vpop.f32.mrf.mxu1  ;;  %v3821_v3 = vpop.f32.mrf.mxu2 }
 0x3d5   : > { %v4100_v0 = vadd.f32 %v3864_v49, %v3244_v34  ;;  %v3768_v26 = vadd.f32 %v3767_v50, %v3718_v17  ;;  %v3726_v52 = vpop.f32.mrf.mxu0 }
 0x3d7   : > { %4164 = vst [vmem:[#allocation2 + $0x1b0] sm:$0xff] %v4100_v0  ;;  %v4103_v31 = vadd.f32 %v3768_v26, %v3247_v61 }
 0x3d8   : > { %3921 = vmatmul.bf16.gmra.mxu0 %v7226_v12 }
 0x3d9   : > { %4167 = vst [vmem:[#allocation2 + $0x50] sm:$0xff] %v4103_v31  ;;  %4019 = vmatmul.bf16.gmra.mxu2 %v7226_v12  ;;  %v3255_v12 = vld [vmem:[#allocation2 + $0x120] sm:$0xff] }
 0x3da   : > { %v3865_v37 = vpop.f32.mrf.mxu3 }
 0x3db   : > { %v3866_v47 = vadd.f32 %v3865_v37, %v3816_v42 }
 0x3dc   : > { %v3770_v62 = vpop.f32.mrf.mxu1  ;;  %v3824_v9 = vpop.f32.mrf.mxu2 }
 0x3dd   : > { %v4104_v24 = vadd.f32 %v3866_v47, %v3248_v35  ;;  %v3771_v58 = vadd.f32 %v3770_v62, %v3721_v4  ;;  %v3728_v40 = vpop.f32.mrf.mxu0  ;;  %v3272_v62 = vld [vmem:[#allocation2] sm:$0xff] }
 0x3df   : > { %4168 = vst [vmem:[#allocation2 + $0x168] sm:$0xff] %v4104_v24  ;;  %v4107_v20 = vadd.f32 %v3771_v58, %v3251_v19  ;;  %3965 = vmatmul.bf16.gmra.mxu1 %v7668_v11  ;;  %4063 = vmatmul.bf16.gmra.mxu3 %v7668_v11  ;;  %v3275_v24 = vld [vmem:[#allocation2 + $0x148] sm:$0xff] }
 0x3e1   : > { %4171 = vst [vmem:[#allocation2 + $0x180] sm:$0xff] %v4107_v20 }
 0x3e2   : > { %v3868_v51 = vpop.f32.mrf.mxu3 }
 0x3e3   : > { %v3869_v14 = vadd.f32 %v3868_v51, %v3819_v2  ;;  %v3264_v2 = vld [vmem:[#allocation2 + $0x1a8] sm:$0xff] }
 0x3e4   : > { %v3772_v18 = vpop.f32.mrf.mxu1  ;;  %v3826_v44 = vpop.f32.mrf.mxu2 }
 0x3e5   : > { %v4108_v63 = vadd.f32 %v3869_v14, %v3252_v16  ;;  %v3773_v53 = vadd.f32 %v3772_v18, %v3723_v57  ;;  %v3731_v43 = vpop.f32.mrf.mxu0  ;;  %v3267_v57 = vld [vmem:[#allocation2 + $0x1e8] sm:$0xff] }
 0x3e7   : > { %4172 = vst [vmem:[#allocation2 + $0x110] sm:$0xff] %v4108_v63  ;;  %v4111_v22 = vadd.f32 %v3773_v53, %v3255_v12  ;;  %v3276_v12 = vld [vmem:[#allocation2 + $0x1d0] sm:$0xff] }
 0x3e8   : > { %3926 = vmatmul.bf16.gmra.mxu0 %v7290_v36 }
 0x3e9   : > { %4175 = vst [vmem:[#allocation2 + $0x120] sm:$0xff] %v4111_v22  ;;  %4024 = vmatmul.bf16.gmra.mxu2 %v7290_v36  ;;  %v3263_v36 = vld [vmem:[#allocation2 + $0x80] sm:$0xff] }
 0x3ea   : > { %v3870_v7 = vpop.f32.mrf.mxu3 }
 0x3eb   : > { %v3871_v11 = vadd.f32 %v3870_v7, %v3821_v3  ;;  %v3268_v3 = vld [vmem:[#allocation2 + $0xf8] sm:$0xff] }
 0x3ec   : > { %v3775_v38 = vpop.f32.mrf.mxu1  ;;  %v3829_v5 = vpop.f32.mrf.mxu2 }
 0x3ed   : > { %v4112_v33 = vadd.f32 %v3871_v11, %v3256_v41  ;;  %v3776_v39 = vadd.f32 %v3775_v38, %v3726_v52  ;;  %v3733_v6 = vpop.f32.mrf.mxu0  ;;  %v3280_v11 = vld [vmem:[#allocation2 + $0x1f8] sm:$0xff]  ;;  %v3283_v38 = vld [vmem:[#allocation2 + $0x1a0] sm:$0xff] }
 0x3ef   : > { %4176 = vst [vmem:[#allocation2 + $0x150] sm:$0xff] %v4112_v33  ;;  %v4115_v21 = vadd.f32 %v3776_v39, %v3259_v56  ;;  %3970 = vmatmul.bf16.gmra.mxu1 %v7732_v29  ;;  %4068 = vmatmul.bf16.gmra.mxu3 %v7732_v29 }
 0x3f1   : > { %4179 = vst [vmem:[#allocation2 + $0xe0] sm:$0xff] %v4115_v21 }
 0x3f2   : > { %v3873_v54 = vpop.f32.mrf.mxu3 }
 0x3f3   : > { %v3874_v1 = vadd.f32 %v3873_v54, %v3824_v9  ;;  %v3284_v54 = vld [vmem:[#allocation2 + $0x1f0] sm:$0xff] }
 0x3f4   : > { %v3777_v10 = vpop.f32.mrf.mxu1  ;;  %v3831_v17 = vpop.f32.mrf.mxu2 }
 0x3f5   : > { %v4116_v42 = vadd.f32 %v3874_v1, %v3260_v30  ;;  %v3778_v4 = vadd.f32 %v3777_v10, %v3728_v40  ;;  %v3736_v60 = vpop.f32.mrf.mxu0 }
 0x3f7   : > { %4180 = vst [vmem:[#allocation2 + $0x188] sm:$0xff] %v4116_v42  ;;  %v4119_v55 = vadd.f32 %v3778_v4, %v3263_v36 }
 0x3f8   : > { %3931 = vmatmul.bf16.gmra.mxu0 %v7357_v59 }
 0x3f9   : > { %4183 = vst [vmem:[#allocation2 + $0x80] sm:$0xff] %v4119_v55  ;;  %4029 = vmatmul.bf16.gmra.mxu2 %v7357_v59  ;;  %v3271_v59 = vld [vmem:[#allocation2 + $0x1e0] sm:$0xff] }
 0x3fa   : > { %v3875_v27 = vpop.f32.mrf.mxu3 }
 0x3fb   : > { %v3876_v29 = vadd.f32 %v3875_v27, %v3826_v44 }
 0x3fc   : > { %v3780_v45 = vpop.f32.mrf.mxu1  ;;  %v3834_v34 = vpop.f32.mrf.mxu2 }
 0x3fd   : > { %v4120_v13 = vadd.f32 %v3876_v29, %v3264_v2  ;;  %v3781_v49 = vadd.f32 %v3780_v45, %v3731_v43  ;;  %v3738_v61 = vpop.f32.mrf.mxu0  ;;  %v3288_v2 = vld [vmem:[#allocation2 + $0x90] sm:$0xff]  ;;  %v3291_v29 = vld [vmem:[#allocation2 + $0xb8] sm:$0xff] }
 0x3ff   : > { %4184 = vst [vmem:[#allocation2 + $0x1a8] sm:$0xff] %v4120_v13  ;;  %v4123_v50 = vadd.f32 %v3781_v49, %v3267_v57  ;;  %3975 = vmatmul.bf16.gmra.mxu1 %v7791_v23  ;;  %4073 = vmatmul.bf16.gmra.mxu3 %v7791_v23 }
 0x401   : > { %4187 = vst [vmem:[#allocation2 + $0x1e8] sm:$0xff] %v4123_v50  ;;  %v3292_v50 = vld [vmem:[#allocation2 + $0x88] sm:$0xff] }
 0x402   : > { %v3878_v0 = vpop.f32.mrf.mxu3 }
 0x403   : > { %v3879_v26 = vadd.f32 %v3878_v0, %v3829_v5 }
 0x404   : > { %v3782_v52 = vpop.f32.mrf.mxu1  ;;  %v3836_v31 = vpop.f32.mrf.mxu2 }
 0x405   : > { %v4124_v35 = vadd.f32 %v3879_v26, %v3268_v3  ;;  %v3783_v37 = vadd.f32 %v3782_v52, %v3733_v6  ;;  %v3741_v47 = vpop.f32.mrf.mxu0 }
 0x407   : > { %4188 = vst [vmem:[#allocation2 + $0xf8] sm:$0xff] %v4124_v35  ;;  %v4127_v19 = vadd.f32 %v3783_v37, %v3271_v59 }
 0x408   : > { %3936 = vmatmul.bf16.gmra.mxu0 %v7428_v46 }
 0x409   : > { %4191 = vst [vmem:[#allocation2 + $0x1e0] sm:$0xff] %v4127_v19  ;;  %4034 = vmatmul.bf16.gmra.mxu2 %v7428_v46  ;;  %v3279_v46 = vld [vmem:[#allocation2 + $0x40] sm:$0xff] }
 0x40a   : > { %v3880_v9 = vpop.f32.mrf.mxu3 }
 0x40b   : > { %v3881_v23 = vadd.f32 %v3880_v9, %v3831_v17  ;;  %v3299_v9 = vld [vmem:[#allocation2 + $0x198] sm:$0xff] }
 0x40c   : > { %v3785_v58 = vpop.f32.mrf.mxu1  ;;  %v3839_v40 = vpop.f32.mrf.mxu2 }
 0x40d   : > { %v4128_v20 = vadd.f32 %v3881_v23, %v3272_v62  ;;  %v3786_v16 = vadd.f32 %v3785_v58, %v3736_v60  ;;  %v3743_v51 = vpop.f32.mrf.mxu0 }
 0x40f   : > { %4192 = vst [vmem:[#allocation2] sm:$0xff] %v4128_v20  ;;  %v4131_v14 = vadd.f32 %v3786_v16, %v3275_v24  ;;  %3980 = vmatmul.bf16.gmra.mxu1 %v7850_v15  ;;  %4078 = vmatmul.bf16.gmra.mxu3 %v7850_v15  ;;  %v3300_v16 = vld [vmem:[#allocation2 + $0x38] sm:$0xff] }
 0x411   : > { %4195 = vst [vmem:[#allocation2 + $0x148] sm:$0xff] %v4131_v14 }
 0x412   : > { %v3883_v18 = vpop.f32.mrf.mxu3 }
 0x413   : > { %v3884_v44 = vadd.f32 %v3883_v18, %v3834_v34 }
 0x414   : > { %v3787_v63 = vpop.f32.mrf.mxu1  ;;  %v3841_v53 = vpop.f32.mrf.mxu2 }
 0x415   : > { %v4132_v43 = vadd.f32 %v3884_v44, %v3276_v12  ;;  %v3788_v22 = vadd.f32 %v3787_v63, %v3738_v61  ;;  %v3746_v41 = vpop.f32.mrf.mxu0  ;;  %v3303_v12 = vld [vmem:[#allocation2 + $0x158] sm:$0xff] }
 0x417   : > { %4196 = vst [vmem:[#allocation2 + $0x1d0] sm:$0xff] %v4132_v43  ;;  %v4135_v7 = vadd.f32 %v3788_v22, %v3279_v46  ;;  %v3304_v22 = vld [vmem:[#allocation2 + $0x10] sm:$0xff] }
 0x418   : > { %3941 = vmatmul.bf16.gmra.mxu0 %v7484_v32 }
 0x419   : > { %4199 = vst [vmem:[#allocation2 + $0x40] sm:$0xff] %v4135_v7  ;;  %4039 = vmatmul.bf16.gmra.mxu2 %v7484_v32  ;;  %v3287_v32 = vld [vmem:[#allocation2 + $0x70] sm:$0xff] }
 0x41a   : > { %v3885_v56 = vpop.f32.mrf.mxu3 }
 0x41b   : > { %v3886_v15 = vadd.f32 %v3885_v56, %v3836_v31 }
 0x41c   : > { %v3790_v5 = vpop.f32.mrf.mxu1  ;;  %v3844_v33 = vpop.f32.mrf.mxu2 }
 0x41d   : > { %v4136_v39 = vadd.f32 %v3886_v15, %v3280_v11  ;;  %v3791_v6 = vadd.f32 %v3790_v5, %v3741_v47  ;;  %v3748_v21 = vpop.f32.mrf.mxu0  ;;  %v3296_v47 = vld [vmem:[#allocation2 + $0x178] sm:$0xff] }
 0x41e   : > { %v3245_v11 = vld [vmem:[#allocation2 + $0xd8] sm:$0xff] }
 0x41f   : > { %4200 = vst [vmem:[#allocation2 + $0x1f8] sm:$0xff] %v4136_v39  ;;  %v4139_v30 = vadd.f32 %v3791_v6, %v3283_v38  ;;  %3985 = vmatmul.bf16.gmra.mxu1 %v7921_v8  ;;  %4083 = vmatmul.bf16.gmra.mxu3 %v7921_v8  ;;  %v3246_v39 = vld [vmem:[#allocation2 + $0x18] sm:$0xff] }
 0x421   : > { %4203 = vst [vmem:[#allocation2 + $0x1a0] sm:$0xff] %v4139_v30  ;;  %v3249_v30 = vld [vmem:[#allocation2 + $0x130] sm:$0xff] }
 0x422   : > { %v3888_v1 = vpop.f32.mrf.mxu3 }
 0x423   : > { %v3889_v36 = vadd.f32 %v3888_v1, %v3839_v40 }
 0x424   : > { %v3792_v10 = vpop.f32.mrf.mxu1  ;;  %v3846_v17 = vpop.f32.mrf.mxu2 }
 0x425   : > { %v4140_v42 = vadd.f32 %v3889_v36, %v3284_v54  ;;  %v3793_v4 = vadd.f32 %v3792_v10, %v3743_v51  ;;  %v3751_v60 = vpop.f32.mrf.mxu0 }
 0x427   : > { %4204 = vst [vmem:[#allocation2 + $0x1f0] sm:$0xff] %v4140_v42  ;;  %v4143_v55 = vadd.f32 %v3793_v4, %v3287_v32  ;;  %v3250_v42 = vld [vmem:[#allocation2 + $0x48] sm:$0xff] }
 0x428   : > { %3946 = vmatmul.bf16.gmra.mxu0 %v7537_v48 }
 0x429   : > { %4207 = vst [vmem:[#allocation2 + $0x70] sm:$0xff] %v4143_v55  ;;  %4044 = vmatmul.bf16.gmra.mxu2 %v7537_v48  ;;  %v3295_v48 = vld [vmem:[#allocation2 + $0x170] sm:$0xff]  ;;  %v3253_v55 = vld [vmem:[#allocation2 + $0x118] sm:$0xff] }
 0x42a   : > { %v3890_v27 = vpop.f32.mrf.mxu3 }
 0x42b   : > { %v3891_v8 = vadd.f32 %v3890_v27, %v3841_v53 }
 0x42c   : > { %v3795_v57 = vpop.f32.mrf.mxu1  ;;  %v3849_v45 = vpop.f32.mrf.mxu2 }
 0x42d   : > { %v4144_v34 = vadd.f32 %v3891_v8, %v3288_v2  ;;  %v3796_v13 = vadd.f32 %v3795_v57, %v3746_v41  ;;  %v3753_v49 = vpop.f32.mrf.mxu0 }
 0x42f   : > { %4208 = vst [vmem:[#allocation2 + $0x90] sm:$0xff] %v4144_v34  ;;  %v4147_v61 = vadd.f32 %v3796_v13, %v3291_v29  ;;  %3990 = vmatmul.bf16.gmra.mxu1 %v7965_v28  ;;  %4088 = vmatmul.bf16.gmra.mxu3 %v7965_v28  ;;  %v3254_v34 = vld [vmem:[#allocation2 + $0x98] sm:$0xff] }
 0x431   : > { %4211 = vst [vmem:[#allocation2 + $0xb8] sm:$0xff] %v4147_v61  ;;  %v3257_v61 = vld [vmem:[#allocation2 + $0x108] sm:$0xff] }
 0x432   : > { %v3893_v3 = vpop.f32.mrf.mxu3 }
 0x433   : > { %v3894_v0 = vadd.f32 %v3893_v3, %v3844_v33 }
 0x434   : > { %v3797_v26 = vpop.f32.mrf.mxu1  ;;  %v3851_v59 = vpop.f32.mrf.mxu2 }
 0x435   : > { %v4148_v52 = vadd.f32 %v3894_v0, %v3292_v50  ;;  %v3798_v31 = vadd.f32 %v3797_v26, %v3748_v21  ;;  %v3912_v35 = vpop.f32.mrf.mxu0 }
 0x437   : > { %4212 = vst [vmem:[#allocation2 + $0x88] sm:$0xff] %v4148_v52  ;;  %v4151_v37 = vadd.f32 %v3798_v31, %v3295_v48  ;;  %v3258_v52 = vld [vmem:[#allocation2 + $0x60] sm:$0xff] }
 0x439   : > { %4215 = vst [vmem:[#allocation2 + $0x170] sm:$0xff] %v4151_v37  ;;  %v3261_v37 = vld [vmem:[#allocation2 + $0x138] sm:$0xff] }
 0x43a   : > { %v3895_v19 = vpop.f32.mrf.mxu3 }
 0x43b   : > { %v3896_v62 = vadd.f32 %v3895_v19, %v3846_v17 }
 0x43c   : > { %v3800_v23 = vpop.f32.mrf.mxu1  ;;  %v4010_v24 = vpop.f32.mrf.mxu2 }
 0x43d   : > { %v4152_v28 = vadd.f32 %v3896_v62, %v3296_v47  ;;  %v3801_v58 = vadd.f32 %v3800_v23, %v3751_v60  ;;  %v3914_v40 = vpop.f32.mrf.mxu0 }
 0x43f   : > { %4216 = vst [vmem:[#allocation2 + $0x178] sm:$0xff] %v4152_v28  ;;  %v4155_v20 = vadd.f32 %v3801_v58, %v3299_v9  ;;  %3995 = vmatmul.bf16.gmra.mxu1 %v7980_v25  ;;  %4093 = vmatmul.bf16.gmra.mxu3 %v7980_v25 }
 0x441   : > { %4219 = vst [vmem:[#allocation2 + $0x198] sm:$0xff] %v4155_v20  ;;  %v3265_v20 = vld [vmem:[#allocation2 + $0x1b8] sm:$0xff] }
 0x442   : > { %v3898_v51 = vpop.f32.mrf.mxu3 }
 0x443   : > { %v3899_v14 = vadd.f32 %v3898_v51, %v3849_v45 }
 0x444   : > { %v3802_v18 = vpop.f32.mrf.mxu1  ;;  %v4012_v44 = vpop.f32.mrf.mxu2 }
 0x445   : > { %v4156_v46 = vadd.f32 %v3899_v14, %v3300_v16  ;;  %v3803_v63 = vadd.f32 %v3802_v18, %v3753_v49  ;;  %v3917_v53 = vpop.f32.mrf.mxu0 }
 0x447   : > { %4220 = vst [vmem:[#allocation2 + $0x38] sm:$0xff] %v4156_v46  ;;  %v4159_v43 = vadd.f32 %v3803_v63, %v3303_v12 }
 0x449   : > { %4223 = vst [vmem:[#allocation2 + $0x158] sm:$0xff] %v4159_v43 }
 0x44a   : > { %v3900_v41 = vpop.f32.mrf.mxu3 }
 0x44b   : > { %v3901_v7 = vadd.f32 %v3900_v41, %v3851_v59 }
 0x44c   : > { %v3961_v56 = vpop.f32.mrf.mxu1  ;;  %v4015_v15 = vpop.f32.mrf.mxu2 }
 0x44d   : > { %v4160_v25 = vadd.f32 %v3901_v7, %v3304_v22  ;;  %v3962_v38 = vadd.f32 %v3961_v56, %v3912_v35  ;;  %v3919_v5 = vpop.f32.mrf.mxu0  ;;  %v3270_v56 = vld [vmem:[#allocation2 + $0x30] sm:$0xff] }
 0x44f   : > { %4224 = vst [vmem:[#allocation2 + $0x10] sm:$0xff] %v4160_v25  ;;  %v4101_v33 = vadd.f32 %v3962_v38, %v3245_v11 }
 0x451   : > { %4165 = vst [vmem:[#allocation2 + $0xd8] sm:$0xff] %v4101_v33 }
 0x452   : > { %v4059_v6 = vpop.f32.mrf.mxu3 }
 0x453   : > { %v4060_v21 = vadd.f32 %v4059_v6, %v4010_v24  ;;  %v3262_v24 = vld [vmem:[#allocation2 + $0x140] sm:$0xff] }
 0x454   : > { %v3963_v54 = vpop.f32.mrf.mxu1  ;;  %v4017_v1 = vpop.f32.mrf.mxu2 }
 0x455   : > { %v4102_v36 = vadd.f32 %v4060_v21, %v3246_v39  ;;  %v3964_v32 = vadd.f32 %v3963_v54, %v3914_v40  ;;  %v3922_v10 = vpop.f32.mrf.mxu0  ;;  %v3274_v54 = vld [vmem:[#allocation2 + $0x8] sm:$0xff] }
 0x457   : > { %4166 = vst [vmem:[#allocation2 + $0x18] sm:$0xff] %v4102_v36  ;;  %v4105_v17 = vadd.f32 %v3964_v32, %v3249_v30  ;;  %v3277_v32 = vld [vmem:[#allocation2 + $0x100] sm:$0xff] }
 0x459   : > { %4169 = vst [vmem:[#allocation2 + $0x130] sm:$0xff] %v4105_v17 }
 0x45a   : > { %v4061_v4 = vpop.f32.mrf.mxu3 }
 0x45b   : > { %v4062_v60 = vadd.f32 %v4061_v4, %v4012_v44  ;;  %v3266_v44 = vld [vmem:[#allocation2 + $0x28] sm:$0xff] }
 0x45c   : > { %v3966_v2 = vpop.f32.mrf.mxu1  ;;  %v4020_v27 = vpop.f32.mrf.mxu2 }
 0x45d   : > { %v4106_v8 = vadd.f32 %v4062_v60, %v3250_v42  ;;  %v3967_v29 = vadd.f32 %v3966_v2, %v3917_v53  ;;  %v3924_v45 = vpop.f32.mrf.mxu0  ;;  %v3269_v53 = vld [vmem:[#allocation2 + $0x160] sm:$0xff]  ;;  %v3278_v2 = vld [vmem:[#allocation2 + $0xc8] sm:$0xff] }
 0x45f   : > { %4170 = vst [vmem:[#allocation2 + $0x48] sm:$0xff] %v4106_v8  ;;  %v4109_v57 = vadd.f32 %v3967_v29, %v3253_v55  ;;  %v3281_v29 = vld [vmem:[#allocation2 + $0x20] sm:$0xff] }
 0x461   : > { %4173 = vst [vmem:[#allocation2 + $0x118] sm:$0xff] %v4109_v57 }
 0x462   : > { %v4064_v13 = vpop.f32.mrf.mxu3 }
 0x463   : > { %v4065_v49 = vadd.f32 %v4064_v13, %v4015_v15 }
 0x464   : > { %v3968_v50 = vpop.f32.mrf.mxu1  ;;  %v4022_v48 = vpop.f32.mrf.mxu2 }
 0x465   : > { %v4110_v3 = vadd.f32 %v4065_v49, %v3254_v34  ;;  %v3969_v0 = vadd.f32 %v3968_v50, %v3919_v5  ;;  %v3927_v59 = vpop.f32.mrf.mxu0  ;;  %v3273_v5 = vld [vmem:[#allocation2 + $0xf0] sm:$0xff] }
 0x467   : > { %4174 = vst [vmem:[#allocation2 + $0x98] sm:$0xff] %v4110_v3  ;;  %v4113_v26 = vadd.f32 %v3969_v0, %v3257_v61  ;;  %v3282_v61 = vld [vmem:[#allocation2 + $0x128] sm:$0xff] }
 0x469   : > { %4177 = vst [vmem:[#allocation2 + $0x108] sm:$0xff] %v4113_v26 }
 0x46a   : > { %v4066_v31 = vpop.f32.mrf.mxu3 }
 0x46b   : > { %v4067_v35 = vadd.f32 %v4066_v31, %v4017_v1 }
 0x46c   : > { %v3971_v47 = vpop.f32.mrf.mxu1  ;;  %v4025_v23 = vpop.f32.mrf.mxu2 }
 0x46d   : > { %v4114_v19 = vadd.f32 %v4067_v35, %v3258_v52  ;;  %v3972_v62 = vadd.f32 %v3971_v47, %v3922_v10  ;;  %v3929_v40 = vpop.f32.mrf.mxu0 }
 0x46f   : > { %4178 = vst [vmem:[#allocation2 + $0x60] sm:$0xff] %v4114_v19  ;;  %v4117_v9 = vadd.f32 %v3972_v62, %v3261_v37  ;;  %v3286_v37 = vld [vmem:[#allocation2 + $0x78] sm:$0xff] }
 0x470   : > { %v3289_v62 = vld [vmem:[#allocation2 + $0x1d8] sm:$0xff] }
 0x471   : > { %4181 = vst [vmem:[#allocation2 + $0x138] sm:$0xff] %v4117_v9 }
 0x472   : > { %v4069_v28 = vpop.f32.mrf.mxu3 }
 0x473   : > { %v4070_v58 = vadd.f32 %v4069_v28, %v4020_v27 }
 0x474   : > { %v3973_v16 = vpop.f32.mrf.mxu1  ;;  %v4027_v18 = vpop.f32.mrf.mxu2 }
 0x475   : > { %v4118_v51 = vadd.f32 %v4070_v58, %v3262_v24  ;;  %v3974_v14 = vadd.f32 %v3973_v16, %v3924_v45  ;;  %v3932_v7 = vpop.f32.mrf.mxu0 }
 0x477   : > { %4182 = vst [vmem:[#allocation2 + $0x140] sm:$0xff] %v4118_v51  ;;  %v4121_v12 = vadd.f32 %v3974_v14, %v3265_v20  ;;  %v3293_v14 = vld [vmem:[#allocation2 + $0xa8] sm:$0xff] }
 0x479   : > { %4185 = vst [vmem:[#allocation2 + $0x1b8] sm:$0xff] %v4121_v12 }
 0x47a   : > { %v4071_v46 = vpop.f32.mrf.mxu3 }
 0x47b   : > { %v4072_v63 = vadd.f32 %v4071_v46, %v4022_v48  ;;  %v3285_v48 = vld [vmem:[#allocation2 + $0xe8] sm:$0xff] }
 0x47c   : > { %v3976_v43 = vpop.f32.mrf.mxu1  ;;  %v4030_v38 = vpop.f32.mrf.mxu2 }
 0x47d   : > { %v4122_v22 = vadd.f32 %v4072_v63, %v3266_v44  ;;  %v3977_v41 = vadd.f32 %v3976_v43, %v3927_v59  ;;  %v3934_v30 = vpop.f32.mrf.mxu0 }
 0x47f   : > { %4186 = vst [vmem:[#allocation2 + $0x28] sm:$0xff] %v4122_v22  ;;  %v4125_v11 = vadd.f32 %v3977_v41, %v3269_v53  ;;  %v3294_v53 = vld [vmem:[#allocation2 + $0x1c8] sm:$0xff] }
 0x480   : > { %v3297_v41 = vld [vmem:[#allocation2 + $0x68] sm:$0xff] }
 0x481   : > { %4189 = vst [vmem:[#allocation2 + $0x160] sm:$0xff] %v4125_v11 }
 0x482   : > { %v4074_v15 = vpop.f32.mrf.mxu3 }
 0x483   : > { %v4075_v25 = vadd.f32 %v4074_v15, %v4025_v23 }
 0x484   : > { %v3978_v33 = vpop.f32.mrf.mxu1  ;;  %v4032_v4 = vpop.f32.mrf.mxu2 }
 0x485   : > { %v4126_v39 = vadd.f32 %v4075_v25, %v3270_v56  ;;  %v3979_v6 = vadd.f32 %v3978_v33, %v3929_v40  ;;  %v3937_v55 = vpop.f32.mrf.mxu0  ;;  %v3290_v40 = vld [vmem:[#allocation2 + $0xd0] sm:$0xff] }
 0x487   : > { %4190 = vst [vmem:[#allocation2 + $0x30] sm:$0xff] %v4126_v39  ;;  %v4129_v21 = vadd.f32 %v3979_v6, %v3273_v5  ;;  %v3298_v5 = vld [vmem:[#allocation2 + $0x190] sm:$0xff]  ;;  %v3301_v6 = vld [vmem:[#allocation2 + $0xc0] sm:$0xff] }
 0x489   : > { %4193 = vst [vmem:[#allocation2 + $0xf0] sm:$0xff] %v4129_v21 }
 0x48a   : > { %v4076_v1 = vpop.f32.mrf.mxu3 }
 0x48b   : > { %v4077_v36 = vadd.f32 %v4076_v1, %v4027_v18 }
 0x48c   : > { %v3981_v10 = vpop.f32.mrf.mxu1  ;;  %v4035_v49 = vpop.f32.mrf.mxu2 }
 0x48d   : > { %v4130_v17 = vadd.f32 %v4077_v36, %v3274_v54  ;;  %v3982_v42 = vadd.f32 %v3981_v10, %v3932_v7  ;;  %v3939_v0 = vpop.f32.mrf.mxu0 }
 0x48f   : > { %4194 = vst [vmem:[#allocation2 + $0x8] sm:$0xff] %v4130_v17  ;;  %v4133_v60 = vadd.f32 %v3982_v42, %v3277_v32  ;;  %v3302_v32 = vld [vmem:[#allocation2 + $0x1c0] sm:$0xff] }
 0x491   : > { %4197 = vst [vmem:[#allocation2 + $0x100] sm:$0xff] %v4133_v60 }
 0x492   : > { %v4079_v27 = vpop.f32.mrf.mxu3 }
 0x493   : > { %v4080_v8 = vadd.f32 %v4079_v27, %v4030_v38 }
 0x494   : > { %v3983_v57 = vpop.f32.mrf.mxu1  ;;  %v4037_v35 = vpop.f32.mrf.mxu2 }
 0x495   : > { %v4134_v45 = vadd.f32 %v4080_v8, %v3278_v2  ;;  %v3984_v34 = vadd.f32 %v3983_v57, %v3934_v30  ;;  %v3942_v28 = vpop.f32.mrf.mxu0 }
 0x497   : > { %4198 = vst [vmem:[#allocation2 + $0xc8] sm:$0xff] %v4134_v45  ;;  %v4137_v13 = vadd.f32 %v3984_v34, %v3281_v29  ;;  %v3306_v29 = vld [vmem:[#allocation2 + $0xa0] sm:$0xff] }
 0x499   : > { %4201 = vst [vmem:[#allocation2 + $0x20] sm:$0xff] %v4137_v13 }
 0x49a   : > { %v4081_v50 = vpop.f32.mrf.mxu3 }
 0x49b   : > { %v4082_v3 = vadd.f32 %v4081_v50, %v4032_v4  ;;  %v3305_v4 = vld [vmem:[#allocation2 + $0x58] sm:$0xff] }
 0x49c   : > { %v3986_v26 = vpop.f32.mrf.mxu1  ;;  %v4040_v51 = vpop.f32.mrf.mxu2 }
 0x49d   : > { %v4138_v59 = vadd.f32 %v4082_v3, %v3282_v61  ;;  %v3987_v52 = vadd.f32 %v3986_v26, %v3937_v55  ;;  %v3944_v63 = vpop.f32.mrf.mxu0 }
 0x49f   : > { %4202 = vst [vmem:[#allocation2 + $0x128] sm:$0xff] %v4138_v59  ;;  %v4141_v31 = vadd.f32 %v3987_v52, %v3285_v48 }
 0x4a1   : > { %4205 = vst [vmem:[#allocation2 + $0xe8] sm:$0xff] %v4141_v31 }
 0x4a2   : > { %v4084_v47 = vpop.f32.mrf.mxu3 }
 0x4a3   : > { %v4085_v19 = vadd.f32 %v4084_v47, %v4035_v49 }
 0x4a4   : > { %v3988_v9 = vpop.f32.mrf.mxu1  ;;  %v4042_v15 = vpop.f32.mrf.mxu2 }
 0x4a5   : > { %v4142_v23 = vadd.f32 %v4085_v19, %v3286_v37  ;;  %v3989_v24 = vadd.f32 %v3988_v9, %v3939_v0  ;;  %v3947_v38 = vpop.f32.mrf.mxu0 }
 0x4a7   : > { %4206 = vst [vmem:[#allocation2 + $0x78] sm:$0xff] %v4142_v23  ;;  %v4145_v58 = vadd.f32 %v3989_v24, %v3289_v62 }
 0x4a9   : > { %4209 = vst [vmem:[#allocation2 + $0x1d8] sm:$0xff] %v4145_v58 }
 0x4aa   : > { %v4086_v20 = vpop.f32.mrf.mxu3 }
 0x4ab   : > { %v4087_v16 = vadd.f32 %v4086_v20, %v4037_v35 }
 0x4ac   : > { %v3991_v12 = vpop.f32.mrf.mxu1  ;;  %v4045_v36 = vpop.f32.mrf.mxu2 }
 0x4ad   : > { %v4146_v18 = vadd.f32 %v4087_v16, %v3290_v40  ;;  %v3992_v44 = vadd.f32 %v3991_v12, %v3942_v28  ;;  %v3949_v42 = vpop.f32.mrf.mxu0 }
 0x4af   : > { %4210 = vst [vmem:[#allocation2 + $0xd0] sm:$0xff] %v4146_v18  ;;  %v4149_v46 = vadd.f32 %v3992_v44, %v3293_v14 }
 0x4b1   : > { %4213 = vst [vmem:[#allocation2 + $0xa8] sm:$0xff] %v4149_v46 }
 0x4b2   : > { %v4089_v43 = vpop.f32.mrf.mxu3 }
 0x4b3   : > { %v4090_v22 = vadd.f32 %v4089_v43, %v4040_v51 }
 0x4b4   : > { %v3993_v7 = vpop.f32.mrf.mxu1  ;;  %v4047_v8 = vpop.f32.mrf.mxu2 }
 0x4b5   : > { %v4150_v11 = vadd.f32 %v4090_v22, %v3294_v53  ;;  %v3994_v56 = vadd.f32 %v3993_v7, %v3944_v63 }
 0x4b7   : > { %4214 = vst [vmem:[#allocation2 + $0x1c8] sm:$0xff] %v4150_v11  ;;  %v4153_v25 = vadd.f32 %v3994_v56, %v3297_v41 }
 0x4b9   : > { %4217 = vst [vmem:[#allocation2 + $0x68] sm:$0xff] %v4153_v25 }
 0x4ba   : > { %v4091_v33 = vpop.f32.mrf.mxu3 }
 0x4bb   : > { %v4092_v39 = vadd.f32 %v4091_v33, %v4042_v15 }
 0x4bc   : > { %v3996_v21 = vpop.f32.mrf.mxu1 }
 0x4bd   : > { %v4154_v30 = vadd.f32 %v4092_v39, %v3298_v5  ;;  %v3997_v54 = vadd.f32 %v3996_v21, %v3947_v38 }
 0x4bf   : > { %4218 = vst [vmem:[#allocation2 + $0x190] sm:$0xff] %v4154_v30  ;;  %v4157_v1 = vadd.f32 %v3997_v54, %v3301_v6 }
 0x4c1   : > { %4221 = vst [vmem:[#allocation2 + $0xc0] sm:$0xff] %v4157_v1 }
 0x4c2   : > { %v4094_v10 = vpop.f32.mrf.mxu3 }
 0x4c3   : > { %v4095_v17 = vadd.f32 %v4094_v10, %v4045_v36 }
 0x4c4   : > { %v3998_v60 = vpop.f32.mrf.mxu1 }
 0x4c5   : > { %v4158_v55 = vadd.f32 %v4095_v17, %v3302_v32  ;;  %v3999_v2 = vadd.f32 %v3998_v60, %v3949_v42 }
 0x4c7   : > { %4222 = vst [vmem:[#allocation2 + $0x1c0] sm:$0xff] %v4158_v55  ;;  %v4161_v27 = vadd.f32 %v3999_v2, %v3305_v4 }
 0x4c9   : > { %4225 = vst [vmem:[#allocation2 + $0x58] sm:$0xff] %v4161_v27 }
 0x4ca   : > { %v4096_v57 = vpop.f32.mrf.mxu3 }
 0x4cb   : > { %v4097_v45 = vadd.f32 %v4096_v57, %v4047_v8 }
 0x4cd   : > { %v4162_v34 = vadd.f32 %v4097_v45, %v3306_v29 }
 0x4cf   : > { %4226 = vst [vmem:[#allocation2 + $0xa0] sm:$0xff] %v4162_v34 }
 0x4d0 PF: > { %p5435_p1 = scmp.ne.s32.totalorder %s5919_s7, 3 }
 0x4d2   : > { %4230 = sbr.rel (%p5435_p1) target bundleno = 1304 (0x518), region = 71 }
 0x4d7   : > { %v4231_v13 = vld [vmem:[#allocation2 + $0xb0] sm:$0xff]  ;;  %v4233_v61 = vld [vmem:[#allocation2 + $0xd8] sm:$0xff]  ;;  %v4236_v0 = vld [vmem:[#allocation2 + $0x168] sm:$0xff] }
 0x4d8   : > { %v4232_v49 = vld [vmem:[#allocation2 + $0x1b0] sm:$0xff]  ;;  %4295 = vst [vmem:[%s6330_s13] sm:$0xff] %v4231_v13  ;;  %v4234_v50 = vld [vmem:[#allocation2 + $0x18] sm:$0xff]  ;;  %v4238_v26 = vld [vmem:[#allocation2 + $0x48] sm:$0xff] }
 0x4d9   : > { %4296 = vst [vmem:[%s6330_s13 + $0x8] sm:$0xff] %v4232_v49  ;;  %v4235_v3 = vld [vmem:[#allocation2 + $0x50] sm:$0xff]  ;;  %v4239_v59 = vld [vmem:[#allocation2 + $0x180] sm:$0xff]  ;;  %v4241_v31 = vld [vmem:[#allocation2 + $0x118] sm:$0xff] }
 0x4da   : > { %4297 = vst [vmem:[%s6330_s13 + $0x10] sm:$0xff] %v4233_v61  ;;  %v4237_v48 = vld [vmem:[#allocation2 + $0x130] sm:$0xff]  ;;  %v4242_v35 = vld [vmem:[#allocation2 + $0x98] sm:$0xff]  ;;  %v4243_v37 = vld [vmem:[#allocation2 + $0x120] sm:$0xff] }
 0x4db   : > { %4298 = vst [vmem:[%s6330_s13 + $0x18] sm:$0xff] %v4234_v50  ;;  %v4240_v52 = vld [vmem:[#allocation2 + $0x110] sm:$0xff]  ;;  %v4245_v19 = vld [vmem:[#allocation2 + $0x108] sm:$0xff]  ;;  %v4246_v62 = vld [vmem:[#allocation2 + $0x60] sm:$0xff] }
 0x4dc   : > { %4299 = vst [vmem:[%s6330_s13 + $0x20] sm:$0xff] %v4235_v3  ;;  %v4244_v47 = vld [vmem:[#allocation2 + $0x150] sm:$0xff]  ;;  %v4247_v9 = vld [vmem:[#allocation2 + $0xe0] sm:$0xff]  ;;  %v4248_v23 = vld [vmem:[#allocation2 + $0x188] sm:$0xff] }
 0x4dd   : > { %4300 = vst [vmem:[%s6330_s13 + $0x28] sm:$0xff] %v4236_v0  ;;  %v4249_v24 = vld [vmem:[#allocation2 + $0x138] sm:$0xff]  ;;  %v4250_v28 = vld [vmem:[#allocation2 + $0x140] sm:$0xff]  ;;  %v4252_v40 = vld [vmem:[#allocation2 + $0x1a8] sm:$0xff] }
 0x4de   : > { %4301 = vst [vmem:[%s6330_s13 + $0x30] sm:$0xff] %v4237_v48  ;;  %v4251_v58 = vld [vmem:[#allocation2 + $0x80] sm:$0xff]  ;;  %v4253_v20 = vld [vmem:[#allocation2 + $0x1b8] sm:$0xff]  ;;  %v4254_v16 = vld [vmem:[#allocation2 + $0x28] sm:$0xff] }
 0x4df   : > { %4302 = vst [vmem:[%s6330_s13 + $0x38] sm:$0xff] %v4238_v26  ;;  %v4255_v51 = vld [vmem:[#allocation2 + $0x1e8] sm:$0xff]  ;;  %v4256_v14 = vld [vmem:[#allocation2 + $0xf8] sm:$0xff]  ;;  %v4257_v12 = vld [vmem:[#allocation2 + $0x160] sm:$0xff] }
 0x4e0   : > { %4303 = vst [vmem:[%s6330_s13 + $0x40] sm:$0xff] %v4239_v59  ;;  %v4258_v18 = vld [vmem:[#allocation2 + $0x30] sm:$0xff]  ;;  %v4259_v44 = vld [vmem:[#allocation2 + $0x1e0] sm:$0xff]  ;;  %v4262_v53 = vld [vmem:[#allocation2 + $0x8] sm:$0xff] }
 0x4e1   : > { %4304 = vst [vmem:[%s6330_s13 + $0x48] sm:$0xff] %v4240_v52  ;;  %v4260_v46 = vld [vmem:[#allocation2] sm:$0xff]  ;;  %v4261_v63 = vld [vmem:[#allocation2 + $0xf0] sm:$0xff]  ;;  %v4263_v43 = vld [vmem:[#allocation2 + $0x148] sm:$0xff] }
 0x4e2   : > { %4305 = vst [vmem:[%s6330_s13 + $0x50] sm:$0xff] %v4241_v31  ;;  %v4264_v22 = vld [vmem:[#allocation2 + $0x1d0] sm:$0xff]  ;;  %v4265_v41 = vld [vmem:[#allocation2 + $0x100] sm:$0xff]  ;;  %v4266_v7 = vld [vmem:[#allocation2 + $0xc8] sm:$0xff] }
 0x4e3   : > { %4306 = vst [vmem:[%s6330_s13 + $0x58] sm:$0xff] %v4242_v35  ;;  %v4267_v11 = vld [vmem:[#allocation2 + $0x40] sm:$0xff]  ;;  %v4268_v56 = vld [vmem:[#allocation2 + $0x1f8] sm:$0xff]  ;;  %v4270_v25 = vld [vmem:[#allocation2 + $0x128] sm:$0xff] }
 0x4e4   : > { %4307 = vst [vmem:[%s6330_s13 + $0x60] sm:$0xff] %v4243_v37  ;;  %v4269_v15 = vld [vmem:[#allocation2 + $0x20] sm:$0xff]  ;;  %v4272_v5 = vld [vmem:[#allocation2 + $0x1f0] sm:$0xff]  ;;  %v4273_v33 = vld [vmem:[#allocation2 + $0xe8] sm:$0xff] }
 0x4e5   : > { %4308 = vst [vmem:[%s6330_s13 + $0x68] sm:$0xff] %v4244_v47  ;;  %v4271_v38 = vld [vmem:[#allocation2 + $0x1a0] sm:$0xff]  ;;  %v4274_v39 = vld [vmem:[#allocation2 + $0x78] sm:$0xff]  ;;  %v4275_v6 = vld [vmem:[#allocation2 + $0x70] sm:$0xff] }
 0x4e6   : > { %4309 = vst [vmem:[%s6330_s13 + $0x70] sm:$0xff] %v4245_v19  ;;  %v4276_v21 = vld [vmem:[#allocation2 + $0x90] sm:$0xff]  ;;  %v4277_v30 = vld [vmem:[#allocation2 + $0x1d8] sm:$0xff]  ;;  %v4280_v36 = vld [vmem:[#allocation2 + $0x88] sm:$0xff] }
 0x4e7   : > { %4310 = vst [vmem:[%s6330_s13 + $0x78] sm:$0xff] %v4246_v62  ;;  %v4278_v54 = vld [vmem:[#allocation2 + $0xd0] sm:$0xff]  ;;  %v4279_v1 = vld [vmem:[#allocation2 + $0xb8] sm:$0xff]  ;;  %v4281_v32 = vld [vmem:[#allocation2 + $0xa8] sm:$0xff] }
 0x4e8   : > { %4311 = vst [vmem:[%s6330_s13 + $0x80] sm:$0xff] %v4247_v9  ;;  %v4282_v10 = vld [vmem:[#allocation2 + $0x1c8] sm:$0xff]  ;;  %v4283_v17 = vld [vmem:[#allocation2 + $0x170] sm:$0xff]  ;;  %v4284_v42 = vld [vmem:[#allocation2 + $0x178] sm:$0xff] }
 0x4e9   : > { %4312 = vst [vmem:[%s6330_s13 + $0x88] sm:$0xff] %v4248_v23  ;;  %v4285_v4 = vld [vmem:[#allocation2 + $0x68] sm:$0xff]  ;;  %v4286_v60 = vld [vmem:[#allocation2 + $0x190] sm:$0xff]  ;;  %v4287_v55 = vld [vmem:[#allocation2 + $0x198] sm:$0xff] }
 0x4ea   : > { %4313 = vst [vmem:[%s6330_s13 + $0x90] sm:$0xff] %v4249_v24  ;;  %v4288_v2 = vld [vmem:[#allocation2 + $0x38] sm:$0xff]  ;;  %v4289_v27 = vld [vmem:[#allocation2 + $0xc0] sm:$0xff]  ;;  %v4292_v57 = vld [vmem:[#allocation2 + $0x10] sm:$0xff] }
 0x4eb   : > { %4314 = vst [vmem:[%s6330_s13 + $0x98] sm:$0xff] %v4250_v28  ;;  %v4290_v8 = vld [vmem:[#allocation2 + $0x1c0] sm:$0xff]  ;;  %v4291_v29 = vld [vmem:[#allocation2 + $0x158] sm:$0xff] }
 0x4ec   : > { %4315 = vst [vmem:[%s6330_s13 + $0xa0] sm:$0xff] %v4251_v58  ;;  %v4293_v45 = vld [vmem:[#allocation2 + $0x58] sm:$0xff]  ;;  %v4294_v34 = vld [vmem:[#allocation2 + $0xa0] sm:$0xff] }
 0x4ed   : > { %4316 = vst [vmem:[%s6330_s13 + $0xa8] sm:$0xff] %v4252_v40 }
 0x4ee   : > { %4317 = vst [vmem:[%s6330_s13 + $0xb0] sm:$0xff] %v4253_v20 }
 0x4ef   : > { %4318 = vst [vmem:[%s6330_s13 + $0xb8] sm:$0xff] %v4254_v16 }
 0x4f0   : > { %4319 = vst [vmem:[%s6330_s13 + $0xc0] sm:$0xff] %v4255_v51 }
 0x4f1   : > { %4320 = vst [vmem:[%s6330_s13 + $0xc8] sm:$0xff] %v4256_v14 }
 0x4f2   : > { %4321 = vst [vmem:[%s6330_s13 + $0xd0] sm:$0xff] %v4257_v12 }
 0x4f3   : > { %4322 = vst [vmem:[%s6330_s13 + $0xd8] sm:$0xff] %v4258_v18 }
 0x4f4   : > { %4323 = vst [vmem:[%s6330_s13 + $0xe0] sm:$0xff] %v4259_v44 }
 0x4f5   : > { %4324 = vst [vmem:[%s6330_s13 + $0xe8] sm:$0xff] %v4260_v46 }
 0x4f6   : > { %4325 = vst [vmem:[%s6330_s13 + $0xf0] sm:$0xff] %v4261_v63 }
 0x4f7   : > { %4326 = vst [vmem:[%s6330_s13 + $0xf8] sm:$0xff] %v4262_v53 }
 0x4f8   : > { %4327 = vst [vmem:[%s6330_s13 + $0x100] sm:$0xff] %v4263_v43 }
 0x4f9   : > { %4328 = vst [vmem:[%s6330_s13 + $0x108] sm:$0xff] %v4264_v22 }
 0x4fa   : > { %4329 = vst [vmem:[%s6330_s13 + $0x110] sm:$0xff] %v4265_v41 }
 0x4fb   : > { %4330 = vst [vmem:[%s6330_s13 + $0x118] sm:$0xff] %v4266_v7 }
 0x4fc   : > { %4331 = vst [vmem:[%s6330_s13 + $0x120] sm:$0xff] %v4267_v11 }
 0x4fd   : > { %4332 = vst [vmem:[%s6330_s13 + $0x128] sm:$0xff] %v4268_v56 }
 0x4fe   : > { %4333 = vst [vmem:[%s6330_s13 + $0x130] sm:$0xff] %v4269_v15 }
 0x4ff   : > { %4334 = vst [vmem:[%s6330_s13 + $0x138] sm:$0xff] %v4270_v25 }
 0x500   : > { %4335 = vst [vmem:[%s6330_s13 + $0x140] sm:$0xff] %v4271_v38 }
 0x501   : > { %4336 = vst [vmem:[%s6330_s13 + $0x148] sm:$0xff] %v4272_v5 }
 0x502   : > { %4337 = vst [vmem:[%s6330_s13 + $0x150] sm:$0xff] %v4273_v33 }
 0x503   : > { %4338 = vst [vmem:[%s6330_s13 + $0x158] sm:$0xff] %v4274_v39 }
 0x504   : > { %4339 = vst [vmem:[%s6330_s13 + $0x160] sm:$0xff] %v4275_v6 }
 0x505   : > { %4340 = vst [vmem:[%s6330_s13 + $0x168] sm:$0xff] %v4276_v21 }
 0x506   : > { %4341 = vst [vmem:[%s6330_s13 + $0x170] sm:$0xff] %v4277_v30 }
 0x507   : > { %4342 = vst [vmem:[%s6330_s13 + $0x178] sm:$0xff] %v4278_v54 }
 0x508   : > { %4343 = vst [vmem:[%s6330_s13 + $0x180] sm:$0xff] %v4279_v1 }
 0x509   : > { %4344 = vst [vmem:[%s6330_s13 + $0x188] sm:$0xff] %v4280_v36 }
 0x50a   : > { %4345 = vst [vmem:[%s6330_s13 + $0x190] sm:$0xff] %v4281_v32 }
 0x50b   : > { %4346 = vst [vmem:[%s6330_s13 + $0x198] sm:$0xff] %v4282_v10 }
 0x50c   : > { %4347 = vst [vmem:[%s6330_s13 + $0x1a0] sm:$0xff] %v4283_v17 }
 0x50d   : > { %4348 = vst [vmem:[%s6330_s13 + $0x1a8] sm:$0xff] %v4284_v42 }
 0x50e   : > { %4349 = vst [vmem:[%s6330_s13 + $0x1b0] sm:$0xff] %v4285_v4 }
 0x50f   : > { %4350 = vst [vmem:[%s6330_s13 + $0x1b8] sm:$0xff] %v4286_v60 }
 0x510   : > { %4351 = vst [vmem:[%s6330_s13 + $0x1c0] sm:$0xff] %v4287_v55 }
 0x511   : > { %4352 = vst [vmem:[%s6330_s13 + $0x1c8] sm:$0xff] %v4288_v2 }
 0x512   : > { %4353 = vst [vmem:[%s6330_s13 + $0x1d0] sm:$0xff] %v4289_v27 }
 0x513   : > { %4354 = vst [vmem:[%s6330_s13 + $0x1d8] sm:$0xff] %v4290_v8 }
 0x514   : > { %4355 = vst [vmem:[%s6330_s13 + $0x1e0] sm:$0xff] %v4291_v29 }
 0x515   : > { %4356 = vst [vmem:[%s6330_s13 + $0x1e8] sm:$0xff] %v4292_v57 }
 0x516   : > { %4357 = vst [vmem:[%s6330_s13 + $0x1f0] sm:$0xff] %v4293_v45 }
 0x517   : > { %4358 = vst [vmem:[%s6330_s13 + $0x1f8] sm:$0xff] %v4294_v34 }
 0x518 PF: > { %s29_s9 = sadd.s32 1, %s5935_s9   ;;  %s8253_s3 = sld [smem:[#allocation8_spill]] }
 0x519   : > { %p26_p2 = scmp.ge.s32.totalorder %s29_s9, 58   ;;  %s8254_s29 = smov %s5915_s30 }
 0x51a   : > { %s8255_s30 = smov %s6039_s23  ;;  %s8256_s7 = smov %s5927_s8 }
 0x51b   : > { %s8257_s0 = smov %s5931_s1  ;;  %s8258_s8 = smov %s8265_s10 }
 0x51c   :  { %28 = sbr.rel (!%p26_p2) target bundleno = 12 (0xc), region = 115 }
 0x51e   : > { %s8259_s1 = smov %s8253_s3 }

</bundles_post_ra>
